<compile_context>
chip_gen: v5e
topology: v5e:2x2
jax: 0.10.0
libtpu: 0.0.40
codegen_flags: <defaults>
</compile_context>

<pallas_src>
import jax
import jax.numpy as jnp
from jax import lax
from jax.experimental import pallas as pl
from jax.experimental.pallas import tpu as pltpu

_EPS = 1e-5  # nn.InstanceNorm2d default eps (affine=False, track_running_stats=False)


def _residual_block_kernel(x_ref, w1_ref, w2_ref, o_ref, pad_ref, im_ref):
    # x_ref  : (1, C, H, W)   one image, NCHW (no wrapper transposes)
    # w*_ref : (C, 9*C)       im2col-folded conv weights (channels-first)
    # o_ref  : (1, C, H*W)    lane-dense flattened output
    # pad_ref: (C, H+2, W+2)  VMEM scratch: reflection-padded activation
    # im_ref : (9*C, H*W)     VMEM scratch: im2col matrix (single K=9*C matmul)
    _, C, H, W = x_ref.shape
    HW = H * W

    def reflect_pad(img):
        # ReflectionPad2d(1): edge not repeated; corners via already-padded rows.
        pad_ref[:, 1:H + 1, 1:W + 1] = img
        pad_ref[:, 0:1, 1:W + 1] = img[:, 1:2, :]                  # top    <- row 1
        pad_ref[:, H + 1:H + 2, 1:W + 1] = img[:, H - 2:H - 1, :]  # bottom <- row H-2
        pad_ref[:, :, 0:1] = pad_ref[:, :, 2:3]                    # left   <- col 1
        pad_ref[:, :, W + 1:W + 2] = pad_ref[:, :, W - 1:W]        # right  <- col W-2

    def conv3x3(w2d):
        # Build im2col (9*C, H*W) with shifted (unstrided) slices, then ONE wide
        # MXU contraction: (C, 9*C) @ (9*C, H*W) -> (C, H*W), lane-dense.
        for kh in range(3):
            for kw in range(3):
                r = (kh * 3 + kw) * C
                im_ref[r:r + C, :] = pad_ref[:, kh:kh + H, kw:kw + W].reshape(C, HW)
        return jnp.dot(w2d, im_ref[...], preferred_element_type=jnp.float32)

    def instance_norm(z):
        mean = jnp.mean(z, axis=1, keepdims=True)
        var = jnp.mean(jnp.square(z - mean), axis=1, keepdims=True)
        return (z - mean) * lax.rsqrt(var + _EPS)

    x = x_ref[0].astype(jnp.float32)                               # (C, H, W)

    # conv1 -> InstanceNorm -> ReLU
    reflect_pad(x)
    y = conv3x3(w1_ref[...].astype(jnp.float32))
    y = jnp.maximum(instance_norm(y), 0.0)

    # conv2 -> InstanceNorm
    reflect_pad(y.reshape(C, H, W))
    z = instance_norm(conv3x3(w2_ref[...].astype(jnp.float32)))

    # residual add + lane-dense store (last dim = H*W)
    o_ref[0] = (z + x.reshape(C, HW)).astype(o_ref.dtype)


def _fold_conv_weight(w_oihw):
    """(Cout, Cin, 3, 3) -> (Cout, 9*Cin); row order r = (kh*3 + kw)*Cin + ci
    must match the kernel's im2col stacking."""
    Cout, Cin, KH, KW = w_oihw.shape
    return jnp.transpose(w_oihw, (2, 3, 1, 0)).reshape(KH * KW * Cin, Cout).T


def residual_block_forward(x_nchw, w1_oihw, w2_oihw):
    """ResidualBlock.forward: IN2(conv2(relu(IN1(conv1(x))))) + x (NCHW in/out)."""
    N, C, H, W = x_nchw.shape
    assert w1_oihw.shape == (C, C, 3, 3) and w2_oihw.shape == (C, C, 3, 3)
    assert H >= 2 and W >= 2, "ReflectionPad2d(1) requires H, W >= 2"

    w1 = _fold_conv_weight(w1_oihw).astype(jnp.float32)
    w2 = _fold_conv_weight(w2_oihw).astype(jnp.float32)
    HW = H * W

    cost = pl.CostEstimate(
        flops=2 * (2 * N * HW * 9 * C * C),      # two 3x3 convs
        transcendentals=2 * N * C,               # one rsqrt per (sample, channel, IN)
        bytes_accessed=4 * (2 * N * C * HW + 2 * 9 * C * C),
    )

    out_flat = pl.pallas_call(
        _residual_block_kernel,
        out_shape=jax.ShapeDtypeStruct((N, C, HW), x_nchw.dtype),
        grid=(N,),
        in_specs=[
            pl.BlockSpec((1, C, H, W), lambda n: (n, 0, 0, 0)),
            pl.BlockSpec((C, 9 * C), lambda n: (0, 0)),
            pl.BlockSpec((C, 9 * C), lambda n: (0, 0)),
        ],
        out_specs=pl.BlockSpec((1, C, HW), lambda n: (n, 0, 0)),
        scratch_shapes=[
            pltpu.VMEM((C, H + 2, W + 2), jnp.float32),   # padded activation
            pltpu.VMEM((9 * C, HW), jnp.float32),         # im2col matrix
        ],
        compiler_params=pltpu.CompilerParams(dimension_semantics=("parallel",)),
        cost_estimate=cost,
    )(x_nchw, w1, w2)

    # (N, C, H*W) -> (N, C, H, W): same row-major memory layout, free reshape.
    return out_flat.reshape(N, C, H, W)


# ----------------------------- pure-JAX reference -----------------------------
def _ref_residual_block(x, w1, w2, eps=_EPS):
    def conv_layer(h, w):
        hp = jnp.pad(h, ((0, 0), (0, 0), (1, 1), (1, 1)), mode="reflect")
        return lax.conv_general_dilated(
            hp, w, (1, 1), "VALID",
            dimension_numbers=("NCHW", "OIHW", "NCHW"),
            precision=lax.Precision.HIGHEST)

    def instance_norm(h):
        mean = h.mean(axis=(2, 3), keepdims=True)
        var = ((h - mean) ** 2).mean(axis=(2, 3), keepdims=True)
        return (h - mean) / jnp.sqrt(var + eps)

    out = jax.nn.relu(instance_norm(conv_layer(x, w1)))
    out = instance_norm(conv_layer(out, w2))
    return out + x


if __name__ == "__main__":
    # ResidualBlock(in_channel=4) on a small NCHW input.  W=128 keeps the
    # flattened spatial axis lane-aligned, so every in-kernel (C,H,W)<->(C,H*W)
    # reshape collapses/splits whole 128-lane rows and all stores are lane-dense.
    N, C, H, W = 2, 4, 8, 128
    key = jax.random.PRNGKey(0)
    kx, k1, k2 = jax.random.split(key, 3)
    x = jax.random.normal(kx, (N, C, H, W), dtype=jnp.float32)
    w1 = 0.1 * jax.random.normal(k1, (C, C, 3, 3), dtype=jnp.float32)
    w2 = 0.1 * jax.random.normal(k2, (C, C, 3, 3), dtype=jnp.float32)

    out = jax.block_until_ready(residual_block_forward(x, w1, w2))

    ref = _ref_residual_block(x, w1, w2)
    assert out.shape == ref.shape, (out.shape, ref.shape)
    max_err = float(jnp.max(jnp.abs(out - ref)))
    assert jnp.allclose(out, ref, atol=1e-3, rtol=1e-3), max_err
    print("KERNEL_OK")
</pallas_src>

<mosaic_0001>
module attributes {stable_mosaic.version = 11 : i64} {
  func.func @_residual_block_kernel(%arg0: i32, %arg1: memref<1x4x8x128xf32, #tpu.memory_space<vmem>>, %arg2: memref<4x36xf32, #tpu.memory_space<vmem>>, %arg3: memref<4x36xf32, #tpu.memory_space<vmem>>, %arg4: memref<1x4x1024xf32, #tpu.memory_space<vmem>>, %arg5: memref<4x10x130xf32, #tpu.memory_space<vmem>>, %arg6: memref<36x1024xf32, #tpu.memory_space<vmem>>) attributes {dimension_semantics = [#tpu.dimension_semantics<parallel>], iteration_bounds = array<i64: 2>, scalar_prefetch = 0 : i64, scratch_operands = 2 : i64, tpu.core_type = #tpu.core_type<tc>, window_params = [{transform_indices = @transform_0, window_bounds = array<i64: 1, 4, 8, 128>}, {pipeline_mode = #tpu.pipeline_mode<synchronous>, transform_indices = @transform_1, window_bounds = array<i64: 4, 36>}, {pipeline_mode = #tpu.pipeline_mode<synchronous>, transform_indices = @transform_2, window_bounds = array<i64: 4, 36>}, {transform_indices = @transform_3, window_bounds = array<i64: 1, 4, 1024>}]} {
    %c0 = arith.constant 0 : index
    %c0_0 = arith.constant 0 : index
    %c0_1 = arith.constant 0 : index
    %c0_2 = arith.constant 0 : index
    %0 = vector.load %arg1[%c0, %c0_0, %c0_1, %c0_2] : memref<1x4x8x128xf32, #tpu.memory_space<vmem>>, vector<1x4x8x128xf32>
    %1 = vector.shape_cast %0 : vector<1x4x8x128xf32> to vector<4x8x128xf32>
    %c0_3 = arith.constant 0 : index
    %c1 = arith.constant 1 : index
    %c1_4 = arith.constant 1 : index
    %2 = vector.load %arg5[%c0_3, %c1, %c1_4] : memref<4x10x130xf32, #tpu.memory_space<vmem>>, vector<4x8x128xf32>
    tpu.vector_store %arg5[%c0_3, %c1, %c1_4], %1 {strides = array<i32>} : memref<4x10x130xf32, #tpu.memory_space<vmem>>, vector<4x8x128xf32>,
    %3 = vector.extract_strided_slice %1 {offsets = [0, 1, 0], sizes = [4, 1, 128], strides = [1, 1, 1]} : vector<4x8x128xf32> to vector<4x1x128xf32>
    %c0_5 = arith.constant 0 : index
    %c0_6 = arith.constant 0 : index
    %c1_7 = arith.constant 1 : index
    %4 = vector.load %arg5[%c0_5, %c0_6, %c1_7] : memref<4x10x130xf32, #tpu.memory_space<vmem>>, vector<4x1x128xf32>
    tpu.vector_store %arg5[%c0_5, %c0_6, %c1_7], %3 {strides = array<i32>} : memref<4x10x130xf32, #tpu.memory_space<vmem>>, vector<4x1x128xf32>,
    %5 = vector.extract_strided_slice %1 {offsets = [0, 6, 0], sizes = [4, 1, 128], strides = [1, 1, 1]} : vector<4x8x128xf32> to vector<4x1x128xf32>
    %c0_8 = arith.constant 0 : index
    %c9 = arith.constant 9 : index
    %c1_9 = arith.constant 1 : index
    %6 = vector.load %arg5[%c0_8, %c9, %c1_9] : memref<4x10x130xf32, #tpu.memory_space<vmem>>, vector<4x1x128xf32>
    tpu.vector_store %arg5[%c0_8, %c9, %c1_9], %5 {strides = array<i32>} : memref<4x10x130xf32, #tpu.memory_space<vmem>>, vector<4x1x128xf32>,
    %c0_10 = arith.constant 0 : index
    %c0_11 = arith.constant 0 : index
    %c2 = arith.constant 2 : index
    %7 = vector.load %arg5[%c0_10, %c0_11, %c2] : memref<4x10x130xf32, #tpu.memory_space<vmem>>, vector<4x10x1xf32>
    %c0_12 = arith.constant 0 : index
    %c0_13 = arith.constant 0 : index
    %c0_14 = arith.constant 0 : index
    %8 = vector.load %arg5[%c0_12, %c0_13, %c0_14] : memref<4x10x130xf32, #tpu.memory_space<vmem>>, vector<4x10x1xf32>
    tpu.vector_store %arg5[%c0_12, %c0_13, %c0_14], %7 {strides = array<i32>} : memref<4x10x130xf32, #tpu.memory_space<vmem>>, vector<4x10x1xf32>,
    %c0_15 = arith.constant 0 : index
    %c0_16 = arith.constant 0 : index
    %c127 = arith.constant 127 : index
    %9 = vector.load %arg5[%c0_15, %c0_16, %c127] : memref<4x10x130xf32, #tpu.memory_space<vmem>>, vector<4x10x1xf32>
    %c0_17 = arith.constant 0 : index
    %c0_18 = arith.constant 0 : index
    %c129 = arith.constant 129 : index
    %10 = vector.load %arg5[%c0_17, %c0_18, %c129] : memref<4x10x130xf32, #tpu.memory_space<vmem>>, vector<4x10x1xf32>
    tpu.vector_store %arg5[%c0_17, %c0_18, %c129], %9 {strides = array<i32>} : memref<4x10x130xf32, #tpu.memory_space<vmem>>, vector<4x10x1xf32>,
    %c0_19 = arith.constant 0 : index
    %c0_20 = arith.constant 0 : index
    %11 = vector.load %arg2[%c0_19, %c0_20] : memref<4x36xf32, #tpu.memory_space<vmem>>, vector<4x36xf32>
    %c0_21 = arith.constant 0 : index
    %c0_22 = arith.constant 0 : index
    %c0_23 = arith.constant 0 : index
    %12 = vector.load %arg5[%c0_21, %c0_22, %c0_23] : memref<4x10x130xf32, #tpu.memory_space<vmem>>, vector<4x8x128xf32>
    %13 = vector.shape_cast %12 : vector<4x8x128xf32> to vector<4x1024xf32>
    %c0_24 = arith.constant 0 : index
    %c0_25 = arith.constant 0 : index
    %14 = vector.load %arg6[%c0_24, %c0_25] : memref<36x1024xf32, #tpu.memory_space<vmem>>, vector<4x1024xf32>
    tpu.vector_store %arg6[%c0_24, %c0_25], %13 {strides = array<i32>} : memref<36x1024xf32, #tpu.memory_space<vmem>>, vector<4x1024xf32>,
    %c0_26 = arith.constant 0 : index
    %c0_27 = arith.constant 0 : index
    %c1_28 = arith.constant 1 : index
    %15 = vector.load %arg5[%c0_26, %c0_27, %c1_28] : memref<4x10x130xf32, #tpu.memory_space<vmem>>, vector<4x8x128xf32>
    %16 = vector.shape_cast %15 : vector<4x8x128xf32> to vector<4x1024xf32>
    %c4 = arith.constant 4 : index
    %c0_29 = arith.constant 0 : index
    %17 = vector.load %arg6[%c4, %c0_29] : memref<36x1024xf32, #tpu.memory_space<vmem>>, vector<4x1024xf32>
    tpu.vector_store %arg6[%c4, %c0_29], %16 {strides = array<i32>} : memref<36x1024xf32, #tpu.memory_space<vmem>>, vector<4x1024xf32>,
    %c0_30 = arith.constant 0 : index
    %c0_31 = arith.constant 0 : index
    %c2_32 = arith.constant 2 : index
    %18 = vector.load %arg5[%c0_30, %c0_31, %c2_32] : memref<4x10x130xf32, #tpu.memory_space<vmem>>, vector<4x8x128xf32>
    %19 = vector.shape_cast %18 : vector<4x8x128xf32> to vector<4x1024xf32>
    %c8 = arith.constant 8 : index
    %c0_33 = arith.constant 0 : index
    %20 = vector.load %arg6[%c8, %c0_33] : memref<36x1024xf32, #tpu.memory_space<vmem>>, vector<4x1024xf32>
    tpu.vector_store %arg6[%c8, %c0_33], %19 {strides = array<i32>} : memref<36x1024xf32, #tpu.memory_space<vmem>>, vector<4x1024xf32>,
    %c0_34 = arith.constant 0 : index
    %c1_35 = arith.constant 1 : index
    %c0_36 = arith.constant 0 : index
    %21 = vector.load %arg5[%c0_34, %c1_35, %c0_36] : memref<4x10x130xf32, #tpu.memory_space<vmem>>, vector<4x8x128xf32>
    %22 = vector.shape_cast %21 : vector<4x8x128xf32> to vector<4x1024xf32>
    %c12 = arith.constant 12 : index
    %c0_37 = arith.constant 0 : index
    %23 = vector.load %arg6[%c12, %c0_37] : memref<36x1024xf32, #tpu.memory_space<vmem>>, vector<4x1024xf32>
    tpu.vector_store %arg6[%c12, %c0_37], %22 {strides = array<i32>} : memref<36x1024xf32, #tpu.memory_space<vmem>>, vector<4x1024xf32>,
    %c0_38 = arith.constant 0 : index
    %c1_39 = arith.constant 1 : index
    %c1_40 = arith.constant 1 : index
    %24 = vector.load %arg5[%c0_38, %c1_39, %c1_40] : memref<4x10x130xf32, #tpu.memory_space<vmem>>, vector<4x8x128xf32>
    %25 = vector.shape_cast %24 : vector<4x8x128xf32> to vector<4x1024xf32>
    %c16 = arith.constant 16 : index
    %c0_41 = arith.constant 0 : index
    %26 = vector.load %arg6[%c16, %c0_41] : memref<36x1024xf32, #tpu.memory_space<vmem>>, vector<4x1024xf32>
    tpu.vector_store %arg6[%c16, %c0_41], %25 {strides = array<i32>} : memref<36x1024xf32, #tpu.memory_space<vmem>>, vector<4x1024xf32>,
    %c0_42 = arith.constant 0 : index
    %c1_43 = arith.constant 1 : index
    %c2_44 = arith.constant 2 : index
    %27 = vector.load %arg5[%c0_42, %c1_43, %c2_44] : memref<4x10x130xf32, #tpu.memory_space<vmem>>, vector<4x8x128xf32>
    %28 = vector.shape_cast %27 : vector<4x8x128xf32> to vector<4x1024xf32>
    %c20 = arith.constant 20 : index
    %c0_45 = arith.constant 0 : index
    %29 = vector.load %arg6[%c20, %c0_45] : memref<36x1024xf32, #tpu.memory_space<vmem>>, vector<4x1024xf32>
    tpu.vector_store %arg6[%c20, %c0_45], %28 {strides = array<i32>} : memref<36x1024xf32, #tpu.memory_space<vmem>>, vector<4x1024xf32>,
    %c0_46 = arith.constant 0 : index
    %c2_47 = arith.constant 2 : index
    %c0_48 = arith.constant 0 : index
    %30 = vector.load %arg5[%c0_46, %c2_47, %c0_48] : memref<4x10x130xf32, #tpu.memory_space<vmem>>, vector<4x8x128xf32>
    %31 = vector.shape_cast %30 : vector<4x8x128xf32> to vector<4x1024xf32>
    %c24 = arith.constant 24 : index
    %c0_49 = arith.constant 0 : index
    %32 = vector.load %arg6[%c24, %c0_49] : memref<36x1024xf32, #tpu.memory_space<vmem>>, vector<4x1024xf32>
    tpu.vector_store %arg6[%c24, %c0_49], %31 {strides = array<i32>} : memref<36x1024xf32, #tpu.memory_space<vmem>>, vector<4x1024xf32>,
    %c0_50 = arith.constant 0 : index
    %c2_51 = arith.constant 2 : index
    %c1_52 = arith.constant 1 : index
    %33 = vector.load %arg5[%c0_50, %c2_51, %c1_52] : memref<4x10x130xf32, #tpu.memory_space<vmem>>, vector<4x8x128xf32>
    %34 = vector.shape_cast %33 : vector<4x8x128xf32> to vector<4x1024xf32>
    %c28 = arith.constant 28 : index
    %c0_53 = arith.constant 0 : index
    %35 = vector.load %arg6[%c28, %c0_53] : memref<36x1024xf32, #tpu.memory_space<vmem>>, vector<4x1024xf32>
    tpu.vector_store %arg6[%c28, %c0_53], %34 {strides = array<i32>} : memref<36x1024xf32, #tpu.memory_space<vmem>>, vector<4x1024xf32>,
    %c0_54 = arith.constant 0 : index
    %c2_55 = arith.constant 2 : index
    %c2_56 = arith.constant 2 : index
    %36 = vector.load %arg5[%c0_54, %c2_55, %c2_56] : memref<4x10x130xf32, #tpu.memory_space<vmem>>, vector<4x8x128xf32>
    %37 = vector.shape_cast %36 : vector<4x8x128xf32> to vector<4x1024xf32>
    %c32 = arith.constant 32 : index
    %c0_57 = arith.constant 0 : index
    %38 = vector.load %arg6[%c32, %c0_57] : memref<36x1024xf32, #tpu.memory_space<vmem>>, vector<4x1024xf32>
    tpu.vector_store %arg6[%c32, %c0_57], %37 {strides = array<i32>} : memref<36x1024xf32, #tpu.memory_space<vmem>>, vector<4x1024xf32>,
    %c0_58 = arith.constant 0 : index
    %c0_59 = arith.constant 0 : index
    %39 = vector.load %arg6[%c0_58, %c0_59] : memref<36x1024xf32, #tpu.memory_space<vmem>>, vector<36x1024xf32>
    %cst = arith.constant dense<0.000000e+00> : vector<4x1024xf32>
    %40 = tpu.matmul %11, %39, %cst {dimension_numbers = #tpu.dot_dimension_numbers<[1], [0], [0], [1], [0, 0, 1, 1], [], []>} : vector<4x36xf32>, vector<36x1024xf32>, vector<4x1024xf32> -> vector<4x1024xf32>
    %cst_60 = arith.constant dense<0.000000e+00> : vector<4xf32>
    %41 = vector.multi_reduction <add>, %40, %cst_60 [1] : vector<4x1024xf32> to vector<4xf32>
    %42 = vector.shape_cast %41 : vector<4xf32> to vector<4x1xf32>
    %cst_61 = arith.constant 1.024000e+03 : f32
    %43 = vector.broadcast %cst_61 : f32 to vector<4x1xf32>
    %44 = arith.divf %42, %43 : vector<4x1xf32>
    %45 = vector.broadcast %44 : vector<4x1xf32> to vector<4x1024xf32>
    %46 = arith.subf %40, %45 : vector<4x1024xf32>
    %47 = arith.mulf %46, %46 : vector<4x1024xf32>
    %cst_62 = arith.constant dense<0.000000e+00> : vector<4xf32>
    %48 = vector.multi_reduction <add>, %47, %cst_62 [1] : vector<4x1024xf32> to vector<4xf32>
    %49 = vector.shape_cast %48 : vector<4xf32> to vector<4x1xf32>
    %cst_63 = arith.constant 1.024000e+03 : f32
    %50 = vector.broadcast %cst_63 : f32 to vector<4x1xf32>
    %51 = arith.divf %49, %50 : vector<4x1xf32>
    %52 = vector.broadcast %44 : vector<4x1xf32> to vector<4x1024xf32>
    %53 = arith.subf %40, %52 : vector<4x1024xf32>
    %cst_64 = arith.constant 9.99999974E-6 : f32
    %54 = vector.broadcast %cst_64 : f32 to vector<4x1xf32>
    %55 = arith.addf %51, %54 : vector<4x1xf32>
    %56 = math.rsqrt %55 : vector<4x1xf32>
    %57 = vector.broadcast %56 : vector<4x1xf32> to vector<4x1024xf32>
    %58 = arith.mulf %53, %57 : vector<4x1024xf32>
    %cst_65 = arith.constant 0.000000e+00 : f32
    %59 = vector.broadcast %cst_65 : f32 to vector<4x1024xf32>
    %60 = arith.maximumf %58, %59 : vector<4x1024xf32>
    %61 = vector.shape_cast %60 : vector<4x1024xf32> to vector<4x8x128xf32>
    %c0_66 = arith.constant 0 : index
    %c1_67 = arith.constant 1 : index
    %c1_68 = arith.constant 1 : index
    %62 = vector.load %arg5[%c0_66, %c1_67, %c1_68] : memref<4x10x130xf32, #tpu.memory_space<vmem>>, vector<4x8x128xf32>
    tpu.vector_store %arg5[%c0_66, %c1_67, %c1_68], %61 {strides = array<i32>} : memref<4x10x130xf32, #tpu.memory_space<vmem>>, vector<4x8x128xf32>,
    %63 = vector.extract_strided_slice %61 {offsets = [0, 1, 0], sizes = [4, 1, 128], strides = [1, 1, 1]} : vector<4x8x128xf32> to vector<4x1x128xf32>
    %c0_69 = arith.constant 0 : index
    %c0_70 = arith.constant 0 : index
    %c1_71 = arith.constant 1 : index
    %64 = vector.load %arg5[%c0_69, %c0_70, %c1_71] : memref<4x10x130xf32, #tpu.memory_space<vmem>>, vector<4x1x128xf32>
    tpu.vector_store %arg5[%c0_69, %c0_70, %c1_71], %63 {strides = array<i32>} : memref<4x10x130xf32, #tpu.memory_space<vmem>>, vector<4x1x128xf32>,
    %65 = vector.extract_strided_slice %61 {offsets = [0, 6, 0], sizes = [4, 1, 128], strides = [1, 1, 1]} : vector<4x8x128xf32> to vector<4x1x128xf32>
    %c0_72 = arith.constant 0 : index
    %c9_73 = arith.constant 9 : index
    %c1_74 = arith.constant 1 : index
    %66 = vector.load %arg5[%c0_72, %c9_73, %c1_74] : memref<4x10x130xf32, #tpu.memory_space<vmem>>, vector<4x1x128xf32>
    tpu.vector_store %arg5[%c0_72, %c9_73, %c1_74], %65 {strides = array<i32>} : memref<4x10x130xf32, #tpu.memory_space<vmem>>, vector<4x1x128xf32>,
    %c0_75 = arith.constant 0 : index
    %c0_76 = arith.constant 0 : index
    %c2_77 = arith.constant 2 : index
    %67 = vector.load %arg5[%c0_75, %c0_76, %c2_77] : memref<4x10x130xf32, #tpu.memory_space<vmem>>, vector<4x10x1xf32>
    %c0_78 = arith.constant 0 : index
    %c0_79 = arith.constant 0 : index
    %c0_80 = arith.constant 0 : index
    %68 = vector.load %arg5[%c0_78, %c0_79, %c0_80] : memref<4x10x130xf32, #tpu.memory_space<vmem>>, vector<4x10x1xf32>
    tpu.vector_store %arg5[%c0_78, %c0_79, %c0_80], %67 {strides = array<i32>} : memref<4x10x130xf32, #tpu.memory_space<vmem>>, vector<4x10x1xf32>,
    %c0_81 = arith.constant 0 : index
    %c0_82 = arith.constant 0 : index
    %c127_83 = arith.constant 127 : index
    %69 = vector.load %arg5[%c0_81, %c0_82, %c127_83] : memref<4x10x130xf32, #tpu.memory_space<vmem>>, vector<4x10x1xf32>
    %c0_84 = arith.constant 0 : index
    %c0_85 = arith.constant 0 : index
    %c129_86 = arith.constant 129 : index
    %70 = vector.load %arg5[%c0_84, %c0_85, %c129_86] : memref<4x10x130xf32, #tpu.memory_space<vmem>>, vector<4x10x1xf32>
    tpu.vector_store %arg5[%c0_84, %c0_85, %c129_86], %69 {strides = array<i32>} : memref<4x10x130xf32, #tpu.memory_space<vmem>>, vector<4x10x1xf32>,
    %c0_87 = arith.constant 0 : index
    %c0_88 = arith.constant 0 : index
    %71 = vector.load %arg3[%c0_87, %c0_88] : memref<4x36xf32, #tpu.memory_space<vmem>>, vector<4x36xf32>
    %c0_89 = arith.constant 0 : index
    %c0_90 = arith.constant 0 : index
    %c0_91 = arith.constant 0 : index
    %72 = vector.load %arg5[%c0_89, %c0_90, %c0_91] : memref<4x10x130xf32, #tpu.memory_space<vmem>>, vector<4x8x128xf32>
    %73 = vector.shape_cast %72 : vector<4x8x128xf32> to vector<4x1024xf32>
    %c0_92 = arith.constant 0 : index
    %c0_93 = arith.constant 0 : index
    %74 = vector.load %arg6[%c0_92, %c0_93] : memref<36x1024xf32, #tpu.memory_space<vmem>>, vector<4x1024xf32>
    tpu.vector_store %arg6[%c0_92, %c0_93], %73 {strides = array<i32>} : memref<36x1024xf32, #tpu.memory_space<vmem>>, vector<4x1024xf32>,
    %c0_94 = arith.constant 0 : index
    %c0_95 = arith.constant 0 : index
    %c1_96 = arith.constant 1 : index
    %75 = vector.load %arg5[%c0_94, %c0_95, %c1_96] : memref<4x10x130xf32, #tpu.memory_space<vmem>>, vector<4x8x128xf32>
    %76 = vector.shape_cast %75 : vector<4x8x128xf32> to vector<4x1024xf32>
    %c4_97 = arith.constant 4 : index
    %c0_98 = arith.constant 0 : index
    %77 = vector.load %arg6[%c4_97, %c0_98] : memref<36x1024xf32, #tpu.memory_space<vmem>>, vector<4x1024xf32>
    tpu.vector_store %arg6[%c4_97, %c0_98], %76 {strides = array<i32>} : memref<36x1024xf32, #tpu.memory_space<vmem>>, vector<4x1024xf32>,
    %c0_99 = arith.constant 0 : index
    %c0_100 = arith.constant 0 : index
    %c2_101 = arith.constant 2 : index
    %78 = vector.load %arg5[%c0_99, %c0_100, %c2_101] : memref<4x10x130xf32, #tpu.memory_space<vmem>>, vector<4x8x128xf32>
    %79 = vector.shape_cast %78 : vector<4x8x128xf32> to vector<4x1024xf32>
    %c8_102 = arith.constant 8 : index
    %c0_103 = arith.constant 0 : index
    %80 = vector.load %arg6[%c8_102, %c0_103] : memref<36x1024xf32, #tpu.memory_space<vmem>>, vector<4x1024xf32>
    tpu.vector_store %arg6[%c8_102, %c0_103], %79 {strides = array<i32>} : memref<36x1024xf32, #tpu.memory_space<vmem>>, vector<4x1024xf32>,
    %c0_104 = arith.constant 0 : index
    %c1_105 = arith.constant 1 : index
    %c0_106 = arith.constant 0 : index
    %81 = vector.load %arg5[%c0_104, %c1_105, %c0_106] : memref<4x10x130xf32, #tpu.memory_space<vmem>>, vector<4x8x128xf32>
    %82 = vector.shape_cast %81 : vector<4x8x128xf32> to vector<4x1024xf32>
    %c12_107 = arith.constant 12 : index
    %c0_108 = arith.constant 0 : index
    %83 = vector.load %arg6[%c12_107, %c0_108] : memref<36x1024xf32, #tpu.memory_space<vmem>>, vector<4x1024xf32>
    tpu.vector_store %arg6[%c12_107, %c0_108], %82 {strides = array<i32>} : memref<36x1024xf32, #tpu.memory_space<vmem>>, vector<4x1024xf32>,
    %c0_109 = arith.constant 0 : index
    %c1_110 = arith.constant 1 : index
    %c1_111 = arith.constant 1 : index
    %84 = vector.load %arg5[%c0_109, %c1_110, %c1_111] : memref<4x10x130xf32, #tpu.memory_space<vmem>>, vector<4x8x128xf32>
    %85 = vector.shape_cast %84 : vector<4x8x128xf32> to vector<4x1024xf32>
    %c16_112 = arith.constant 16 : index
    %c0_113 = arith.constant 0 : index
    %86 = vector.load %arg6[%c16_112, %c0_113] : memref<36x1024xf32, #tpu.memory_space<vmem>>, vector<4x1024xf32>
    tpu.vector_store %arg6[%c16_112, %c0_113], %85 {strides = array<i32>} : memref<36x1024xf32, #tpu.memory_space<vmem>>, vector<4x1024xf32>,
    %c0_114 = arith.constant 0 : index
    %c1_115 = arith.constant 1 : index
    %c2_116 = arith.constant 2 : index
    %87 = vector.load %arg5[%c0_114, %c1_115, %c2_116] : memref<4x10x130xf32, #tpu.memory_space<vmem>>, vector<4x8x128xf32>
    %88 = vector.shape_cast %87 : vector<4x8x128xf32> to vector<4x1024xf32>
    %c20_117 = arith.constant 20 : index
    %c0_118 = arith.constant 0 : index
    %89 = vector.load %arg6[%c20_117, %c0_118] : memref<36x1024xf32, #tpu.memory_space<vmem>>, vector<4x1024xf32>
    tpu.vector_store %arg6[%c20_117, %c0_118], %88 {strides = array<i32>} : memref<36x1024xf32, #tpu.memory_space<vmem>>, vector<4x1024xf32>,
    %c0_119 = arith.constant 0 : index
    %c2_120 = arith.constant 2 : index
    %c0_121 = arith.constant 0 : index
    %90 = vector.load %arg5[%c0_119, %c2_120, %c0_121] : memref<4x10x130xf32, #tpu.memory_space<vmem>>, vector<4x8x128xf32>
    %91 = vector.shape_cast %90 : vector<4x8x128xf32> to vector<4x1024xf32>
    %c24_122 = arith.constant 24 : index
    %c0_123 = arith.constant 0 : index
    %92 = vector.load %arg6[%c24_122, %c0_123] : memref<36x1024xf32, #tpu.memory_space<vmem>>, vector<4x1024xf32>
    tpu.vector_store %arg6[%c24_122, %c0_123], %91 {strides = array<i32>} : memref<36x1024xf32, #tpu.memory_space<vmem>>, vector<4x1024xf32>,
    %c0_124 = arith.constant 0 : index
    %c2_125 = arith.constant 2 : index
    %c1_126 = arith.constant 1 : index
    %93 = vector.load %arg5[%c0_124, %c2_125, %c1_126] : memref<4x10x130xf32, #tpu.memory_space<vmem>>, vector<4x8x128xf32>
    %94 = vector.shape_cast %93 : vector<4x8x128xf32> to vector<4x1024xf32>
    %c28_127 = arith.constant 28 : index
    %c0_128 = arith.constant 0 : index
    %95 = vector.load %arg6[%c28_127, %c0_128] : memref<36x1024xf32, #tpu.memory_space<vmem>>, vector<4x1024xf32>
    tpu.vector_store %arg6[%c28_127, %c0_128], %94 {strides = array<i32>} : memref<36x1024xf32, #tpu.memory_space<vmem>>, vector<4x1024xf32>,
    %c0_129 = arith.constant 0 : index
    %c2_130 = arith.constant 2 : index
    %c2_131 = arith.constant 2 : index
    %96 = vector.load %arg5[%c0_129, %c2_130, %c2_131] : memref<4x10x130xf32, #tpu.memory_space<vmem>>, vector<4x8x128xf32>
    %97 = vector.shape_cast %96 : vector<4x8x128xf32> to vector<4x1024xf32>
    %c32_132 = arith.constant 32 : index
    %c0_133 = arith.constant 0 : index
    %98 = vector.load %arg6[%c32_132, %c0_133] : memref<36x1024xf32, #tpu.memory_space<vmem>>, vector<4x1024xf32>
    tpu.vector_store %arg6[%c32_132, %c0_133], %97 {strides = array<i32>} : memref<36x1024xf32, #tpu.memory_space<vmem>>, vector<4x1024xf32>,
    %c0_134 = arith.constant 0 : index
    %c0_135 = arith.constant 0 : index
    %99 = vector.load %arg6[%c0_134, %c0_135] : memref<36x1024xf32, #tpu.memory_space<vmem>>, vector<36x1024xf32>
    %cst_136 = arith.constant dense<0.000000e+00> : vector<4x1024xf32>
    %100 = tpu.matmul %71, %99, %cst_136 {dimension_numbers = #tpu.dot_dimension_numbers<[1], [0], [0], [1], [0, 0, 1, 1], [], []>} : vector<4x36xf32>, vector<36x1024xf32>, vector<4x1024xf32> -> vector<4x1024xf32>
    %cst_137 = arith.constant dense<0.000000e+00> : vector<4xf32>
    %101 = vector.multi_reduction <add>, %100, %cst_137 [1] : vector<4x1024xf32> to vector<4xf32>
    %102 = vector.shape_cast %101 : vector<4xf32> to vector<4x1xf32>
    %cst_138 = arith.constant 1.024000e+03 : f32
    %103 = vector.broadcast %cst_138 : f32 to vector<4x1xf32>
    %104 = arith.divf %102, %103 : vector<4x1xf32>
    %105 = vector.broadcast %104 : vector<4x1xf32> to vector<4x1024xf32>
    %106 = arith.subf %100, %105 : vector<4x1024xf32>
    %107 = arith.mulf %106, %106 : vector<4x1024xf32>
    %cst_139 = arith.constant dense<0.000000e+00> : vector<4xf32>
    %108 = vector.multi_reduction <add>, %107, %cst_139 [1] : vector<4x1024xf32> to vector<4xf32>
    %109 = vector.shape_cast %108 : vector<4xf32> to vector<4x1xf32>
    %cst_140 = arith.constant 1.024000e+03 : f32
    %110 = vector.broadcast %cst_140 : f32 to vector<4x1xf32>
    %111 = arith.divf %109, %110 : vector<4x1xf32>
    %112 = vector.broadcast %104 : vector<4x1xf32> to vector<4x1024xf32>
    %113 = arith.subf %100, %112 : vector<4x1024xf32>
    %cst_141 = arith.constant 9.99999974E-6 : f32
    %114 = vector.broadcast %cst_141 : f32 to vector<4x1xf32>
    %115 = arith.addf %111, %114 : vector<4x1xf32>
    %116 = math.rsqrt %115 : vector<4x1xf32>
    %117 = vector.broadcast %116 : vector<4x1xf32> to vector<4x1024xf32>
    %118 = arith.mulf %113, %117 : vector<4x1024xf32>
    %119 = vector.shape_cast %1 : vector<4x8x128xf32> to vector<4x1024xf32>
    %120 = arith.addf %118, %119 : vector<4x1024xf32>
    %c0_142 = arith.constant 0 : index
    %c0_143 = arith.constant 0 : index
    %c0_144 = arith.constant 0 : index
    %121 = vector.load %arg4[%c0_142, %c0_143, %c0_144] : memref<1x4x1024xf32, #tpu.memory_space<vmem>>, vector<1x4x1024xf32>
    %122 = vector.shape_cast %121 : vector<1x4x1024xf32> to vector<4x1024xf32>
    %123 = vector.shape_cast %120 : vector<4x1024xf32> to vector<1x4x1024xf32>
    tpu.vector_store %arg4[%c0_142, %c0_143, %c0_144], %123 {strides = array<i32>} : memref<1x4x1024xf32, #tpu.memory_space<vmem>>, vector<1x4x1024xf32>,
    return
  }
  func.func @transform_0(%arg0: i32) -> (i32, i32, i32, i32) {
    %c0_i32 = arith.constant 0 : i32
    %c0_i32_0 = arith.constant 0 : i32
    %c0_i32_1 = arith.constant 0 : i32
    %c0_i32_2 = arith.constant 0 : i32
    return %arg0, %c0_i32, %c0_i32_0, %c0_i32_1 : i32, i32, i32, i32
  }
  func.func @transform_1(%arg0: i32) -> (i32, i32) {
    %c0_i32 = arith.constant 0 : i32
    %c0_i32_0 = arith.constant 0 : i32
    %c0_i32_1 = arith.constant 0 : i32
    return %c0_i32, %c0_i32_0 : i32, i32
  }
  func.func @transform_2(%arg0: i32) -> (i32, i32) {
    %c0_i32 = arith.constant 0 : i32
    %c0_i32_0 = arith.constant 0 : i32
    %c0_i32_1 = arith.constant 0 : i32
    return %c0_i32, %c0_i32_0 : i32, i32
  }
  func.func @transform_3(%arg0: i32) -> (i32, i32, i32) {
    %c0_i32 = arith.constant 0 : i32
    %c0_i32_0 = arith.constant 0 : i32
    %c0_i32_1 = arith.constant 0 : i32
    return %arg0, %c0_i32, %c0_i32_0 : i32, i32, i32
  }
}

</mosaic_0001>

<bundles_post_ra>
// kernel: tpu_custom_call.1
= control target key start
LH: loop header
LB: loop body
LE: loop exit
PB: predicated region body
PF: predicated region fallthrough
CT: control target
= control target key end

     0   :  { %8 = vsyncpa [#allocation5], 0  ;;  %s5435_s0 = inlined_call_operand.hbm [shape: f32[2,4,8,128], index: 0, kind: input, shape index: {}]   ;;  %s5436_s1 = inlined_call_operand.hbm [shape: f32[4,36], index: 1, kind: input, shape index: {}]   ;;  %s5437_s2 = inlined_call_operand.hbm [shape: f32[4,36], index: 2, kind: input, shape index: {}]   ;;  %s5438_s3 = inlined_call_operand.hbm [shape: f32[2,4,1024], index: 3, kind: output, shape index: {}]  }
   0x1   :  { %10 = vsyncpa [#allocation5 + $0x1], 0 }
   0x2   :  { %11 = vsyncpa [#allocation8], 0 }
   0x3   :  { %12 = vsyncpa [#allocation6], 0 }
   0x4   :  { %14 = vsyncpa [#allocation6 + $0x1], 0  ;;  %s4083_s12 = smov 0   ;;  %s4085_s13 = smov 0  }
   0x5   :  { %s4087_s14 = smov 0   ;;  %s4089_s15 = smov 0  }
   0x6 LB: > { %s4104_s16 = sadd.s32 4294967295, %s4050_s15   ;;  %s3709_s17 = sadd.s32 4294967294, %s4050_s15   ;;  %s4050_s15 = sphi %s4089_s15, %s5471_s15   ;;  %s4046_s14 = sphi %s4087_s14, %s5470_s14   ;;  %s4042_s13 = sphi %s4085_s13, %s5469_s13   ;;  %s4038_s12 = sphi %s4083_s12, %s5468_s12  }
   0x7   : > { %s4108_s18 = sadd.s32 1, %s4050_s15   ;;  %s27_s19 = sadd.s32 1, %s4046_s14 }
   0x8   : > { %s24_s20 = ssub.s32 %s4050_s15, %s4108_s18  ;;  %p34_p0 = scmp.ne.s32.totalorder %s4046_s14, %s4042_s13 }
   0x9   : > { %p25_p1 = scmp.eq.s32.totalorder %s24_s20, 0  ;;  %p35_p2 = scmp.eq.s32.totalorder %s4050_s15, 0 }
   0xa   : > { %p40_p3 = scmp.ne.s32.totalorder %s4042_s13, %s4038_s12  ;;  %p41_p4 = scmp.eq.s32.totalorder %s4104_s16, 0 }
   0xb   : > { %s4120_s21 = scalar_select %p25_p1, %s4046_s14, %s27_s19  }
   0xc   : > { %p4122_p5 = por %p35_p2, %p34_p0  ;;  %p4128_p6 = por %p41_p4, %p40_p3 }
   0xd   : > { %p106_p7 = scmp.eq.s32.totalorder %s4104_s16, 1  ;;  %p112_p8 = scmp.eq.s32.totalorder %s3709_s17, 1 }
   0xe   : > { %p3710_p9 = scmp.ge.s32.totalorder %s4050_s15, 1  ;;  %p119_p10 = scmp.lt.s32.totalorder %s4050_s15, 3 }
   0xf   : > { %p4135_p11 = por %p106_p7, %p34_p0  ;;  %p4139_p12 = por %p112_p8, %p40_p3 }
  0x10   : > { %p4143_p13 = pnand %p3710_p9, %p119_p10  ;;  %s131_s29 = sshll.u32 %s5436_s1, 4  ;;  %s132_s29 = int_to_ptr.hbm [resolvable:$true] %s131_s29 }
  0x11   : > { %s4052_s30 = smov [#allocation7]   ;;  %p3837_p3 = scmp.lt.s32.totalorder %s4050_s15, 2 }
  0x12   : > { %p3820_p1 = pneg %p4143_p13  ;;  %s133_s4 = sshll.u32 %s4052_s30, 4  ;;  %s134_s4 = int_to_ptr.vmem [resolvable:$true] %s133_s4 }
  0x13   : > { %s143_s7 = sshll.u32 %s5437_s2, 4  ;;  %p4161_p7 = pnand %p3837_p3, %p4122_p5  ;;  %s144_s7 = int_to_ptr.hbm [resolvable:$true] %s143_s7 }
  0x14   : > { %p3821_p2 = pnand %p3820_p1, %p41_p4  ;;  %s4053_s9 = smov [#allocation9]  }
  0x15   : > { %s145_s10 = sshll.u32 %s4053_s9, 4  ;;  %s156_s11 = sand.u32 1, %s4046_s14   ;;  %s146_s10 = int_to_ptr.vmem [resolvable:$true] %s145_s10 }
  0x16   : > { %3823 = dma.hbm_to_vmem [thread:$0]  (!%p3821_p2), %s132_s29, 64, %s134_s4, [#allocation8]  }
  0x17   : > { %3826 = dma.hbm_to_vmem [thread:$0]  (!%p3821_p2), %s144_s7, 64, %s146_s10, [#allocation8]  }
  0x18   : > { %s3714_s17 = sshll.u32 %s156_s11, 5  ;;  %s3806_s19 = sshll.u32 %s4050_s15, 5 }
  0x19   : > { %s165_s28 = scalar_lea.hbm %s5435_s0, %s3806_s19  ;;  %s160_s30 = scalar_lea.vmem [#allocation4], %s3714_s17 }
  0x1a   : > { %s168_s5 = sshll.u32 %s160_s30, 4  ;;  %s166_s29 = sshll.u32 %s165_s28, 4  ;;  %s169_s5 = int_to_ptr.vmem [resolvable:$true] %s168_s5  ;;  %s167_s29 = int_to_ptr.hbm [resolvable:$true] %s166_s29 }
  0x1b   : > { %s157_s22 = scalar_lea.sflag [#allocation5], %s156_s11  ;;  %s3950_s4 = sshra.s32 %s167_s29, 4  ;;  %s3951_s4 = int_to_ptr.hbm [resolvable:$true] %s3950_s4 }
  0x1c   : > { %s3952_s6 = scalar_lea.hbm %s3951_s4, 32  ;;  %p3954_p8 = pneg %p4161_p7 }
  0x1d   : > { %p3953_p5 = scmp.ne.s32.totalorder %s3951_s4, %s3952_s6  ;;  %s3957_s10 = scalar_lea.hbm %s5435_s0, 64 }
  0x1e   : > { %p3958_p1 = scmp.lt.s32.totalorder %s3951_s4, %s5435_s0  ;;  %p3959_p2 = scmp.lt.s32.totalorder %s3957_s10, %s3952_s6 }
  0x1f   : > { %p3955_p9 = pnand %p3954_p8, %p3953_p5 }
  0x20   : > { %p3960_p3 = por %p3959_p2, %p3958_p1 }
  0x21   : > { %p3956_p10 = pneg %p3955_p9 }
  0x23   : > { %p3961_p0 = pnand %p3960_p3, %p3956_p10 }
  0x25   : > { %3964 = shalt.err (!%p3961_p0)
}
  0x26   : > { %s4054_s11 = smov 128   ;;  %s4055_s17 = smov 8  }
  0x27   : > { %3830 = dma.hbm_to_vmem [thread:$0]  (!%p4161_p7), %s167_s29, 512, %s169_s5, %s157_s22, %s4054_s11, %s4054_s11, %s4055_s17  }
  0x28   : > { %180 = sbr.rel (%p4143_p13) target bundleno = 2111 (0x83f), region = 32  ;;  %s4183_s27 = sand.u32 (!%p4143_p13), 1, %s4042_s13  }
  0x29   : > { %s3718_s28 = sshll.u32 (!%p4143_p13), %s4183_s27, 5  ;;  %s183_s30 = scalar_lea.sflag (!%p4143_p13), [#allocation5], %s4183_s27 }
  0x2a   : > { %s4189_s4 = scalar_lea.vmem (!%p4143_p13), [#allocation4], %s3718_s28 }
  0x2d   : > { %4025 = dma.done.wait (%p4128_p6), %s183_s30, 512  }
  0x2e   : > { %4027 = vsyncadd (%p4128_p6), %s183_s30, 4294966784 }
  0x2f   : > { %4029 = dma.done.wait (%p41_p4), [#allocation8], 128  }
  0x30   : > { %4031 = vsyncadd (%p41_p4), [#allocation8], 4294967168  ;;  %v222_v0 = vld [vmem:[%s4189_s4 + $0x10] sm:$0xff]  ;;  %v223_v3 = vld [vmem:[%s4189_s4 + $0x18] sm:$0xff]  ;;  %s4056_s26 = smov 1   ;;  %vm244_vm0 = vcmask 1047561  }
  0x31   : > { %v290_v1 = vrot.slane %v222_v0, 6  ;;  %v230_v2 = vrot.slane %v222_v0, 7  ;;  %v231_v4 = vrot.slane %v223_v3, 7  ;;  %v220_v5 = vld [vmem:[%s4189_s4] sm:$0xff]  ;;  %v266_v6 = vrot.slane %v222_v0, 1  ;;  %v221_v12 = vld [vmem:[%s4189_s4 + $0x8] sm:$0xff] }
  0x32   : > { %v228_v7 = vrot.slane %v220_v5, 7  ;;  %v264_v8 = vrot.slane %v220_v5, 1  ;;  %v267_v9 = vrot.slane %v223_v3, 1  ;;  %v288_v10 = vrot.slane %v220_v5, 6  ;;  %s4057_s23 = smov 126   ;;  %s4058_s8 = smov 2  }
  0x33   : > { %296 = vrot.lane.b32.xlu1 %v290_v1, %s4056_s26  ;;  %236 = vrot.lane.b32.xlu0 %v230_v2, %s4056_s26  ;;  %v291_v11 = vrot.slane %v223_v3, 6  ;;  %v229_v13 = vrot.slane %v221_v12, 7  ;;  %v265_v14 = vrot.slane %v221_v12, 1  ;;  %v289_v15 = vrot.slane %v221_v12, 6  ;;  %s4059_s5 = smov 127   ;;  %s3807_s29 = sshll.u32 %s4104_s16, 5 }
  0x34   : > { %238 = vrot.lane.b32.xlu2 %v231_v4, %s4056_s26  ;;  %vm246_vm1 = vcmask 7169   ;;  %vm248_vm2 = vcmask 1040392   ;;  %vm250_vm3 = vcmask 0   ;;  %vm352_vm4 = vcmask 7168   ;;  %s3615_s6 = scalar_lea.hbm %s5438_s3, %s3807_s29  ;;  %s219_s7 = scalar_lea.vmem [#allocation10], %s3718_s28 }
  0x35   : > { %vm354_vm5 = vcmask 1024   ;;  %vm732_vm6 = vcmask 1046528   ;;  %vm1165_vm7 = vcmask 1045504   ;;  %vm418_vm8 = vcmask 1047556   ;;  %s3617_s9 = sshll.u32 %s219_s7, 4  ;;  %s3619_s10 = sshll.u32 %s3615_s6, 4  ;;  %s3618_s9 = int_to_ptr.vmem [resolvable:$true] %s3617_s9  ;;  %s3620_s10 = int_to_ptr.hbm [resolvable:$true] %s3619_s10 }
  0x36   : > { %vm402_vm9 = vcmask 15368   ;;  %vm404_vm10 = vcmask 9224   ;;  %vm643_vm11 = vcmask 1031168   ;;  %vm5440_vm12 = vcmask 1039360   ;;  %s3604_s20 = scalar_lea.sflag [#allocation6], %s4183_s27  ;;  %s3994_s19 = sshra.s32 %s3620_s10, 4  ;;  %s3995_s19 = int_to_ptr.hbm [resolvable:$true] %s3994_s19 }
  0x37   : > { %vm1602_vm13 = vcmask 1043456   ;;  %vm5439_vm14 = vcmask 293888   ;;  %s3996_s11 = scalar_lea.hbm %s3995_s19, 32  ;;  %s4000_s30 = scalar_lea.hbm %s5438_s3, 64 }
  0x38   : > { %p3997_p4 = scmp.ne.s32.totalorder %s3995_s19, %s3996_s11  ;;  %p4001_p0 = scmp.lt.s32.totalorder %s3995_s19, %s5438_s3 }
  0x39   : > { %p4002_p7 = scmp.lt.s32.totalorder %s4000_s30, %s3996_s11 }
  0x3a   : > { %p3998_p6 = pnand %p3997_p4, %p4135_p11 }
  0x3b   : > { %272 = vrot.lane.b32.xlu0 %v266_v6, %s4056_s26  ;;  %232 = vrot.lane.b32.xlu1 %v228_v7, %s4056_s26  ;;  %p4003_p5 = por %p4002_p7, %p4001_p0 }
  0x3c   : > { %268 = vrot.lane.b32.xlu2 %v264_v8, %s4056_s26  ;;  %p3999_p13 = pneg %p3998_p6 }
  0x3e   : > { %p4004_p8 = pnand %p4003_p5, %p3999_p13 }
  0x43   : > { %274 = vrot.lane.b32.xlu0 %v267_v9, %s4056_s26  ;;  %292 = vrot.lane.b32.xlu1 %v288_v10, %s4056_s26  ;;  %v4060_v10 = vmov 1983009808  }
  0x44   : > { %298 = vrot.lane.b32.xlu2 %v291_v11, %s4056_s26  ;;  %v423_v11 = vunpack.c.l.s4 %v4060_v10 }
  0x4b   : > { %234 = vrot.lane.b32.xlu0 %v229_v13, %s4056_s26  ;;  %270 = vrot.lane.b32.xlu1 %v265_v14, %s4056_s26 }
  0x4c   : > { %294 = vrot.lane.b32.xlu2 %v289_v15, %s4056_s26 }
  0x8e   : > { %v239_v16 = vpop.permute.xlu2 %238 }
  0x8f   : > { %260 = vst.msk [vmem:[#allocation2 + $0x60] sm:$0xfe] %vm244_vm0, %v239_v16 }
  0x90   : > { %261 = vst.msk [vmem:[#allocation2 + $0x68] sm:$0xfe] %vm246_vm1, %v239_v16 }
  0x91   : > { %262 = vst.msk [vmem:[#allocation2 + $0x70] sm:$0x1] %vm248_vm2, %v239_v16 }
  0x92   : > { %263 = vst.msk [vmem:[#allocation2 + $0x78] sm:$0x1] %vm250_vm3, %v239_v16 }
  0x96   : > { %v269_v17 = vpop.permute.xlu2 %268 }
  0x97   : > { %280 = vst.msk [vmem:[#allocation2] sm:$0x1] %vm248_vm2, %v269_v17 }
  0x98   : > { %281 = vst.msk [vmem:[#allocation2 + $0x8] sm:$0x1] %vm250_vm3, %v269_v17 }
  0x9e   : > { %v299_v18 = vpop.permute.xlu2 %298 }
  0x9f   : > { %310 = vst.msk [vmem:[#allocation2 + $0x71] sm:$0x1] %vm248_vm2, %v299_v18 }
  0xa0   : > { %311 = vst.msk [vmem:[#allocation2 + $0x79] sm:$0x1] %vm250_vm3, %v299_v18 }
  0xa5   : > { %v297_v19 = vpop.permute.xlu1 %296  ;;  %v237_v20 = vpop.permute.xlu0 %236 }
  0xa6   : > { %308 = vst.msk [vmem:[#allocation2 + $0x51] sm:$0x1] %vm248_vm2, %v297_v19  ;;  %v295_v21 = vpop.permute.xlu2 %294  ;;  %v319_v31 = vld [vmem:[#allocation2 + $0x70] sm:$0x3] }
  0xa7   : > { %309 = vst.msk [vmem:[#allocation2 + $0x59] sm:$0x1] %vm250_vm3, %v297_v19 }
  0xa8   : > { %256 = vst.msk [vmem:[#allocation2 + $0x40] sm:$0xfe] %vm244_vm0, %v237_v20 }
  0xa9   : > { %257 = vst.msk [vmem:[#allocation2 + $0x48] sm:$0xfe] %vm246_vm1, %v237_v20 }
  0xaa   : > { %258 = vst.msk [vmem:[#allocation2 + $0x50] sm:$0x1] %vm248_vm2, %v237_v20 }
  0xab   : > { %259 = vst.msk [vmem:[#allocation2 + $0x58] sm:$0x1] %vm250_vm3, %v237_v20 }
  0xac   : > { %306 = vst.msk [vmem:[#allocation2 + $0x31] sm:$0x1] %vm248_vm2, %v295_v21 }
  0xad   : > { %v273_v22 = vpop.permute.xlu0 %272  ;;  %v233_v23 = vpop.permute.xlu1 %232  ;;  %307 = vst.msk [vmem:[#allocation2 + $0x39] sm:$0x1] %vm250_vm3, %v295_v21 }
  0xae   : > { %284 = vst.msk [vmem:[#allocation2 + $0x40] sm:$0x1] %vm248_vm2, %v273_v22 }
  0xaf   : > { %285 = vst.msk [vmem:[#allocation2 + $0x48] sm:$0x1] %vm250_vm3, %v273_v22 }
  0xb0   : > { %245 = vst.msk [vmem:[#allocation2] sm:$0xfe] %vm244_vm0, %v233_v23 }
  0xb1   : > { %247 = vst.msk [vmem:[#allocation2 + $0x8] sm:$0xfe] %vm246_vm1, %v233_v23  ;;  %v317_v24 = vld [vmem:[#allocation2 + $0x50] sm:$0x3] }
  0xb2   : > { %249 = vst.msk [vmem:[#allocation2 + $0x10] sm:$0x1] %vm248_vm2, %v233_v23  ;;  %338 = vrot.lane.b32.xlu1 %v317_v24, %s4057_s23  ;;  %v4061_v24 = vmov 1934713408  }
  0xb3   : > { %251 = vst.msk [vmem:[#allocation2 + $0x18] sm:$0x1] %vm250_vm3, %v233_v23 }
  0xb5   : > { %v275_v25 = vpop.permute.xlu0 %274  ;;  %v293_v26 = vpop.permute.xlu1 %292  ;;  %v316_v27 = vld [vmem:[#allocation2 + $0x40] sm:$0xff] }
  0xb6   : > { %286 = vst.msk [vmem:[#allocation2 + $0x60] sm:$0x1] %vm248_vm2, %v275_v25  ;;  %336 = vrot.lane.b32.xlu0 %v316_v27, %s4057_s23 }
  0xb7   : > { %287 = vst.msk [vmem:[#allocation2 + $0x68] sm:$0x1] %vm250_vm3, %v275_v25  ;;  %v312_v28 = vld [vmem:[#allocation2] sm:$0xff]  ;;  %v447_v25 = vunpack.c.l.s4 %v4061_v24 }
  0xb8   : > { %304 = vst.msk [vmem:[#allocation2 + $0x11] sm:$0x1] %vm248_vm2, %v293_v26  ;;  %328 = vrot.lane.b32.xlu2 %v312_v28, %s4057_s23 }
  0xb9   : > { %305 = vst.msk [vmem:[#allocation2 + $0x19] sm:$0x1] %vm250_vm3, %v293_v26 }
  0xbd   : > { %v235_v29 = vpop.permute.xlu0 %234  ;;  %v318_v30 = vld [vmem:[#allocation2 + $0x60] sm:$0xff]  ;;  %v271_v32 = vpop.permute.xlu1 %270 }
  0xbe   : > { %252 = vst.msk [vmem:[#allocation2 + $0x20] sm:$0xfe] %vm244_vm0, %v235_v29  ;;  %340 = vrot.lane.b32.xlu1 %v318_v30, %s4057_s23 }
  0xbf   : > { %253 = vst.msk [vmem:[#allocation2 + $0x28] sm:$0xfe] %vm246_vm1, %v235_v29  ;;  %v313_v33 = vld [vmem:[#allocation2 + $0x10] sm:$0x3] }
  0xc0   : > { %254 = vst.msk [vmem:[#allocation2 + $0x30] sm:$0x1] %vm248_vm2, %v235_v29  ;;  %342 = vrot.lane.b32.xlu2 %v319_v31, %s4057_s23  ;;  %330 = vrot.lane.b32.xlu0 %v313_v33, %s4057_s23 }
  0xc1   : > { %255 = vst.msk [vmem:[#allocation2 + $0x38] sm:$0x1] %vm250_vm3, %v235_v29 }
  0xc2   : > { %282 = vst.msk [vmem:[#allocation2 + $0x20] sm:$0x1] %vm248_vm2, %v271_v32 }
  0xc3   : > { %283 = vst.msk [vmem:[#allocation2 + $0x28] sm:$0x1] %vm250_vm3, %v271_v32 }
  0xc7   : > { %v315_v34 = vld [vmem:[#allocation2 + $0x30] sm:$0x3] }
  0xc8   : > { %334 = vrot.lane.b32.xlu1 %v315_v34, %s4057_s23 }
  0xc9   : > { %v314_v35 = vld [vmem:[#allocation2 + $0x20] sm:$0xff] }
  0xca   : > { %332 = vrot.lane.b32.xlu0 %v314_v35, %s4057_s23 }
 0x112   : > { %v329_v36 = vpop.permute.xlu2 %328 }
 0x113   : > { %353 = vst.msk [vmem:[#allocation2] sm:$0xff] %vm352_vm4, %v329_v36 }
 0x11a   : > { %v4256_v37 = vld [vmem:[#allocation2] sm:$0xff]  ;;  %v343_v38 = vpop.permute.xlu2 %342 }
 0x11b   : > { %361 = vst.msk [vmem:[#allocation2 + $0x70] sm:$0x3] %vm354_vm5, %v343_v38  ;;  %378 = vrot.lane.b32.xlu1 %v4256_v37, %s4058_s8  ;;  %v4273_v46 = vld [vmem:[#allocation2] sm:$0xfe]  ;;  %v420_v26 = vrot.slane %v4256_v37, 4 }
 0x11c   : > { %v1149_v47 = vld [vmem:[#allocation2] sm:$0xfc]  ;;  %v733_v51 = vrot.slane %v4273_v46, 1 }
 0x11d   : > { %v4278_v54 = vld [vmem:[#allocation2] sm:$0xfc]  ;;  %v1166_v55 = vrot.slane %v1149_v47, 2 }
 0x11e   : > { %v4286_v61 = vld [vmem:[#allocation2] sm:$0xfc]  ;;  %v1278_v8 = vrot.slane %v4278_v54, 2 }
 0x11f   : > { %v1446_v20 = vrot.slane %v4286_v61, 2 }
 0x122   : > { %v369_v39 = vld [vmem:[#allocation2 + $0x70] sm:$0x3] }
 0x123   : > { %392 = vrot.lane.b32.xlu1 %v369_v39, %s4058_s8  ;;  %v4280_v56 = vld [vmem:[#allocation2 + $0x70] sm:$0x1] }
 0x124   : > { %v339_v40 = vpop.permute.xlu1 %338  ;;  %v1156_v62 = vld [vmem:[#allocation2 + $0x70] sm:$0x3]  ;;  %v743_v17 = vrot.slane %v4280_v56, 1 }
 0x125   : > { %359 = vst.msk [vmem:[#allocation2 + $0x50] sm:$0x3] %vm354_vm5, %v339_v40  ;;  %v4291_v9 = vld [vmem:[#allocation2 + $0x70] sm:$0x3]  ;;  %v1176_v22 = vrot.slane %v1156_v62, 2  ;;  %v4333_v62 = vunpack.c.0.s8 %v447_v25 }
 0x126   : > { %v1465_v23 = vrot.slane %v4291_v9, 2  ;;  %v4307_v33 = vld [vmem:[#allocation2 + $0x70] sm:$0x1] }
 0x128   : > { %v337_v41 = vpop.permute.xlu0 %336 }
 0x129   : > { %358 = vst.msk [vmem:[#allocation2 + $0x40] sm:$0xff] %vm352_vm4, %v337_v41  ;;  %v4314_v41 = vunpack.c.0.s8 %v423_v11 }
 0x12c   : > { %v367_v42 = vld [vmem:[#allocation2 + $0x50] sm:$0x3] }
 0x12d   : > { %388 = vrot.lane.b32.xlu0 %v367_v42, %s4058_s8  ;;  %v721_v48 = vld [vmem:[#allocation2 + $0x50] sm:$0x1] }
 0x12e   : > { %v1154_v52 = vld [vmem:[#allocation2 + $0x50] sm:$0x3]  ;;  %v740_v57 = vrot.slane %v721_v48, 1 }
 0x12f   : > { %v1173_v3 = vrot.slane %v1154_v52, 2  ;;  %v1256_v5 = vld [vmem:[#allocation2 + $0x50] sm:$0x3] }
 0x130   : > { %v4265_v43 = vld [vmem:[#allocation2 + $0x40] sm:$0xff]  ;;  %v341_v44 = vpop.permute.xlu1 %340  ;;  %v1291_v19 = vrot.slane %v1256_v5, 2 }
 0x131   : > { %360 = vst.msk [vmem:[#allocation2 + $0x60] sm:$0xff] %vm352_vm4, %v341_v44  ;;  %386 = vrot.lane.b32.xlu2 %v4265_v43, %s4058_s8  ;;  %506 = vrot.lane.b32.xlu1 %v4265_v43, %s4059_s5  ;;  %v720_v49 = vld [vmem:[#allocation2 + $0x40] sm:$0xfe]  ;;  %v417_v16 = vrot.slane %v4265_v43, 4  ;;  %v421_v47 = vsel %vm418_vm8, %v4265_v43, %v420_v26 }
 0x132   : > { %v331_v45 = vpop.permute.xlu0 %330  ;;  %v1153_v50 = vld [vmem:[#allocation2 + $0x40] sm:$0xfc]  ;;  %v739_v58 = vrot.slane %v720_v49, 1 }
 0x133   : > { %355 = vst.msk [vmem:[#allocation2 + $0x10] sm:$0x3] %vm354_vm5, %v331_v45  ;;  %v1172_v59 = vrot.slane %v1153_v50, 2  ;;  %v1254_v60 = vld [vmem:[#allocation2 + $0x40] sm:$0xfc]  ;;  %v419_v36 = vsel %vm418_vm8, %v417_v16, %v4256_v37 }
 0x134   : > { %v1290_v7 = vrot.slane %v1254_v60, 2  ;;  %v4294_v12 = vsel %vm732_vm6, %v739_v58, %v740_v57  ;;  %v4326_v56 = vperm.slane %v419_v36, %v4314_v41  ;;  %v1032_v60 = vrot.slane %v4307_v33, 1 }
 0x135   : > { %v1174_v13 = vsel %vm1165_vm7, %v1172_v59, %v1173_v3  ;;  %v749_v27 = vrot.slane %v4294_v12, 4 }
 0x136   : > { %v1292_v29 = vsel %vm1165_vm7, %v1290_v7, %v1291_v19  ;;  %v1182_v31 = vrot.slane %v1174_v13, 4  ;;  %v444_v11 = vrot.slane %v4326_v56, 4 }
 0x138   : > { %v4276_v53 = vld [vmem:[#allocation2 + $0x60] sm:$0xff] }
 0x139   : > { %510 = vrot.lane.b32.xlu1 %v4276_v53, %s4059_s5  ;;  %390 = vrot.lane.b32.xlu0 %v4276_v53, %s4058_s8  ;;  %v1155_v15 = vld [vmem:[#allocation2 + $0x60] sm:$0xfc] }
 0x13a   : > { %v717_v63 = vld [vmem:[#allocation2 + $0x10] sm:$0x1]  ;;  %v335_v1 = vpop.permute.xlu1 %334  ;;  %v722_v18 = vld [vmem:[#allocation2 + $0x60] sm:$0xfe]  ;;  %v1175_v28 = vrot.slane %v1155_v15, 2 }
 0x13b   : > { %v1150_v0 = vld [vmem:[#allocation2 + $0x10] sm:$0x3]  ;;  %357 = vst.msk [vmem:[#allocation2 + $0x30] sm:$0x3] %vm354_vm5, %v335_v1  ;;  %v734_v14 = vrot.slane %v717_v63, 1  ;;  %v742_v32 = vrot.slane %v722_v18, 1 }
 0x13c   : > { %v363_v2 = vld [vmem:[#allocation2 + $0x10] sm:$0x3]  ;;  %v1167_v4 = vrot.slane %v1150_v0, 2  ;;  %v333_v6 = vpop.permute.xlu0 %332  ;;  %v1426_v45 = vld [vmem:[#allocation2 + $0x60] sm:$0xfc]  ;;  %v1177_v52 = vsel %vm1165_vm7, %v1175_v28, %v1176_v22  ;;  %v430_v22 = vrot.slane %v4276_v53, 4 }
 0x13d   : > { %380 = vrot.lane.b32.xlu2 %v363_v2, %s4058_s8  ;;  %356 = vst.msk [vmem:[#allocation2 + $0x20] sm:$0xff] %vm352_vm4, %v333_v6  ;;  %v1248_v30 = vld [vmem:[#allocation2 + $0x10] sm:$0x3]  ;;  %v4310_v35 = vsel %vm732_vm6, %v733_v51, %v734_v14  ;;  %v4330_v59 = vld [vmem:[#allocation2 + $0x60] sm:$0xfe]  ;;  %v4336_v63 = vsel %vm732_vm6, %v742_v32, %v743_v17  ;;  %v1464_v0 = vrot.slane %v1426_v45, 2  ;;  %v4343_v6 = vperm.slane %v421_v47, %v4314_v41 }
 0x13e   : > { %v1168_v21 = vsel %vm1165_vm7, %v1166_v55, %v1167_v4  ;;  %v1279_v44 = vrot.slane %v1248_v30, 2  ;;  %v750_v55 = vsel %vm418_vm8, %v749_v27, %v4310_v35  ;;  %v1194_v4 = vrot.slane %v1177_v52, 4 }
 0x13f   : > { %v1184_v34 = vrot.slane %v1168_v21, 4  ;;  %v1183_v46 = vsel %vm418_vm8, %v1182_v31, %v1168_v21  ;;  %v756_v5 = vperm.slane %v750_v55, %v4314_v41  ;;  %v1031_v9 = vrot.slane %v4330_v59, 1 }
 0x140   : > { %v1189_v1 = vperm.slane %v1183_v46, %v4314_v41  ;;  %v1280_v7 = vsel %vm1165_vm7, %v1278_v8, %v1279_v44  ;;  %v761_v15 = vrot.slane %v4336_v63, 4  ;;  %v1466_v54 = vsel %vm1165_vm7, %v1464_v0, %v1465_v23 }
 0x141   : > { %1310 = vrot.lane.b32.xlu1 %v1292_v29, %s4059_s5  ;;  %v1185_v2 = vsel %vm418_vm8, %v1174_v13, %v1184_v34  ;;  %v751_v18 = vrot.slane %v4310_v35, 4  ;;  %v775_v21 = vrot.slane %v756_v5, 4 }
 0x142   : > { %v719_v38 = vld [vmem:[#allocation2 + $0x30] sm:$0x1]  ;;  %v1193_v16 = vperm.slane %v1185_v2, %v4314_v41  ;;  %v1208_v17 = vrot.slane %v1189_v1, 4 }
 0x143   : > { %v1152_v39 = vld [vmem:[#allocation2 + $0x30] sm:$0x3]  ;;  %v737_v51 = vrot.slane %v719_v38, 1  ;;  %v752_v46 = vsel %vm418_vm8, %v4294_v12, %v751_v18 }
 0x144   : > { %v365_v40 = vld [vmem:[#allocation2 + $0x30] sm:$0x3]  ;;  %v1170_v42 = vrot.slane %v1152_v39, 2  ;;  %v4320_v48 = vld [vmem:[#allocation2 + $0x20] sm:$0xff]  ;;  %v1220_v30 = vrot.slane %v1193_v16, 4 }
 0x145   : > { %384 = vrot.lane.b32.xlu0 %v365_v40, %s4058_s8  ;;  %v718_v49 = vld [vmem:[#allocation2 + $0x20] sm:$0xfe]  ;;  %382 = vrot.lane.b32.xlu2 %v4320_v48, %s4058_s8  ;;  %v431_v29 = vsel %vm418_vm8, %v430_v22, %v4320_v48  ;;  %v851_v18 = vld [vmem:[#allocation2 + $0x70] sm:$0x1] }
 0x146   : > { %v1151_v50 = vld [vmem:[#allocation2 + $0x20] sm:$0xfc]  ;;  %v736_v57 = vrot.slane %v718_v49, 1  ;;  %v437_v35 = vperm.slane %v431_v29, %v4314_v41  ;;  %v1416_v29 = vld [vmem:[#allocation2 + $0x10] sm:$0x3] }
 0x147   : > { %v1169_v58 = vrot.slane %v1151_v50, 2 }
 0x148   : > { %v4350_v10 = vsel %vm732_vm6, %v736_v57, %v737_v51  ;;  %v445_v44 = vsel %vm418_vm8, %v437_v35, %v444_v11  ;;  %v442_v45 = vrot.slane %v437_v35, 4 }
 0x149   : > { %v1171_v3 = vsel %vm1165_vm7, %v1169_v58, %v1170_v42  ;;  %1302 = vrot.lane.b32.xlu1 %v1280_v7, %s4059_s5  ;;  %v762_v19 = vsel %vm418_vm8, %v761_v15, %v4350_v10  ;;  %v763_v28 = vrot.slane %v4350_v10, 4  ;;  %v760_v7 = vperm.slane %v752_v46, %v4314_v41  ;;  %v849_v15 = vld [vmem:[#allocation2 + $0x60] sm:$0xfe] }
 0x14a   : > { %v1195_v13 = vsel %vm418_vm8, %v1194_v4, %v1171_v3  ;;  %v1196_v14 = vrot.slane %v1171_v3, 4  ;;  %v768_v23 = vperm.slane %v762_v19, %v4314_v41  ;;  %v443_v55 = vsel %vm418_vm8, %v442_v45, %v4326_v56  ;;  %v989_v3 = vld [vmem:[#allocation2 + $0x40] sm:$0xfe] }
 0x14b   : > { %v1201_v8 = vperm.slane %v1195_v13, %v4314_v41  ;;  %3723 = vst.sshfl [vmem:[#allocation3 + $0x10] sm:$0x55 pattern:$0x73516240] %v445_v44  ;;  %v1422_v19 = vld [vmem:[#allocation2 + $0x40] sm:$0xfc] }
 0x14c   : > { %v1197_v24 = vsel %vm418_vm8, %v1177_v52, %v1196_v14  ;;  %v776_v32 = vsel %vm418_vm8, %v768_v23, %v775_v21  ;;  %v773_v34 = vrot.slane %v768_v23, 4  ;;  %v453_v52 = vperm.slane %v445_v44, %v4333_v62  ;;  %v1424_v21 = vld [vmem:[#allocation2 + $0x50] sm:$0x3] }
 0x14d   : > { %635 = vrot.lane.b32.xlu0 %v4265_v43, %s4057_s23  ;;  %v1209_v25 = vsel %vm418_vm8, %v1201_v8, %v1208_v17  ;;  %v1206_v26 = vrot.slane %v1201_v8, 4  ;;  %v1205_v27 = vperm.slane %v1197_v24, %v4314_v41  ;;  %498 = vrot.lane.b32.xlu2 %v4256_v37, %s4059_s5  ;;  %v784_v39 = vperm.slane %v776_v32, %v4333_v62 }
 0x14e   : > { %v1217_v43 = vperm.slane %v1209_v25, %v4333_v62  ;;  %3735 = vst.sshfl [vmem:[#allocation3 + $0xd0] sm:$0x55 pattern:$0x73516240] %v1209_v25  ;;  %v774_v42 = vsel %vm418_vm8, %v773_v34, %v756_v5  ;;  %v468_v4 = vrot.slane %v453_v52, 4  ;;  %v764_v14 = vsel %vm418_vm8, %v4336_v63, %v763_v28 }
 0x14f   : > { %v1207_v31 = vsel %vm418_vm8, %v1206_v26, %v1189_v1  ;;  %v1221_v40 = vsel %vm418_vm8, %v1205_v27, %v1220_v30  ;;  %v799_v50 = vrot.slane %v784_v39, 4  ;;  %v780_v51 = vperm.slane %v774_v42, %v4333_v62  ;;  %3722 = vst.sshfl [vmem:[#allocation3] sm:$0x55 pattern:$0x73516240] %v443_v55 }
 0x150   : > { %v1232_v36 = vrot.slane %v1217_v43, 4  ;;  %v1213_v38 = vperm.slane %v1207_v31, %v4333_v62  ;;  %3734 = vst.sshfl [vmem:[#allocation3 + $0xc0] sm:$0x55 pattern:$0x73516240] %v1207_v31  ;;  %v1229_v57 = vperm.slane %v1221_v40, %v4333_v62  ;;  %v1218_v58 = vrot.slane %v1205_v27, 4 }
 0x151   : > { %3737 = vst.sshfl [vmem:[#allocation3 + $0xf0] sm:$0x55 pattern:$0x73516240] %v1221_v40  ;;  %1482 = vrot.lane.b32.xlu1 %v1466_v54, %s4057_s23  ;;  %v797_v0 = vrot.slane %v780_v51, 4  ;;  %v449_v1 = vperm.slane %v443_v55, %v4333_v62  ;;  %v800_v2 = vsel %vm418_vm8, 0.0, %v799_v50  ;;  %v1033_v24 = vsel %vm732_vm6, %v1031_v9, %v1032_v60 }
 0x152   : > { %v1230_v47 = vrot.slane %v1213_v38, 4  ;;  %v1233_v49 = vsel %vm418_vm8, 0.0, %v1232_v36  ;;  %831 = vst [vmem:[#allocation3 + $0x50] sm:$0xf0] %v799_v50  ;;  %v816_v5 = vrot.slane %v800_v2, 4  ;;  %v1219_v56 = vsel %vm418_vm8, %v1218_v58, %v1193_v16 }
 0x153   : > { %1241 = vst [vmem:[#allocation3 + $0xd8] sm:$0xf] %v1233_v49  ;;  %v466_v10 = vrot.slane %v449_v1, 4  ;;  %v798_v11 = vsel %vm418_vm8, 0.0, %v797_v0  ;;  %v1225_v13 = vperm.slane %v1219_v56, %v4333_v62  ;;  %v1236_v54 = vrot.slane %v1229_v57, 4 }
 0x154   : > { %v1231_v12 = vsel %vm418_vm8, 0.0, %v1230_v47  ;;  %829 = vst [vmem:[#allocation3 + $0x40] sm:$0xf0] %v797_v0  ;;  %v814_v8 = vrot.slane %v798_v11, 4  ;;  %v772_v16 = vperm.slane %v764_v14, %v4314_v41  ;;  %v1025_v17 = vrot.slane %v989_v3, 1 }
 0x155   : > { %627 = vrot.lane.b32.xlu0 %v4256_v37, %s4057_s23  ;;  %1239 = vst [vmem:[#allocation3 + $0xc8] sm:$0xf] %v1231_v12  ;;  %639 = vrot.lane.b32.xlu2 %v4276_v53, %s4057_s23  ;;  %v991_v37 = vld [vmem:[#allocation2 + $0x50] sm:$0x1]  ;;  %v469_v22 = vsel %vm418_vm8, 0.0, %v468_v4  ;;  %v787_v63 = vrot.slane %v760_v7, 4 }
 0x156   : > { %832 = vst [vmem:[#allocation3 + $0x58] sm:$0xf0] %v816_v5  ;;  %v785_v25 = vrot.slane %v772_v16, 4  ;;  %v432_v26 = vrot.slane %v4320_v48, 4  ;;  %v1026_v23 = vrot.slane %v991_v37, 1  ;;  %v1234_v27 = vrot.slane %v1225_v13, 4 }
 0x157   : > { %830 = vst [vmem:[#allocation3 + $0x48] sm:$0xf0] %v814_v8  ;;  %v467_v43 = vsel %vm418_vm8, 0.0, %v466_v10  ;;  %v456_v28 = vrot.slane %v4343_v6, 4  ;;  %v788_v33 = vsel %vm418_vm8, %v772_v16, %v787_v63  ;;  %v1237_v59 = vsel %vm418_vm8, 0.0, %v1236_v54 }
 0x158   : > { %477 = vst [vmem:[#allocation3 + $0x18] sm:$0xf] %v469_v22  ;;  %v786_v60 = vsel %vm418_vm8, %v785_v25, %v760_v7  ;;  %v433_v9 = vsel %vm418_vm8, %v4276_v53, %v432_v26  ;;  %v887_v30 = vrot.slane %v849_v15, 1  ;;  %v796_v31 = vperm.slane %v788_v33, %v4333_v62  ;;  %v841_v0 = vld [vmem:[#allocation2 + $0x20] sm:$0xfe] }
 0x159   : > { %1049 = vrot.lane.b32.xlu1 %v1033_v24, %s4057_s23  ;;  %3736 = vst.sshfl [vmem:[#allocation3 + $0xe0] sm:$0x55 pattern:$0x73516240] %v1219_v56  ;;  %v792_v32 = vperm.slane %v786_v60, %v4333_v62  ;;  %v441_v34 = vperm.slane %v433_v9, %v4314_v41  ;;  %v1027_v35 = vsel %vm732_vm6, %v1025_v17, %v1026_v23  ;;  %v888_v36 = vrot.slane %v851_v18, 1 }
 0x15a   : > { %v1458_v38 = vrot.slane %v1422_v19, 2  ;;  %v1459_v39 = vrot.slane %v1424_v21, 2  ;;  %475 = vst [vmem:[#allocation3 + $0x8] sm:$0xf] %v467_v43  ;;  %v803_v53 = vrot.slane %v796_v31, 4  ;;  %v1447_v45 = vrot.slane %v1416_v29, 2 }
 0x15b   : > { %1245 = vst [vmem:[#allocation3 + $0xf8] sm:$0xf] %v1237_v59  ;;  %v801_v40 = vrot.slane %v792_v32, 4  ;;  %v457_v42 = vsel %vm418_vm8, %v441_v34, %v456_v28  ;;  %v454_v44 = vrot.slane %v441_v34, 4  ;;  %v1235_v47 = vsel %vm418_vm8, 0.0, %v1234_v27 }
 0x15c   : > { %v465_v46 = vperm.slane %v457_v42, %v4333_v62  ;;  %3725 = vst.sshfl [vmem:[#allocation3 + $0x30] sm:$0x55 pattern:$0x73516240] %v457_v42  ;;  %v889_v49 = vsel %vm732_vm6, %v887_v30, %v888_v36  ;;  %v804_v51 = vsel %vm418_vm8, 0.0, %v803_v53  ;;  %v1460_v2 = vsel %vm1165_vm7, %v1458_v38, %v1459_v39 }
 0x15d   : > { %502 = vrot.lane.b32.xlu0 %v4320_v48, %s4059_s5  ;;  %1045 = vrot.lane.b32.xlu2 %v1027_v35, %s4057_s23  ;;  %835 = vst [vmem:[#allocation3 + $0x70] sm:$0xf0] %v803_v53  ;;  %v455_v50 = vsel %vm418_vm8, %v454_v44, %v4343_v6  ;;  %v802_v52 = vsel %vm418_vm8, 0.0, %v801_v40  ;;  %v820_v58 = vrot.slane %v804_v51, 4  ;;  %v843_v1 = vld [vmem:[#allocation2 + $0x30] sm:$0x1]  ;;  %v1448_v5 = vsel %vm1165_vm7, %v1446_v20, %v1447_v45 }
 0x15e   : > { %833 = vst [vmem:[#allocation3 + $0x60] sm:$0xf0] %v801_v40  ;;  %v472_v55 = vrot.slane %v465_v46, 4  ;;  %v461_v57 = vperm.slane %v455_v50, %v4333_v62  ;;  %v818_v12 = vrot.slane %v802_v52, 4  ;;  %v1258_v4 = vld [vmem:[#allocation2 + $0x60] sm:$0xfc] }
 0x15f   : > { %1243 = vst [vmem:[#allocation3 + $0xe8] sm:$0xf] %v1235_v47  ;;  %v875_v56 = vrot.slane %v841_v0, 1  ;;  %v876_v7 = vrot.slane %v843_v1, 1  ;;  %v983_v10 = vld [vmem:[#allocation2 + $0x10] sm:$0x1] }
 0x160   : > { %v470_v3 = vrot.slane %v461_v57, 4  ;;  %3724 = vst.sshfl [vmem:[#allocation3 + $0x20] sm:$0x55 pattern:$0x73516240] %v455_v50  ;;  %v473_v6 = vsel %vm418_vm8, 0.0, %v472_v55 }
 0x161   : > { %905 = vrot.lane.b32.xlu1 %v889_v49, %s4059_s5  ;;  %836 = vst [vmem:[#allocation3 + $0x78] sm:$0xf0] %v820_v58  ;;  %v1260_v11 = vld [vmem:[#allocation2 + $0x70] sm:$0x3]  ;;  %v1296_v13 = vrot.slane %v1258_v4, 2  ;;  %v1014_v15 = vrot.slane %v983_v10, 1  ;;  %v877_v54 = vsel %vm732_vm6, %v875_v56, %v876_v7 }
 0x162   : > { %834 = vst [vmem:[#allocation3 + $0x68] sm:$0xf0] %v818_v12  ;;  %v471_v37 = vsel %vm418_vm8, 0.0, %v470_v3  ;;  %v981_v14 = vld [vmem:[#allocation2] sm:$0xfe]  ;;  %v1297_v8 = vrot.slane %v1260_v11, 2 }
 0x163   : > { %481 = vst [vmem:[#allocation3 + $0x38] sm:$0xf] %v473_v6  ;;  %v1013_v61 = vrot.slane %v981_v14, 1  ;;  %v845_v16 = vld [vmem:[#allocation2 + $0x40] sm:$0xfe] }
 0x164   : > { %479 = vst [vmem:[#allocation3 + $0x28] sm:$0xf] %v471_v37  ;;  %v1298_v20 = vsel %vm1165_vm7, %v1296_v13, %v1297_v8  ;;  %v1418_v18 = vld [vmem:[#allocation2 + $0x20] sm:$0xfc]  ;;  %v1420_v19 = vld [vmem:[#allocation2 + $0x30] sm:$0x3] }
 0x165   : > { %1478 = vrot.lane.b32.xlu0 %v1460_v2, %s4057_s23  ;;  %1470 = vrot.lane.b32.xlu2 %v1448_v5, %s4057_s23  ;;  %v1015_v17 = vsel %vm732_vm6, %v1013_v61, %v1014_v15  ;;  %v847_v21 = vld [vmem:[#allocation2 + $0x50] sm:$0x1]  ;;  %v881_v22 = vrot.slane %v845_v16, 1  ;;  %v1452_v24 = vrot.slane %v1418_v18, 2  ;;  %v1453_v63 = vrot.slane %v1420_v19, 2 }
 0x166   : > { %v882_v25 = vrot.slane %v847_v21, 1  ;;  %v1250_v23 = vld [vmem:[#allocation2 + $0x20] sm:$0xfc]  ;;  %v1252_v27 = vld [vmem:[#allocation2 + $0x30] sm:$0x3] }
 0x167   : > { %v1454_v43 = vsel %vm1165_vm7, %v1452_v24, %v1453_v63  ;;  %v839_v28 = vld [vmem:[#allocation2 + $0x10] sm:$0x1]  ;;  %v1284_v29 = vrot.slane %v1250_v23, 2  ;;  %v1285_v33 = vrot.slane %v1252_v27, 2  ;;  %v837_v59 = vld [vmem:[#allocation2] sm:$0xfe] }
 0x168   : > { %v883_v26 = vsel %vm732_vm6, %v881_v22, %v882_v25  ;;  %v870_v60 = vrot.slane %v839_v28, 1  ;;  %v869_v9 = vrot.slane %v837_v59, 1  ;;  %v985_v31 = vld [vmem:[#allocation2 + $0x20] sm:$0xfe]  ;;  %v987_v32 = vld [vmem:[#allocation2 + $0x30] sm:$0x1] }
 0x169   : > { %897 = vrot.lane.b32.xlu1 %v877_v54, %s4059_s5  ;;  %v1286_v30 = vsel %vm1165_vm7, %v1284_v29, %v1285_v33  ;;  %v1019_v35 = vrot.slane %v985_v31, 1  ;;  %v1020_v36 = vrot.slane %v987_v32, 1 }
 0x16a   : > { %v871_v34 = vsel %vm732_vm6, %v869_v9, %v870_v60 }
 0x16b   : > { %v1021_v38 = vsel %vm732_vm6, %v1019_v35, %v1020_v36 }
 0x16d   : > { %1314 = vrot.lane.b32.xlu0 %v1298_v20, %s4059_s5  ;;  %1037 = vrot.lane.b32.xlu2 %v1015_v17, %s4057_s23 }
 0x175   : > { %901 = vrot.lane.b32.xlu0 %v883_v26, %s4059_s5  ;;  %1474 = vrot.lane.b32.xlu2 %v1454_v43, %s4057_s23 }
 0x17d   : > { %1306 = vrot.lane.b32.xlu0 %v1286_v30, %s4059_s5  ;;  %893 = vrot.lane.b32.xlu2 %v871_v34, %s4059_s5 }
 0x185   : > { %1041 = vrot.lane.b32.xlu0 %v1021_v38, %s4057_s23 }
 0x18b   : > { %v387_v39 = vpop.permute.xlu2 %386 }
 0x18c   : > { %408 = vst.msk [vmem:[#allocation2 + $0x48] sm:$0xff] %vm402_vm9, %v387_v39 }
 0x18d   : > { %v379_v53 = vpop.permute.xlu1 %378 }
 0x18e   : > { %403 = vst.msk [vmem:[#allocation2 + $0x8] sm:$0xff] %vm402_vm9, %v379_v53 }
 0x193   : > { %v487_v40 = vld [vmem:[#allocation2 + $0x48] sm:$0xff] }
 0x194   : > { %508 = vrot.lane.b32.xlu2 %v487_v40, %s4059_s5  ;;  %637 = vrot.lane.b32.xlu1 %v487_v40, %s4057_s23  ;;  %v1423_v49 = vld [vmem:[#allocation2 + $0x48] sm:$0xfc] }
 0x195   : > { %v393_v44 = vpop.permute.xlu1 %392  ;;  %v483_v45 = vld [vmem:[#allocation2 + $0x8] sm:$0xff]  ;;  %v1461_v51 = vrot.slane %v1423_v49, 2 }
 0x196   : > { %500 = vrot.lane.b32.xlu0 %v483_v45, %s4059_s5  ;;  %411 = vst.msk [vmem:[#allocation2 + $0x78] sm:$0x3] %vm404_vm10, %v393_v44  ;;  %v1255_v56 = vld [vmem:[#allocation2 + $0x48] sm:$0xfc] }
 0x197   : > { %v381_v42 = vpop.permute.xlu2 %380  ;;  %v990_v7 = vld [vmem:[#allocation2 + $0x48] sm:$0xfe]  ;;  %v1293_v15 = vrot.slane %v1255_v56, 2 }
 0x198   : > { %405 = vst.msk [vmem:[#allocation2 + $0x18] sm:$0x3] %vm404_vm10, %v381_v42  ;;  %v846_v14 = vld [vmem:[#allocation2 + $0x48] sm:$0xfe]  ;;  %v1028_v54 = vrot.slane %v990_v7, 1 }
 0x199   : > { %v884_v16 = vrot.slane %v846_v14, 1  ;;  %v1247_v17 = vld [vmem:[#allocation2 + $0x8] sm:$0xfc] }
 0x19a   : > { %v1415_v19 = vld [vmem:[#allocation2 + $0x8] sm:$0xfc]  ;;  %v1281_v24 = vrot.slane %v1247_v17, 2 }
 0x19b   : > { %v1449_v25 = vrot.slane %v1415_v19, 2  ;;  %v982_v60 = vld [vmem:[#allocation2 + $0x8] sm:$0xfe] }
 0x19c   : > { %629 = vrot.lane.b32.xlu1 %v483_v45, %s4057_s23  ;;  %v1016_v35 = vrot.slane %v982_v60, 1 }
 0x19d   : > { %v1261_v58 = vld [vmem:[#allocation2 + $0x78] sm:$0x3] }
 0x19e   : > { %v1300_v2 = vrot.slane %v1261_v58, 2  ;;  %v1429_v34 = vld [vmem:[#allocation2 + $0x78] sm:$0x3] }
 0x19f   : > { %v383_v46 = vpop.permute.xlu2 %382  ;;  %v389_v47 = vpop.permute.xlu0 %388  ;;  %v1249_v18 = vld [vmem:[#allocation2 + $0x18] sm:$0x3]  ;;  %v1468_v53 = vrot.slane %v1429_v34, 2 }
 0x1a0   : > { %406 = vst.msk [vmem:[#allocation2 + $0x28] sm:$0xff] %vm402_vm9, %v383_v46  ;;  %v1417_v21 = vld [vmem:[#allocation2 + $0x18] sm:$0x3]  ;;  %v1282_v63 = vrot.slane %v1249_v18, 2 }
 0x1a1   : > { %409 = vst.msk [vmem:[#allocation2 + $0x58] sm:$0x3] %vm404_vm10, %v389_v47  ;;  %v1450_v26 = vrot.slane %v1417_v21, 2  ;;  %v984_v30 = vld [vmem:[#allocation2 + $0x18] sm:$0x1] }
 0x1a2   : > { %v1283_v33 = vsel %vm1165_vm7, %v1281_v24, %v1282_v63  ;;  %v1017_v36 = vrot.slane %v984_v30, 1 }
 0x1a3   : > { %v4480_v13 = vpop.permute.xlu1 %506  ;;  %v1451_v59 = vsel %vm1165_vm7, %v1449_v25, %v1450_v26 }
 0x1a4   : > { %v1018_v44 = vsel %vm732_vm6, %v1016_v35, %v1017_v36 }
 0x1a7   : > { %v1251_v27 = vld [vmem:[#allocation2 + $0x28] sm:$0xfc]  ;;  %v4488_v43 = vpop.permute.xlu2 %498 }
 0x1a8   : > { %v1425_v50 = vld [vmem:[#allocation2 + $0x58] sm:$0x3]  ;;  %v1287_v9 = vrot.slane %v1251_v27, 2  ;;  %v986_v40 = vld [vmem:[#allocation2 + $0x28] sm:$0xfe] }
 0x1a9   : > { %v1462_v52 = vrot.slane %v1425_v50, 2  ;;  %v1257_v3 = vld [vmem:[#allocation2 + $0x58] sm:$0x3]  ;;  %v1022_v49 = vrot.slane %v986_v40, 1  ;;  %v842_v18 = vld [vmem:[#allocation2 + $0x28] sm:$0xfe] }
 0x1aa   : > { %v992_v6 = vld [vmem:[#allocation2 + $0x58] sm:$0x1]  ;;  %v1294_v37 = vrot.slane %v1257_v3, 2  ;;  %v878_v24 = vrot.slane %v842_v18, 1 }
 0x1ab   : > { %v1463_v55 = vsel %vm1165_vm7, %v1461_v51, %v1462_v52  ;;  %v391_v57 = vpop.permute.xlu0 %390  ;;  %v1029_v10 = vrot.slane %v992_v6, 1  ;;  %v848_v11 = vld [vmem:[#allocation2 + $0x58] sm:$0x1]  ;;  %v4490_v28 = vpop.permute.xlu1 %510 }
 0x1ac   : > { %1480 = vrot.lane.b32.xlu1 %v1463_v55, %s4057_s23  ;;  %410 = vst.msk [vmem:[#allocation2 + $0x68] sm:$0xff] %vm402_vm9, %v391_v57  ;;  %v885_v8 = vrot.slane %v848_v11, 1  ;;  %v1295_v61 = vsel %vm1165_vm7, %v1293_v15, %v1294_v37  ;;  %v1419_v55 = vld [vmem:[#allocation2 + $0x28] sm:$0xfc]  ;;  %v996_v57 = vld [vmem:[#allocation2 + $0x78] sm:$0x1] }
 0x1ad   : > { %v1030_v20 = vsel %vm732_vm6, %v1028_v54, %v1029_v10  ;;  %v485_v10 = vld [vmem:[#allocation2 + $0x28] sm:$0xff]  ;;  %v852_v11 = vld [vmem:[#allocation2 + $0x78] sm:$0x1] }
 0x1ae   : > { %v886_v22 = vsel %vm732_vm6, %v884_v16, %v885_v8  ;;  %v891_v8 = vrot.slane %v852_v11, 1 }
 0x1af   : > { %v4500_v46 = vpop.permute.xlu2 %639 }
 0x1b3   : > { %v489_v12 = vld [vmem:[#allocation2 + $0x68] sm:$0xff]  ;;  %v4502_v47 = vpop.permute.xlu1 %1310 }
 0x1b4   : > { %v1259_v0 = vld [vmem:[#allocation2 + $0x68] sm:$0xfc]  ;;  %512 = vrot.lane.b32.xlu2 %v489_v12, %s4059_s5  ;;  %641 = vrot.lane.b32.xlu0 %v489_v12, %s4057_s23 }
 0x1b5   : > { %v1299_v1 = vrot.slane %v1259_v0, 2  ;;  %v1427_v31 = vld [vmem:[#allocation2 + $0x68] sm:$0xfc] }
 0x1b6   : > { %v1467_v38 = vrot.slane %v1427_v31, 2  ;;  %v994_v51 = vld [vmem:[#allocation2 + $0x68] sm:$0xfe] }
 0x1b7   : > { %v385_v4 = vpop.permute.xlu0 %384  ;;  %v1301_v5 = vsel %vm1165_vm7, %v1299_v1, %v1300_v2  ;;  %v1034_v12 = vrot.slane %v994_v51, 1  ;;  %v1455_v1 = vrot.slane %v1419_v55, 2  ;;  %v1035_v2 = vrot.slane %v996_v57, 1  ;;  %v850_v56 = vld [vmem:[#allocation2 + $0x68] sm:$0xfe]  ;;  %v4512_v7 = vpop.permute.xlu2 %1045 }
 0x1b8   : > { %407 = vst.msk [vmem:[#allocation2 + $0x38] sm:$0x3] %vm404_vm10, %v385_v4  ;;  %1316 = vrot.lane.b32.xlu1 %v1301_v5, %s4059_s5  ;;  %v1469_v45 = vsel %vm1165_vm7, %v1467_v38, %v1468_v53  ;;  %v838_v4 = vld [vmem:[#allocation2 + $0x8] sm:$0xfe]  ;;  %v840_v5 = vld [vmem:[#allocation2 + $0x18] sm:$0x1] }
 0x1b9   : > { %v1036_v6 = vsel %vm732_vm6, %v1034_v12, %v1035_v2  ;;  %v872_v14 = vrot.slane %v838_v4, 1  ;;  %v873_v15 = vrot.slane %v840_v5, 1  ;;  %v890_v54 = vrot.slane %v850_v56, 1 }
 0x1bb   : > { %v1303_v37 = vpop.permute.xlu1 %1302  ;;  %v892_v16 = vsel %vm732_vm6, %v890_v54, %v891_v8 }
 0x1bc   : > { %1312 = vrot.lane.b32.xlu2 %v1295_v61, %s4059_s5  ;;  %1047 = vrot.lane.b32.xlu0 %v1030_v20, %s4057_s23  ;;  %v874_v20 = vsel %vm732_vm6, %v872_v14, %v873_v15 }
 0x1bf   : > { %v1253_v23 = vld [vmem:[#allocation2 + $0x38] sm:$0x3]  ;;  %v636_v0 = vpop.permute.xlu0 %635  ;;  %v4519_v21 = vpop.permute.xlu2 %1470 }
 0x1c0   : > { %903 = vrot.lane.b32.xlu1 %v886_v22, %s4059_s5  ;;  %v1288_v29 = vrot.slane %v1253_v23, 2  ;;  %v988_v39 = vld [vmem:[#allocation2 + $0x38] sm:$0x1] }
 0x1c1   : > { %v1023_v42 = vrot.slane %v988_v39, 1  ;;  %v1421_v50 = vld [vmem:[#allocation2 + $0x38] sm:$0x3] }
 0x1c2   : > { %v1289_v32 = vsel %vm1165_vm7, %v1287_v9, %v1288_v29  ;;  %v1456_v58 = vrot.slane %v1421_v50, 2  ;;  %v844_v17 = vld [vmem:[#allocation2 + $0x38] sm:$0x1] }
 0x1c3   : > { %v1024_v52 = vsel %vm732_vm6, %v1022_v49, %v1023_v42  ;;  %v879_v19 = vrot.slane %v844_v17, 1  ;;  %v4521_v22 = vpop.permute.xlu1 %1482 }
 0x1c4   : > { %1304 = vrot.lane.b32.xlu2 %v1283_v33, %s4059_s5  ;;  %1472 = vrot.lane.b32.xlu0 %v1451_v59, %s4057_s23  ;;  %v1457_v3 = vsel %vm1165_vm7, %v1455_v1, %v1456_v58 }
 0x1c5   : > { %v880_v63 = vsel %vm732_vm6, %v878_v24, %v879_v19 }
 0x1c7   : > { %v628_v61 = vpop.permute.xlu0 %627  ;;  %v4528_v26 = vpop.permute.xlu2 %1037 }
 0x1c8   : > { %1308 = vrot.lane.b32.xlu1 %v1289_v32, %s4059_s5 }
 0x1cb   : > { %v4530_v23 = vpop.permute.xlu1 %1049 }
 0x1cc   : > { %1039 = vrot.lane.b32.xlu0 %v1018_v44, %s4057_s23  ;;  %1484 = vrot.lane.b32.xlu2 %v1469_v45, %s4057_s23 }
 0x1cf   : > { %v4524_v25 = vpop.permute.xlu0 %502  ;;  %v4534_v29 = vpop.permute.xlu2 %1474 }
 0x1d0   : > { %1043 = vrot.lane.b32.xlu1 %v1024_v52, %s4057_s23 }
 0x1d3   : > { %v4536_v33 = vpop.permute.xlu1 %905 }
 0x1d4   : > { %1476 = vrot.lane.b32.xlu0 %v1457_v3, %s4057_s23  ;;  %1051 = vrot.lane.b32.xlu2 %v1036_v6, %s4057_s23 }
 0x1d7   : > { %v1479_v27 = vpop.permute.xlu0 %1478  ;;  %v4538_v60 = vpop.permute.xlu2 %893 }
 0x1d8   : > { %504 = vrot.lane.b32.xlu1 %v485_v10, %s4059_s5 }
 0x1db   : > { %v4540_v9 = vpop.permute.xlu1 %897 }
 0x1dc   : > { %895 = vrot.lane.b32.xlu0 %v874_v20, %s4059_s5  ;;  %907 = vrot.lane.b32.xlu2 %v892_v16, %s4059_s5 }
 0x1df   : > { %v1315_v59 = vpop.permute.xlu0 %1314 }
 0x1e4   : > { %633 = vrot.lane.b32.xlu0 %v485_v10, %s4057_s23  ;;  %899 = vrot.lane.b32.xlu2 %v880_v63, %s4059_s5 }
 0x1e7   : > { %v902_v30 = vpop.permute.xlu0 %901 }
 0x1ec   : > { %631 = vrot.lane.b32.xlu2 %v4320_v48, %s4057_s23 }
 0x1ee   : > { %v509_v31 = vpop.permute.xlu2 %508 }
 0x1ef   : > { %v1307_v35 = vpop.permute.xlu0 %1306  ;;  %v517_v12 = vsel %vm5440_vm12, %v4480_v13, %v509_v31 }
 0x1f0   : > { %v523_v3 = vrot.slane %v517_v12, 4 }
 0x1f7   : > { %v4550_v44 = vpop.permute.xlu0 %1041 }
 0x206   : > { %v638_v32 = vpop.permute.xlu1 %637 }
 0x207   : > { %v646_v34 = vsel %vm643_vm11, %v636_v0, %v638_v32 }
 0x208   : > { %v652_v36 = vrot.slane %v646_v34, 4  ;;  %v501_v49 = vpop.permute.xlu0 %500 }
 0x209   : > { %v515_v57 = vsel %vm5440_vm12, %v4488_v43, %v501_v49 }
 0x20a   : > { %v525_v1 = vrot.slane %v515_v57, 4  ;;  %v524_v10 = vsel %vm418_vm8, %v523_v3, %v515_v57 }
 0x20c   : > { %v526_v11 = vsel %vm418_vm8, %v517_v12, %v525_v1 }
 0x20d   : > { %v4567_v15 = vperm.slane %v526_v11, %v4314_v41 }
 0x20e   : > { %v513_v38 = vpop.permute.xlu2 %512  ;;  %v630_v48 = vpop.permute.xlu1 %629 }
 0x20f   : > { %v644_v39 = vsel %vm643_vm11, %v628_v61, %v630_v48  ;;  %v561_v19 = vrot.slane %v4567_v15, 4 }
 0x210   : > { %v4545_v53 = vsel %vm418_vm8, %v652_v36, %v644_v39  ;;  %v654_v40 = vrot.slane %v644_v39, 4 }
 0x212   : > { %v4548_v42 = vsel %vm418_vm8, %v646_v34, %v654_v40 }
 0x216   : > { %v1313_v45 = vpop.permute.xlu2 %1312 }
 0x217   : > { %v1320_v2 = vsel %vm5440_vm12, %v4502_v47, %v1313_v45  ;;  %v4571_v47 = vsel %vm5440_vm12, %v4490_v28, %v513_v38 }
 0x218   : > { %v1326_v56 = vrot.slane %v1320_v2, 4  ;;  %v535_v24 = vrot.slane %v4571_v47, 4 }
 0x21e   : > { %v1305_v50 = vpop.permute.xlu2 %1304  ;;  %v1481_v51 = vpop.permute.xlu1 %1480 }
 0x21f   : > { %v1318_v0 = vsel %vm5440_vm12, %v1303_v37, %v1305_v50  ;;  %v4564_v37 = vperm.slane %v524_v10, %v4314_v41  ;;  %v1488_v8 = vsel %vm643_vm11, %v1479_v27, %v1481_v51 }
 0x220   : > { %v1328_v6 = vrot.slane %v1318_v0, 4  ;;  %v1327_v43 = vsel %vm418_vm8, %v1326_v56, %v1318_v0  ;;  %v1494_v63 = vrot.slane %v1488_v8, 4 }
 0x221   : > { %v1333_v54 = vperm.slane %v1327_v43, %v4314_v41  ;;  %v549_v18 = vrot.slane %v4564_v37, 4 }
 0x222   : > { %v1329_v13 = vsel %vm418_vm8, %v1320_v2, %v1328_v6 }
 0x223   : > { %v1337_v61 = vperm.slane %v1329_v13, %v4314_v41  ;;  %v1352_v31 = vrot.slane %v1333_v54, 4 }
 0x225   : > { %v1364_v34 = vrot.slane %v1337_v61, 4 }
 0x226   : > { %v642_v52 = vpop.permute.xlu0 %641  ;;  %v1485_v55 = vpop.permute.xlu2 %1484 }
 0x227   : > { %v4584_v27 = vsel %vm643_vm11, %v4500_v46, %v642_v52 }
 0x22a   : > { %v1317_v58 = vpop.permute.xlu1 %1316 }
 0x22b   : > { %v1321_v20 = vsel %vm5440_vm12, %v1315_v59, %v1317_v58  ;;  %v4588_v59 = vsel %vm643_vm11, %v4521_v22, %v1485_v55  ;;  %v664_v22 = vrot.slane %v4584_v27, 4 }
 0x22c   : > { %v1338_v36 = vrot.slane %v1321_v20, 4  ;;  %v1506_v50 = vrot.slane %v4588_v59, 4 }
 0x22e   : > { %v1048_v4 = vpop.permute.xlu0 %1047  ;;  %v1052_v5 = vpop.permute.xlu2 %1051 }
 0x22f   : > { %v1055_v38 = vsel %vm643_vm11, %v4512_v7, %v1048_v4 }
 0x230   : > { %v1061_v51 = vrot.slane %v1055_v38, 4 }
 0x232   : > { %v904_v14 = vpop.permute.xlu1 %903 }
 0x233   : > { %v4597_v39 = vsel %vm5440_vm12, %v902_v30, %v904_v14 }
 0x236   : > { %v1473_v16 = vpop.permute.xlu0 %1472  ;;  %v908_v17 = vpop.permute.xlu2 %907 }
 0x237   : > { %v1486_v28 = vsel %vm643_vm11, %v4519_v21, %v1473_v16  ;;  %v4594_v21 = vsel %vm643_vm11, %v4530_v23, %v1052_v5  ;;  %v912_v46 = vsel %vm5440_vm12, %v4536_v33, %v908_v17  ;;  %v917_v33 = vrot.slane %v4597_v39, 4 }
 0x238   : > { %v1496_v32 = vrot.slane %v1486_v28, 4  ;;  %v1495_v45 = vsel %vm418_vm8, %v1494_v63, %v1486_v28  ;;  %v1073_v52 = vrot.slane %v4594_v21, 4  ;;  %v929_v55 = vrot.slane %v912_v46, 4 }
 0x239   : > { %v4612_v57 = vperm.slane %v1495_v45, %v4314_v41 }
 0x23a   : > { %v1309_v48 = vpop.permute.xlu1 %1308  ;;  %v1497_v23 = vsel %vm418_vm8, %v1488_v8, %v1496_v32 }
 0x23b   : > { %v1319_v40 = vsel %vm5440_vm12, %v1307_v35, %v1309_v48  ;;  %v4617_v3 = vperm.slane %v1497_v23, %v4314_v41 }
 0x23c   : > { %v1339_v49 = vsel %vm418_vm8, %v1338_v36, %v1319_v40  ;;  %v1340_v7 = vrot.slane %v1319_v40, 4 }
 0x23d   : > { %v1345_v30 = vperm.slane %v1339_v49, %v4314_v41 }
 0x23e   : > { %v1341_v35 = vsel %vm418_vm8, %v1321_v20, %v1340_v7  ;;  %v1040_v1 = vpop.permute.xlu0 %1039  ;;  %v900_v2 = vpop.permute.xlu2 %899 }
 0x23f   : > { %v1349_v58 = vperm.slane %v1341_v35, %v4314_v41  ;;  %v1350_v12 = vrot.slane %v1345_v30, 4  ;;  %v1353_v0 = vsel %vm418_vm8, %v1345_v30, %v1352_v31  ;;  %v1053_v4 = vsel %vm643_vm11, %v4528_v26, %v1040_v1 }
 0x240   : > { %v1361_v6 = vperm.slane %v1353_v0, %v4333_v62  ;;  %v910_v5 = vsel %vm5440_vm12, %v4540_v9, %v900_v2  ;;  %v1062_v43 = vsel %vm418_vm8, %v1061_v51, %v1053_v4  ;;  %v1063_v20 = vrot.slane %v1053_v4, 4 }
 0x241   : > { %v1351_v56 = vsel %vm418_vm8, %v1350_v12, %v1333_v54  ;;  %v1362_v10 = vrot.slane %v1349_v58, 4  ;;  %v1365_v11 = vsel %vm418_vm8, %v1349_v58, %v1364_v34  ;;  %v1068_v26 = vperm.slane %v1062_v43, %v4314_v41 }
 0x242   : > { %v1357_v14 = vperm.slane %v1351_v56, %v4333_v62  ;;  %v1373_v13 = vperm.slane %v1365_v11, %v4333_v62  ;;  %v1376_v8 = vrot.slane %v1361_v6, 4  ;;  %v1044_v16 = vpop.permute.xlu1 %1043  ;;  %v930_v9 = vsel %vm418_vm8, %v929_v55, %v910_v5 }
 0x243   : > { %v1363_v17 = vsel %vm418_vm8, %v1362_v10, %v1337_v61  ;;  %v931_v28 = vrot.slane %v910_v5, 4  ;;  %v1520_v34 = vrot.slane %v4612_v57, 4  ;;  %v1064_v48 = vsel %vm418_vm8, %v1055_v38, %v1063_v20 }
 0x244   : > { %v1369_v54 = vperm.slane %v1363_v17, %v4333_v62  ;;  %v1374_v63 = vrot.slane %v1357_v14, 4  ;;  %v1377_v31 = vsel %vm418_vm8, 0.0, %v1376_v8  ;;  %v1380_v32 = vrot.slane %v1373_v13, 4  ;;  %1408 = vst [vmem:[#allocation3 + $0xd0] sm:$0xf0] %v1376_v8 }
 0x245   : > { %v1393_v36 = vrot.slane %v1377_v31, 4  ;;  %v932_v40 = vsel %vm418_vm8, %v912_v46, %v931_v28  ;;  %v1072_v7 = vperm.slane %v1064_v48, %v4314_v41  ;;  %v1087_v23 = vrot.slane %v1068_v26, 4 }
 0x246   : > { %v1375_v61 = vsel %vm418_vm8, 0.0, %v1374_v63  ;;  %v1378_v45 = vrot.slane %v1369_v54, 4  ;;  %v1381_v49 = vsel %vm418_vm8, 0.0, %v1380_v32  ;;  %1406 = vst [vmem:[#allocation3 + $0xc0] sm:$0xf0] %v1374_v63  ;;  %v4641_v30 = vperm.slane %v930_v9, %v4314_v41  ;;  %v1477_v38 = vpop.permute.xlu0 %1476 }
 0x247   : > { %v1391_v51 = vrot.slane %v1375_v61, 4  ;;  %1409 = vst [vmem:[#allocation3 + $0xd8] sm:$0xf0] %v1393_v36  ;;  %v4644_v55 = vperm.slane %v932_v40, %v4314_v41  ;;  %v1397_v35 = vrot.slane %v1381_v49, 4  ;;  %v1054_v58 = vsel %vm643_vm11, %v4550_v44, %v1044_v16 }
 0x248   : > { %v1379_v46 = vsel %vm418_vm8, 0.0, %v1378_v45  ;;  %1410 = vst [vmem:[#allocation3 + $0xe0] sm:$0xf0] %v1378_v45  ;;  %v1487_v12 = vsel %vm643_vm11, %v4534_v29, %v1477_v38  ;;  %v1532_v0 = vrot.slane %v4617_v3, 4  ;;  %v1099_v2 = vrot.slane %v1072_v7, 4 }
 0x249   : > { %v1395_v1 = vrot.slane %v1379_v46, 4  ;;  %1407 = vst [vmem:[#allocation3 + $0xc8] sm:$0xf0] %v1391_v51  ;;  %v1074_v6 = vsel %vm418_vm8, %v1073_v52, %v1054_v58  ;;  %v1075_v4 = vrot.slane %v1054_v58, 4  ;;  %v1507_v56 = vsel %vm418_vm8, %v1506_v50, %v1487_v12 }
 0x24a   : > { %1412 = vst [vmem:[#allocation3 + $0xf0] sm:$0xf0] %v1380_v32  ;;  %v1080_v5 = vperm.slane %v1074_v6, %v4314_v41  ;;  %v1508_v10 = vrot.slane %v1487_v12, 4  ;;  %v505_v44 = vpop.permute.xlu1 %504  ;;  %v941_v29 = vrot.slane %v4641_v30, 4  ;;  %v953_v11 = vrot.slane %v4644_v55, 4 }
 0x24b   : > { %1411 = vst [vmem:[#allocation3 + $0xe8] sm:$0xf0] %v1395_v1  ;;  %v1513_v43 = vperm.slane %v1507_v56, %v4314_v41  ;;  %v516_v52 = vsel %vm5440_vm12, %v4524_v25, %v505_v44  ;;  %v1076_v14 = vsel %vm418_vm8, %v4594_v21, %v1075_v4 }
 0x24c   : > { %1413 = vst [vmem:[#allocation3 + $0xf8] sm:$0xf0] %v1397_v35  ;;  %v1085_v13 = vrot.slane %v1080_v5, 4  ;;  %v1088_v8 = vsel %vm418_vm8, %v1080_v5, %v1087_v23  ;;  %v1509_v50 = vsel %vm418_vm8, %v4588_v59, %v1508_v10  ;;  %v1084_v20 = vperm.slane %v1076_v14, %v4314_v41 }
 0x24d   : > { %v1096_v16 = vperm.slane %v1088_v8, %v4333_v62  ;;  %v1517_v17 = vperm.slane %v1509_v50, %v4314_v41  ;;  %v1518_v9 = vrot.slane %v1513_v43, 4  ;;  %v1521_v28 = vsel %vm418_vm8, %v1513_v43, %v1520_v34 }
 0x24e   : > { %v1086_v25 = vsel %vm418_vm8, %v1085_v13, %v1068_v26  ;;  %v536_v21 = vsel %vm418_vm8, %v535_v24, %v516_v52  ;;  %v537_v54 = vrot.slane %v516_v52, 4  ;;  %v1097_v59 = vrot.slane %v1084_v20, 4  ;;  %3739 = vst.sshfl [vmem:[#allocation3 + $0x110] sm:$0x55 pattern:$0x73516240] %v1521_v28  ;;  %v896_v36 = vpop.permute.xlu0 %895 }
 0x24f   : > { %v1092_v63 = vperm.slane %v1086_v25, %v4333_v62  ;;  %v1100_v31 = vsel %vm418_vm8, %v1084_v20, %v1099_v2  ;;  %v1111_v32 = vrot.slane %v1096_v16, 4  ;;  %v1519_v26 = vsel %vm418_vm8, %v1518_v9, %v4612_v57  ;;  %v1584_v25 = vld [vmem:[#allocation3 + $0xd0] sm:$0xff] }
 0x250   : > { %v1108_v48 = vperm.slane %v1100_v31, %v4333_v62  ;;  %v1529_v34 = vperm.slane %v1521_v28, %v4333_v62  ;;  %v1530_v40 = vrot.slane %v1517_v17, 4  ;;  %v1098_v61 = vsel %vm418_vm8, %v1097_v59, %v1072_v7  ;;  %3738 = vst.sshfl [vmem:[#allocation3 + $0x100] sm:$0x55 pattern:$0x73516240] %v1519_v26 }
 0x251   : > { %v1109_v24 = vrot.slane %v1092_v63, 4  ;;  %v1112_v45 = vsel %vm418_vm8, 0.0, %v1111_v32  ;;  %1143 = vst [vmem:[#allocation3 + $0x90] sm:$0xf0] %v1111_v32  ;;  %v1525_v49 = vperm.slane %v1519_v26, %v4333_v62  ;;  %v1104_v51 = vperm.slane %v1098_v61, %v4333_v62 }
 0x252   : > { %v1115_v23 = vrot.slane %v1108_v48, 4  ;;  %v1128_v38 = vrot.slane %v1112_v45, 4  ;;  %v1531_v46 = vsel %vm418_vm8, %v1530_v40, %v4617_v3  ;;  %v4689_v35 = vsel %vm418_vm8, %v1517_v17, %v1532_v0 }
 0x253   : > { %v1110_v57 = vsel %vm418_vm8, 0.0, %v1109_v24  ;;  %1141 = vst [vmem:[#allocation3 + $0x80] sm:$0xf0] %v1109_v24  ;;  %v1537_v7 = vperm.slane %v1531_v46, %v4333_v62  ;;  %v1542_v58 = vrot.slane %v1525_v49, 4  ;;  %v1113_v12 = vrot.slane %v1104_v51, 4 }
 0x254   : > { %v1116_v1 = vsel %vm418_vm8, 0.0, %v1115_v23  ;;  %v1126_v2 = vrot.slane %v1110_v57, 4  ;;  %1144 = vst [vmem:[#allocation3 + $0x98] sm:$0xf0] %v1128_v38  ;;  %v1541_v6 = vperm.slane %v4689_v35, %v4333_v62  ;;  %v1544_v5 = vrot.slane %v1529_v34, 4  ;;  %v1582_v34 = vld [vmem:[#allocation3 + $0xc0] sm:$0xff] }
 0x255   : > { %v1132_v4 = vrot.slane %v1116_v1, 4  ;;  %1147 = vst [vmem:[#allocation3 + $0xb0] sm:$0xf0] %v1115_v23  ;;  %v1543_v3 = vsel %vm418_vm8, 0.0, %v1542_v58  ;;  %v1546_v56 = vrot.slane %v1537_v7, 4  ;;  %v1114_v0 = vsel %vm418_vm8, 0.0, %v1113_v12 }
 0x256   : > { %1142 = vst [vmem:[#allocation3 + $0x88] sm:$0xf0] %v1126_v2  ;;  %v1548_v10 = vrot.slane %v1541_v6, 4  ;;  %v538_v44 = vsel %vm418_vm8, %v4571_v47, %v537_v54  ;;  %v542_v43 = vperm.slane %v536_v21, %v4314_v41  ;;  %v1592_v52 = vld [vmem:[#allocation3 + $0x110] sm:$0xf]  ;;  %v1130_v14 = vrot.slane %v1114_v0, 4  ;;  %v634_v9 = vpop.permute.xlu0 %633 }
 0x257   : > { %1145 = vst [vmem:[#allocation3 + $0xa0] sm:$0xf0] %v1113_v12  ;;  %v1545_v13 = vsel %vm418_vm8, 0.0, %v1544_v5  ;;  %v1547_v8 = vsel %vm418_vm8, 0.0, %v1546_v56  ;;  %v546_v50 = vperm.slane %v538_v44, %v4314_v41  ;;  %3746 = vmatpush.msk.msra.mxu2 %vm1602_vm13, %v1592_v52  ;;  %v909_v17 = vsel %vm5440_vm12, %v4538_v60, %v896_v36  ;;  %v1590_v59 = vld [vmem:[#allocation3 + $0x100] sm:$0xf] }
 0x258   : > { %1148 = vst [vmem:[#allocation3 + $0xb8] sm:$0xf0] %v1132_v4  ;;  %v1549_v20 = vsel %vm418_vm8, 0.0, %v1548_v10  ;;  %v547_v16 = vrot.slane %v542_v43, 4  ;;  %v550_v47 = vsel %vm418_vm8, %v542_v43, %v549_v18  ;;  %v918_v63 = vsel %vm418_vm8, %v917_v33, %v909_v17  ;;  %v632_v18 = vpop.permute.xlu2 %631  ;;  %3742 = vmatpush.msk.msra.mxu0 %vm1602_vm13, %v1590_v59 }
 0x259   : > { %1146 = vst [vmem:[#allocation3 + $0xa8] sm:$0xf0] %v1130_v14  ;;  %v558_v28 = vperm.slane %v550_v47, %v4333_v62  ;;  %v559_v21 = vrot.slane %v546_v50, 4  ;;  %v562_v54 = vsel %vm418_vm8, %v546_v50, %v561_v19  ;;  %1679 = vmatpush.msra.mxu2 %v1584_v25  ;;  %v919_v32 = vrot.slane %v909_v17, 4 }
 0x25a   : > { %1551 = vst [vmem:[#allocation3 + $0x108] sm:$0xf] %v1543_v3  ;;  %v548_v60 = vsel %vm418_vm8, %v547_v16, %v4564_v37  ;;  %v570_v31 = vperm.slane %v562_v54, %v4333_v62  ;;  %v924_v36 = vperm.slane %v918_v63, %v4314_v41  ;;  %v645_v26 = vsel %vm643_vm11, %v632_v18, %v634_v9 }
 0x25b   : > { %1553 = vst [vmem:[#allocation3 + $0x118] sm:$0xf] %v1545_v13  ;;  %v554_v19 = vperm.slane %v548_v60, %v4333_v62  ;;  %v560_v33 = vsel %vm418_vm8, %v559_v21, %v4567_v15  ;;  %v573_v48 = vrot.slane %v558_v28, 4  ;;  %v920_v61 = vsel %vm418_vm8, %v4597_v39, %v919_v32  ;;  %1639 = vmatpush.msra.mxu0 %v1582_v34 }
 0x25c   : > { %3740 = vst.sshfl [vmem:[#allocation3 + $0x120] sm:$0x55 pattern:$0x73516240] %v1531_v46  ;;  %v566_v37 = vperm.slane %v560_v33, %v4333_v62  ;;  %v577_v40 = vrot.slane %v570_v31, 4  ;;  %v942_v24 = vsel %vm418_vm8, %v941_v29, %v924_v36  ;;  %v928_v49 = vperm.slane %v920_v61, %v4314_v41 }
 0x25d   : > { %1555 = vst [vmem:[#allocation3 + $0x128] sm:$0xf] %v1547_v8  ;;  %v571_v45 = vrot.slane %v554_v19, 4  ;;  %v574_v15 = vsel %vm418_vm8, 0.0, %v573_v48  ;;  %v943_v51 = vrot.slane %v924_v36, 4  ;;  %v659_v23 = vperm.slane %v4545_v53, %v4314_v41 }
 0x25e   : > { %3741 = vst.sshfl [vmem:[#allocation3 + $0x130] sm:$0x55 pattern:$0x73516240] %v4689_v35  ;;  %v575_v38 = vrot.slane %v566_v37, 4  ;;  %v578_v39 = vsel %vm418_vm8, 0.0, %v577_v40  ;;  %v948_v46 = vperm.slane %v942_v24, %v4333_v62  ;;  %v665_v58 = vsel %vm418_vm8, %v664_v22, %v645_v26 }
 0x25f   : > { %1557 = vst [vmem:[#allocation3 + $0x138] sm:$0xf] %v1549_v20  ;;  %v572_v29 = vsel %vm418_vm8, 0.0, %v571_v45  ;;  %v590_v57 = vrot.slane %v574_v15, 4  ;;  %v944_v7 = vsel %vm418_vm8, %v4641_v30, %v943_v51  ;;  %v954_v1 = vsel %vm418_vm8, %v953_v11, %v928_v49 }
 0x260   : > { %v576_v53 = vsel %vm418_vm8, 0.0, %v575_v38  ;;  %v588_v12 = vrot.slane %v572_v29, 4  ;;  %603 = vst [vmem:[#allocation3] sm:$0xf0] %v571_v45  ;;  %v952_v35 = vperm.slane %v944_v7, %v4333_v62  ;;  %v955_v6 = vrot.slane %v928_v49, 4 }
 0x261   : > { %v592_v2 = vrot.slane %v576_v53, 4  ;;  %605 = vst [vmem:[#allocation3 + $0x10] sm:$0xf0] %v573_v48  ;;  %v960_v30 = vperm.slane %v954_v1, %v4333_v62  ;;  %v965_v4 = vrot.slane %v948_v46, 4  ;;  %v666_v3 = vrot.slane %v645_v26, 4  ;;  %v1588_v53 = vld [vmem:[#allocation3 + $0xf0] sm:$0xff] }
 0x262   : > { %604 = vst [vmem:[#allocation3 + $0x8] sm:$0xf0] %v588_v12  ;;  %v671_v22 = vperm.slane %v665_v58, %v4314_v41  ;;  %v1593_v5 = vld [vmem:[#allocation3 + $0x118] sm:$0xf]  ;;  %v663_v56 = vperm.slane %v4548_v42, %v4314_v41  ;;  %v678_v0 = vrot.slane %v659_v23, 4  ;;  %v594_v10 = vrot.slane %v578_v39, 4 }
 0x263   : > { %606 = vst [vmem:[#allocation3 + $0x18] sm:$0xf0] %v590_v57  ;;  %v956_v11 = vsel %vm418_vm8, %v4644_v55, %v955_v6  ;;  %3748 = vmatpush.msk.msra.mxu3 %vm1602_vm13, %v1593_v5  ;;  %v1591_v44 = vld [vmem:[#allocation3 + $0x108] sm:$0xf]  ;;  %v967_v52 = vrot.slane %v952_v35, 4  ;;  %v667_v14 = vsel %vm418_vm8, %v4584_v27, %v666_v3  ;;  %v1585_v42 = vld [vmem:[#allocation3 + $0xd8] sm:$0xff] }
 0x264   : > { %607 = vst [vmem:[#allocation3 + $0x20] sm:$0xf0] %v575_v38  ;;  %v964_v43 = vperm.slane %v956_v11, %v4333_v62  ;;  %v676_v13 = vrot.slane %v671_v22, 4  ;;  %3744 = vmatpush.msk.msra.mxu1 %vm1602_vm13, %v1591_v44  ;;  %v675_v8 = vperm.slane %v667_v14, %v4314_v41  ;;  %v679_v50 = vsel %vm418_vm8, %v671_v22, %v678_v0  ;;  %v1583_v55 = vld [vmem:[#allocation3 + $0xc8] sm:$0xff]  ;;  %v1594_v39 = vld [vmem:[#allocation3 + $0x120] sm:$0xf] }
 0x265   : > { %608 = vst [vmem:[#allocation3 + $0x28] sm:$0xf0] %v592_v2  ;;  %1699 = vmatpush.msra.mxu3 %v1585_v42  ;;  %v966_v20 = vsel %vm418_vm8, 0.0, %v965_v4  ;;  %v969_v16 = vrot.slane %v960_v30, 4  ;;  %v690_v17 = vrot.slane %v663_v56, 4  ;;  %v687_v9 = vperm.slane %v679_v50, %v4333_v62  ;;  %v1586_v58 = vld [vmem:[#allocation3 + $0xe0] sm:$0xff] }
 0x266   : > { %609 = vst [vmem:[#allocation3 + $0x30] sm:$0xf0] %v577_v40  ;;  %v677_v47 = vsel %vm418_vm8, %v676_v13, %v659_v23  ;;  %1659 = vmatpush.msra.mxu1 %v1583_v55  ;;  %v688_v25 = vrot.slane %v675_v8, 4  ;;  %v968_v28 = vsel %vm418_vm8, 0.0, %v967_v52  ;;  %v971_v21 = vrot.slane %v964_v43, 4  ;;  %v1589_v6 = vld [vmem:[#allocation3 + $0xf8] sm:$0xff] }
 0x267   : > { %610 = vst [vmem:[#allocation3 + $0x38] sm:$0xf0] %v594_v10  ;;  %v683_v27 = vperm.slane %v677_v47, %v4333_v62  ;;  %v691_v63 = vsel %vm418_vm8, %v675_v8, %v690_v17  ;;  %v970_v59 = vsel %vm418_vm8, 0.0, %v969_v16  ;;  %v702_v31 = vrot.slane %v687_v9, 4  ;;  %v1558_v23 = vld [vmem:[#allocation3] sm:$0xff] }
 0x268   : > { %3730 = vst.sshfl [vmem:[#allocation3 + $0x80] sm:$0x55 pattern:$0x73516240] %v942_v24  ;;  %v689_v54 = vsel %vm418_vm8, %v688_v25, %v663_v56  ;;  %v972_v32 = vsel %vm418_vm8, 0.0, %v971_v21  ;;  %v699_v36 = vperm.slane %v691_v63, %v4333_v62  ;;  %v1560_v46 = vld [vmem:[#allocation3 + $0x10] sm:$0xff] }
 0x269   : > { %974 = vst [vmem:[#allocation3 + $0x88] sm:$0xf] %v966_v20  ;;  %v695_v18 = vperm.slane %v689_v54, %v4333_v62  ;;  %v700_v60 = vrot.slane %v683_v27, 4  ;;  %v703_v48 = vsel %vm418_vm8, 0.0, %v702_v31  ;;  %v412_v29 = vld [vmem:[#allocation7] sm:$0xf] }
 0x26a   : > { %3731 = vst.sshfl [vmem:[#allocation3 + $0x90] sm:$0x55 pattern:$0x73516240] %v944_v7  ;;  %v706_v34 = vrot.slane %v699_v36, 4  ;;  %v1561_v7 = vld [vmem:[#allocation3 + $0x18] sm:$0xff] }
 0x26b   : > { %976 = vst [vmem:[#allocation3 + $0x98] sm:$0xf] %v968_v28  ;;  %v701_v19 = vsel %vm418_vm8, 0.0, %v700_v60  ;;  %v704_v33 = vrot.slane %v695_v18, 4  ;;  %v1596_v57 = vld [vmem:[#allocation3 + $0x130] sm:$0xf] }
 0x26c   : > { %3732 = vst.sshfl [vmem:[#allocation3 + $0xa0] sm:$0x55 pattern:$0x73516240] %v954_v1  ;;  %v707_v45 = vsel %vm418_vm8, 0.0, %v706_v34  ;;  %v1559_v35 = vld [vmem:[#allocation3 + $0x8] sm:$0xff] }
 0x26d   : > { %978 = vst [vmem:[#allocation3 + $0xa8] sm:$0xf] %v970_v59  ;;  %v705_v61 = vsel %vm418_vm8, 0.0, %v704_v33  ;;  %v1597_v12 = vld [vmem:[#allocation3 + $0x138] sm:$0xf]  ;;  %v1564_v5 = vld [vmem:[#allocation3 + $0x30] sm:$0xff] }
 0x26e   : > { %3733 = vst.sshfl [vmem:[#allocation3 + $0xb0] sm:$0x55 pattern:$0x73516240] %v956_v11  ;;  %v1595_v4 = vld [vmem:[#allocation3 + $0x128] sm:$0xf] }
 0x26f   : > { %980 = vst [vmem:[#allocation3 + $0xb8] sm:$0xf] %v972_v32  ;;  %v1574_v26 = vld [vmem:[#allocation3 + $0x80] sm:$0xff]  ;;  %v1587_v56 = vld [vmem:[#allocation3 + $0xe8] sm:$0xff]  ;;  %v1565_v44 = vld [vmem:[#allocation3 + $0x38] sm:$0xff] }
 0x270   : > { %3726 = vst.sshfl [vmem:[#allocation3 + $0x40] sm:$0x55 pattern:$0x73516240] %v677_v47  ;;  %1640 = vmatpush.msra.mxu0 %v1574_v26  ;;  %v1575_v37 = vld [vmem:[#allocation3 + $0x88] sm:$0xff]  ;;  %v1562_v0 = vld [vmem:[#allocation3 + $0x20] sm:$0xff] }
 0x271   : > { %709 = vst [vmem:[#allocation3 + $0x48] sm:$0xf] %v701_v19  ;;  %v1576_v40 = vld [vmem:[#allocation3 + $0x90] sm:$0xff]  ;;  %1660 = vmatpush.msra.mxu1 %v1575_v37  ;;  %v1563_v52 = vld [vmem:[#allocation3 + $0x28] sm:$0xff]  ;;  %v4062_v19 = vmov 1024.0  }
 0x272   : > { %3727 = vst.sshfl [vmem:[#allocation3 + $0x50] sm:$0x55 pattern:$0x73516240] %v679_v50  ;;  %1680 = vmatpush.msra.mxu2 %v1576_v40  ;;  %v1577_v24 = vld [vmem:[#allocation3 + $0x98] sm:$0xff]  ;;  %3884 = vrcp.f32 %v4062_v19 }
 0x273   : > { %711 = vst [vmem:[#allocation3 + $0x58] sm:$0xf] %v703_v48  ;;  %1700 = vmatpush.msra.mxu3 %v1577_v24  ;;  %v1578_v2 = vld [vmem:[#allocation3 + $0xa0] sm:$0xff] }
 0x274   : > { %3728 = vst.sshfl [vmem:[#allocation3 + $0x60] sm:$0x55 pattern:$0x73516240] %v689_v54  ;;  %v1579_v11 = vld [vmem:[#allocation3 + $0xa8] sm:$0xff] }
 0x275   : > { %713 = vst [vmem:[#allocation3 + $0x68] sm:$0xf] %v705_v61  ;;  %v1580_v1 = vld [vmem:[#allocation3 + $0xb0] sm:$0xff] }
 0x276   : > { %3729 = vst.sshfl [vmem:[#allocation3 + $0x70] sm:$0x55 pattern:$0x73516240] %v691_v63  ;;  %v1581_v22 = vld [vmem:[#allocation3 + $0xb8] sm:$0xff] }
 0x277   : > { %715 = vst [vmem:[#allocation3 + $0x78] sm:$0xf] %v707_v45  ;;  %v1566_v15 = vld [vmem:[#allocation3 + $0x40] sm:$0xff] }
 0x278   : > { %1641 = vmatpush.msra.mxu0 %v1566_v15  ;;  %v1567_v49 = vld [vmem:[#allocation3 + $0x48] sm:$0xff]  ;;  %v3885_v33 = vpop.eup %3884 }
 0x279   : > { %v1568_v51 = vld [vmem:[#allocation3 + $0x50] sm:$0xff]  ;;  %1661 = vmatpush.msra.mxu1 %v1567_v49  ;;  %v1805_v48 = vmul.f32 1024.0, %v3885_v33  ;;  %vm1809_vm15 = vweird.f32 %v3885_v33 }
 0x27a   : > { %1681 = vmatpush.msra.mxu2 %v1568_v51  ;;  %1642 = vmatpush.msra.mxu0 %v1558_v23  ;;  %v1569_v38 = vld [vmem:[#allocation3 + $0x58] sm:$0xff] }
 0x27b   : > { %1701 = vmatpush.msra.mxu3 %v1569_v38  ;;  %3743 = vmatmul.msk.f32.vlgmr.msra.gmra.mxu0 %vm5439_vm14, %v412_v29  ;;  %v1570_v3 = vld [vmem:[#allocation3 + $0x60] sm:$0xff]  ;;  %v1806_v26 = vsub.f32 1.0, %v1805_v48 }
 0x27c   : > { %3750 = vmatpush.msk.msrb.mxu0 %vm1602_vm13, %v1594_v39  ;;  %1682 = vmatpush.msra.mxu2 %v1560_v46  ;;  %v1571_v43 = vld [vmem:[#allocation3 + $0x68] sm:$0xff] }
 0x27d   : > { %1702 = vmatpush.msra.mxu3 %v1561_v7  ;;  %3747 = vmatmul.msk.f32.vlgmr.msra.gmra.mxu2 %vm5439_vm14, %v412_v29  ;;  %v1572_v30 = vld [vmem:[#allocation3 + $0x70] sm:$0xff]  ;;  %v1807_v34 = vmul.f32 %v3885_v33, %v1806_v26 }
 0x27e   : > { %3754 = vmatpush.msk.msrb.mxu2 %vm1602_vm13, %v1596_v57  ;;  %1719 = vmatpush.msrb.mxu0 %v1586_v58  ;;  %v1573_v10 = vld [vmem:[#allocation3 + $0x78] sm:$0xff] }
 0x27f   : > { %3749 = vmatmul.msk.f32.vlgmr.msra.gmra.mxu3 %vm5439_vm14, %v412_v29  ;;  %1662 = vmatpush.msra.mxu1 %v1559_v35  ;;  %v1808_v37 = vadd.f32 %v3885_v33, %v1807_v34 }
 0x280   : > { %1759 = vmatpush.msrb.mxu2 %v1588_v53  ;;  %3756 = vmatpush.msk.msrb.mxu3 %vm1602_vm13, %v1597_v12 }
 0x281   : > { %1720 = vmatpush.msrb.mxu0 %v1578_v2  ;;  %3745 = vmatmul.msk.f32.vlgmr.msra.gmra.mxu1 %vm5439_vm14, %v412_v29  ;;  %v4798_v40 = vsel %vm1809_vm15, %v3885_v33, %v1808_v37 }
 0x282   : > { %1760 = vmatpush.msrb.mxu2 %v1580_v1  ;;  %1779 = vmatpush.msrb.mxu3 %v1589_v6 }
 0x283   : > { %3752 = vmatpush.msk.msrb.mxu1 %vm1602_vm13, %v1595_v4  ;;  %1721 = vmatpush.msrb.mxu0 %v1570_v3 }
 0x284   : > { %1761 = vmatpush.msrb.mxu2 %v1572_v30  ;;  %1780 = vmatpush.msrb.mxu3 %v1581_v22 }
 0x285   : > { %1739 = vmatpush.msrb.mxu1 %v1587_v56  ;;  %1722 = vmatpush.msrb.mxu0 %v1562_v0 }
 0x286   : > { %1762 = vmatpush.msrb.mxu2 %v1564_v5  ;;  %1781 = vmatpush.msrb.mxu3 %v1573_v10 }
 0x287   : > { %1740 = vmatpush.msrb.mxu1 %v1579_v11  ;;  %3755 = vmatmul.msk.f32.vlgmr.msrb.gmra.mxu2 %vm5439_vm14, %v412_v29 }
 0x288   : > { %3751 = vmatmul.msk.f32.vlgmr.msrb.gmra.mxu0 %vm5439_vm14, %v412_v29  ;;  %1782 = vmatpush.msrb.mxu3 %v1565_v44 }
 0x289   : > { %1741 = vmatpush.msrb.mxu1 %v1571_v43  ;;  %3757 = vmatmul.msk.f32.vlgmr.msrb.gmra.mxu3 %vm5439_vm14, %v412_v29 }
 0x28b   : > { %1742 = vmatpush.msrb.mxu1 %v1563_v52 }
 0x28c   : > { %3753 = vmatmul.msk.f32.vlgmr.msrb.gmra.mxu1 %vm5439_vm14, %v412_v29 }
 0x2f8   : > { %v1644_v14 = vpop.f32.mrf.mxu0 }
 0x2f9   : > { %v1787_v13 = vsel %vm1602_vm13, %v1644_v14, 0.0 }
 0x2fe   : > { %v1664_v42 = vpop.f32.mrf.mxu1 }
 0x2ff   : > { %v1788_v8 = vsel %vm1602_vm13, %v1664_v42, 0.0 }
 0x300   : > { %v1789_v50 = vadd.f32 %v1788_v8, %v1787_v13  ;;  %v1684_v55 = vpop.f32.mrf.mxu2 }
 0x301   : > { %v1790_v20 = vsel %vm1602_vm13, %v1684_v55, 0.0 }
 0x302   : > { %v1704_v16 = vpop.f32.mrf.mxu3  ;;  %v1791_v47 = vadd.f32 %v1790_v20, %v1789_v50 }
 0x303   : > { %v1792_v17 = vsel %vm1602_vm13, %v1704_v16, 0.0 }
 0x304   : > { %v1793_v27 = vadd.f32 %v1792_v17, %v1791_v47 }
 0x305   : > { %v1724_v9 = vpop.f32.mrf.mxu0 }
 0x306   : > { %v1794_v25 = vsel %vm1602_vm13, %v1724_v9, 0.0 }
 0x307   : > { %v1795_v28 = vadd.f32 %v1794_v25, %v1793_v27 }
 0x309   : > { %v1744_v21 = vpop.f32.mrf.mxu1 }
 0x30a   : > { %v1796_v54 = vsel %vm1602_vm13, %v1744_v21, 0.0  ;;  %v1764_v63 = vpop.f32.mrf.mxu2 }
 0x30b   : > { %v1797_v59 = vadd.f32 %v1796_v54, %v1795_v28  ;;  %v1798_v18 = vsel %vm1602_vm13, %v1764_v63, 0.0 }
 0x30c   : > { %v1784_v60 = vpop.f32.mrf.mxu3 }
 0x30d   : > { %v1799_v31 = vadd.f32 %v1798_v18, %v1797_v59  ;;  %v1800_v32 = vsel %vm1602_vm13, %v1784_v60, 0.0 }
 0x30f   : > { %v1801_v36 = vadd.f32 %v1800_v32, %v1799_v31 }
 0x311   : > { %1802 = vadd.xlane.f32.xlu1 %v1801_v36 }
 0x384   : > { %v1803_v61 = vpop.xlane.xlu1 %1802 }
 0x385   : > { %v1811_v24 = vmul.f32 %v4798_v40, %v1803_v61 }
 0x387   : > { %v1812_v45 = vsub.f32 %v1644_v14, %v1811_v24  ;;  %v1813_v15 = vsub.f32 %v1664_v42, %v1811_v24  ;;  %v1814_v49 = vsub.f32 %v1684_v55, %v1811_v24  ;;  %v1815_v51 = vsub.f32 %v1704_v16, %v1811_v24 }
 0x388   : > { %v1816_v23 = vsub.f32 %v1724_v9, %v1811_v24  ;;  %v1817_v29 = vsub.f32 %v1744_v21, %v1811_v24  ;;  %v1818_v12 = vsub.f32 %v1764_v63, %v1811_v24  ;;  %v1819_v6 = vsub.f32 %v1784_v60, %v1811_v24 }
 0x389   : > { %v1820_v38 = vmul.f32 %v1812_v45, %v1812_v45  ;;  %v1821_v39 = vmul.f32 %v1813_v15, %v1813_v15  ;;  %v1822_v46 = vmul.f32 %v1814_v49, %v1814_v49  ;;  %v1823_v57 = vmul.f32 %v1815_v51, %v1815_v51 }
 0x38a   : > { %v1824_v35 = vmul.f32 %v1816_v23, %v1816_v23  ;;  %v1825_v30 = vmul.f32 %v1817_v29, %v1817_v29  ;;  %v1826_v22 = vmul.f32 %v1818_v12, %v1818_v12  ;;  %v1827_v0 = vmul.f32 %v1819_v6, %v1819_v6 }
 0x38b   : > { %v1828_v7 = vsel %vm1602_vm13, %v1820_v38, 0.0  ;;  %v1829_v58 = vsel %vm1602_vm13, %v1821_v39, 0.0  ;;  %v1831_v1 = vsel %vm1602_vm13, %v1822_v46, 0.0  ;;  %v1833_v4 = vsel %vm1602_vm13, %v1823_v57, 0.0 }
 0x38c   : > { %v1830_v53 = vadd.f32 %v1829_v58, %v1828_v7  ;;  %v1835_v5 = vsel %vm1602_vm13, %v1824_v35, 0.0  ;;  %v1837_v10 = vsel %vm1602_vm13, %v1825_v30, 0.0  ;;  %v1839_v44 = vsel %vm1602_vm13, %v1826_v22, 0.0 }
 0x38d   : > { %v1841_v52 = vsel %vm1602_vm13, %v1827_v0, 0.0 }
 0x38e   : > { %v1832_v2 = vadd.f32 %v1831_v1, %v1830_v53 }
 0x390   : > { %v1834_v3 = vadd.f32 %v1833_v4, %v1832_v2 }
 0x392   : > { %v1836_v56 = vadd.f32 %v1835_v5, %v1834_v3 }
 0x394   : > { %v1838_v11 = vadd.f32 %v1837_v10, %v1836_v56 }
 0x396   : > { %v1840_v43 = vadd.f32 %v1839_v44, %v1838_v11 }
 0x398   : > { %v1842_v14 = vadd.f32 %v1841_v52, %v1840_v43 }
 0x39a   : > { %1843 = vadd.xlane.f32.xlu2 %v1842_v14 }
 0x40d   : > { %v1844_v13 = vpop.xlane.xlu2 %1843 }
 0x40e   : > { %v1845_v42 = vmul.f32 %v1844_v13, %v4798_v40 }
 0x410   : > { %v1846_v8 = vadd.f32 1e-05, %v1845_v42 }
 0x412   : > { %3886 = vrsqrt.f32 %v1846_v8  ;;  %vm1853_vm14 = vweird.f32 %v1846_v8 }
 0x418   : > { %v3887_v50 = vpop.eup %3886 }
 0x419   : > { %v1848_v55 = vmul.f32 %v3887_v50, %v1846_v8  ;;  %vm1854_vm15 = vweird.f32 %v3887_v50 }
 0x41a   : > { %vm1855_vm12 = vmor %vm1853_vm14, %vm1854_vm15 }
 0x41b   : > { %v1849_v20 = vmul.f32 %v3887_v50, %v1848_v55 }
 0x41d   : > { %v1850_v16 = vmul.f32 0.5, %v1849_v20 }
 0x41f   : > { %v1851_v47 = vsub.f32 1.5, %v1850_v16 }
 0x421   : > { %v1852_v17 = vmul.f32 %v3887_v50, %v1851_v47 }
 0x423   : > { %v1856_v27 = vsel %vm1855_vm12, %v3887_v50, %v1852_v17 }
 0x424   : > { %v1857_v9 = vmul.f32 %v1856_v27, %v1812_v45  ;;  %v1859_v25 = vmul.f32 %v1856_v27, %v1814_v49  ;;  %v1858_v28 = vmul.f32 %v1856_v27, %v1813_v15  ;;  %v1860_v21 = vmul.f32 %v1856_v27, %v1815_v51 }
 0x425   : > { %v1861_v54 = vmul.f32 %v1856_v27, %v1816_v23  ;;  %v1862_v63 = vmul.f32 %v1856_v27, %v1817_v29  ;;  %v1863_v59 = vmul.f32 %v1856_v27, %v1818_v12  ;;  %v1864_v18 = vmul.f32 %v1856_v27, %v1819_v6 }
 0x426   : > { %v1867_v60 = vmax.f32 %v1859_v25, 0.0  ;;  %v1868_v31 = vmax.f32 %v1860_v21, 0.0  ;;  %v1865_v19 = vmax.f32 %v1857_v9, 0.0  ;;  %v1866_v33 = vmax.f32 %v1858_v28, 0.0 }
 0x427   : > { %v1871_v32 = vmax.f32 %v1863_v59, 0.0  ;;  %v1872_v36 = vmax.f32 %v1864_v18, 0.0  ;;  %v1869_v34 = vmax.f32 %v1861_v54, 0.0  ;;  %v1870_v37 = vmax.f32 %v1862_v63, 0.0 }
 0x428   : > { %v1873_v48 = vrot.slane %v1867_v60, 4  ;;  %v1879_v26 = vrot.slane %v1868_v31, 4 }
 0x429   : > { %v1885_v61 = vrot.slane %v1871_v32, 4  ;;  %v1891_v24 = vrot.slane %v1872_v36, 4 }
 0x42a   : > { %v1874_v45 = vsel %vm418_vm8, %v1873_v48, %v1865_v19  ;;  %v1880_v15 = vsel %vm418_vm8, %v1879_v26, %v1866_v33 }
 0x42b   : > { %v1878_v49 = vperm.slane %v1874_v45, %v4314_v41  ;;  %v1884_v51 = vperm.slane %v1880_v15, %v4314_v41  ;;  %v1886_v23 = vsel %vm418_vm8, %v1885_v61, %v1869_v34  ;;  %v1892_v38 = vsel %vm418_vm8, %v1891_v24, %v1870_v37 }
 0x42c   : > { %v1890_v39 = vperm.slane %v1886_v23, %v4314_v41  ;;  %v1896_v46 = vperm.slane %v1892_v38, %v4314_v41 }
 0x42d   : > { %v1899_v29 = vrot.slane %v1878_v49, 4  ;;  %v1897_v57 = vrot.slane %v1884_v51, 4 }
 0x42e   : > { %v1911_v7 = vrot.slane %v1890_v39, 4  ;;  %v1909_v58 = vrot.slane %v1896_v46, 4 }
 0x42f   : > { %v1900_v53 = vsel %vm418_vm8, %v1884_v51, %v1899_v29  ;;  %v1898_v12 = vsel %vm418_vm8, %v1897_v57, %v1878_v49 }
 0x430   : > { %v1908_v35 = vperm.slane %v1900_v53, %v4333_v62  ;;  %v1912_v1 = vsel %vm418_vm8, %v1896_v46, %v1911_v7  ;;  %v1910_v2 = vsel %vm418_vm8, %v1909_v58, %v1890_v39  ;;  %v1904_v3 = vperm.slane %v1898_v12, %v4333_v62 }
 0x431   : > { %v1920_v6 = vperm.slane %v1912_v1, %v4333_v62  ;;  %v1916_v30 = vperm.slane %v1910_v2, %v4333_v62 }
 0x432   : > { %v1927_v4 = vrot.slane %v1908_v35, 4  ;;  %v1923_v52 = vrot.slane %v1904_v3, 4 }
 0x433   : > { %v1925_v22 = vrot.slane %v1920_v6, 4  ;;  %v1921_v5 = vrot.slane %v1916_v30, 4 }
 0x434   : > { %v1928_v56 = vsel %vm418_vm8, %v1920_v6, %v1927_v4  ;;  %v1924_v14 = vsel %vm418_vm8, %v1916_v30, %v1923_v52 }
 0x435   : > { %v1968_v0 = vrot.slane %v1928_v56, 1  ;;  %v1926_v10 = vsel %vm418_vm8, %v1925_v22, %v1908_v35  ;;  %v1922_v11 = vsel %vm418_vm8, %v1921_v5, %v1904_v3  ;;  %v1990_v13 = vrot.slane %v1924_v14, 6 }
 0x436   : > { %v1935_v44 = vrot.slane %v1926_v10, 7  ;;  %v1965_v43 = vrot.slane %v1922_v11, 1  ;;  %v1967_v42 = vrot.slane %v1926_v10, 1  ;;  %v1966_v8 = vrot.slane %v1924_v14, 1 }
 0x437   : > { %1975 = vrot.lane.b32.xlu1 %v1968_v0, %s4056_s26  ;;  %v1991_v50 = vrot.slane %v1926_v10, 6  ;;  %v1933_v55 = vrot.slane %v1922_v11, 7  ;;  %v1936_v20 = vrot.slane %v1928_v56, 7  ;;  %v1989_v16 = vrot.slane %v1922_v11, 6 }
 0x438   : > { %1941 = vrot.lane.b32.xlu0 %v1935_v44, %s4056_s26  ;;  %1969 = vrot.lane.b32.xlu2 %v1965_v43, %s4056_s26  ;;  %v1992_v47 = vrot.slane %v1928_v56, 6  ;;  %v1934_v17 = vrot.slane %v1924_v14, 7 }
 0x43f   : > { %1995 = vrot.lane.b32.xlu1 %v1990_v13, %s4056_s26 }
 0x440   : > { %1973 = vrot.lane.b32.xlu0 %v1967_v42, %s4056_s26  ;;  %1971 = vrot.lane.b32.xlu2 %v1966_v8, %s4056_s26 }
 0x448   : > { %1997 = vrot.lane.b32.xlu0 %v1991_v50, %s4056_s26 }
 0x450   : > { %1937 = vrot.lane.b32.xlu0 %v1933_v55, %s4056_s26 }
 0x458   : > { %1943 = vrot.lane.b32.xlu0 %v1936_v20, %s4056_s26 }
 0x460   : > { %1993 = vrot.lane.b32.xlu0 %v1989_v16, %s4056_s26 }
 0x468   : > { %1999 = vrot.lane.b32.xlu0 %v1992_v47, %s4056_s26 }
 0x470   : > { %1939 = vrot.lane.b32.xlu0 %v1934_v17, %s4056_s26 }
 0x492   : > { %v1970_v27 = vpop.permute.xlu2 %1969 }
 0x493   : > { %1981 = vst.msk [vmem:[#allocation2] sm:$0x1] %vm248_vm2, %v1970_v27 }
 0x494   : > { %1982 = vst.msk [vmem:[#allocation2 + $0x8] sm:$0x1] %vm250_vm3, %v1970_v27 }
 0x49a   : > { %v1972_v9 = vpop.permute.xlu2 %1971 }
 0x49b   : > { %1983 = vst.msk [vmem:[#allocation2 + $0x20] sm:$0x1] %vm248_vm2, %v1972_v9 }
 0x49c   : > { %1984 = vst.msk [vmem:[#allocation2 + $0x28] sm:$0x1] %vm250_vm3, %v1972_v9 }
 0x4a9   : > { %v1976_v25 = vpop.permute.xlu1 %1975 }
 0x4aa   : > { %1987 = vst.msk [vmem:[#allocation2 + $0x60] sm:$0x1] %vm248_vm2, %v1976_v25  ;;  %v1942_v28 = vpop.permute.xlu0 %1941 }
 0x4ab   : > { %1988 = vst.msk [vmem:[#allocation2 + $0x68] sm:$0x1] %vm250_vm3, %v1976_v25 }
 0x4ac   : > { %1958 = vst.msk [vmem:[#allocation2 + $0x48] sm:$0xfe] %vm246_vm1, %v1942_v28 }
 0x4ad   : > { %1960 = vst.msk [vmem:[#allocation2 + $0x58] sm:$0x1] %vm250_vm3, %v1942_v28 }
 0x4ae   : > { %1957 = vst.msk [vmem:[#allocation2 + $0x40] sm:$0xfe] %vm244_vm0, %v1942_v28 }
 0x4af   : > { %1959 = vst.msk [vmem:[#allocation2 + $0x50] sm:$0x1] %vm248_vm2, %v1942_v28 }
 0x4b1   : > { %v1996_v21 = vpop.permute.xlu1 %1995 }
 0x4b2   : > { %v1974_v54 = vpop.permute.xlu0 %1973  ;;  %2007 = vst.msk [vmem:[#allocation2 + $0x31] sm:$0x1] %vm248_vm2, %v1996_v21 }
 0x4b3   : > { %1985 = vst.msk [vmem:[#allocation2 + $0x40] sm:$0x1] %vm248_vm2, %v1974_v54 }
 0x4b4   : > { %1986 = vst.msk [vmem:[#allocation2 + $0x48] sm:$0x1] %vm250_vm3, %v1974_v54 }
 0x4b5   : > { %2008 = vst.msk [vmem:[#allocation2 + $0x39] sm:$0x1] %vm250_vm3, %v1996_v21 }
 0x4ba   : > { %v1998_v63 = vpop.permute.xlu0 %1997  ;;  %v2017_v59 = vld [vmem:[#allocation2 + $0x40] sm:$0xff] }
 0x4bb   : > { %2009 = vst.msk [vmem:[#allocation2 + $0x51] sm:$0x1] %vm248_vm2, %v1998_v63  ;;  %2037 = vrot.lane.b32.xlu0 %v2017_v59, %s4057_s23 }
 0x4bc   : > { %2010 = vst.msk [vmem:[#allocation2 + $0x59] sm:$0x1] %vm250_vm3, %v1998_v63 }
 0x4c2   : > { %v1938_v18 = vpop.permute.xlu0 %1937  ;;  %v2018_v60 = vld [vmem:[#allocation2 + $0x50] sm:$0x3] }
 0x4c3   : > { %1950 = vst.msk [vmem:[#allocation2 + $0x8] sm:$0xfe] %vm246_vm1, %v1938_v18  ;;  %2039 = vrot.lane.b32.xlu2 %v2018_v60, %s4057_s23 }
 0x4c4   : > { %1952 = vst.msk [vmem:[#allocation2 + $0x18] sm:$0x1] %vm250_vm3, %v1938_v18 }
 0x4c5   : > { %1949 = vst.msk [vmem:[#allocation2] sm:$0xfe] %vm244_vm0, %v1938_v18 }
 0x4c6   : > { %1951 = vst.msk [vmem:[#allocation2 + $0x10] sm:$0x1] %vm248_vm2, %v1938_v18 }
 0x4ca   : > { %v1944_v31 = vpop.permute.xlu0 %1943 }
 0x4cb   : > { %1962 = vst.msk [vmem:[#allocation2 + $0x68] sm:$0xfe] %vm246_vm1, %v1944_v31 }
 0x4cc   : > { %1964 = vst.msk [vmem:[#allocation2 + $0x78] sm:$0x1] %vm250_vm3, %v1944_v31  ;;  %v2013_v32 = vld [vmem:[#allocation2] sm:$0xff] }
 0x4cd   : > { %1961 = vst.msk [vmem:[#allocation2 + $0x60] sm:$0xfe] %vm244_vm0, %v1944_v31  ;;  %2029 = vrot.lane.b32.xlu1 %v2013_v32, %s4057_s23 }
 0x4ce   : > { %1963 = vst.msk [vmem:[#allocation2 + $0x70] sm:$0x1] %vm248_vm2, %v1944_v31 }
 0x4d2   : > { %v1994_v36 = vpop.permute.xlu0 %1993 }
 0x4d3   : > { %2005 = vst.msk [vmem:[#allocation2 + $0x11] sm:$0x1] %vm248_vm2, %v1994_v36 }
 0x4d4   : > { %2006 = vst.msk [vmem:[#allocation2 + $0x19] sm:$0x1] %vm250_vm3, %v1994_v36  ;;  %v2019_v19 = vld [vmem:[#allocation2 + $0x60] sm:$0xff] }
 0x4d5   : > { %2041 = vrot.lane.b32.xlu2 %v2019_v19, %s4057_s23 }
 0x4da   : > { %v2000_v33 = vpop.permute.xlu0 %1999  ;;  %v2014_v48 = vld [vmem:[#allocation2 + $0x10] sm:$0x3] }
 0x4db   : > { %2011 = vst.msk [vmem:[#allocation2 + $0x71] sm:$0x1] %vm248_vm2, %v2000_v33  ;;  %2031 = vrot.lane.b32.xlu0 %v2014_v48, %s4057_s23 }
 0x4dc   : > { %2012 = vst.msk [vmem:[#allocation2 + $0x79] sm:$0x1] %vm250_vm3, %v2000_v33 }
 0x4e2   : > { %v1940_v26 = vpop.permute.xlu0 %1939  ;;  %v2020_v34 = vld [vmem:[#allocation2 + $0x70] sm:$0x3] }
 0x4e3   : > { %1954 = vst.msk [vmem:[#allocation2 + $0x28] sm:$0xfe] %vm246_vm1, %v1940_v26  ;;  %2043 = vrot.lane.b32.xlu1 %v2020_v34, %s4057_s23 }
 0x4e4   : > { %1956 = vst.msk [vmem:[#allocation2 + $0x38] sm:$0x1] %vm250_vm3, %v1940_v26 }
 0x4e5   : > { %1953 = vst.msk [vmem:[#allocation2 + $0x20] sm:$0xfe] %vm244_vm0, %v1940_v26  ;;  %vm5447_vm0 = vcmask 1039360  }
 0x4e6   : > { %1955 = vst.msk [vmem:[#allocation2 + $0x30] sm:$0x1] %vm248_vm2, %v1940_v26  ;;  %vm5448_vm1 = vmmov %vm5447_vm0 }
 0x4e7   : > { %vm5449_vm2 = vmmov %vm5447_vm0 }
 0x4e8   : > { %vm5450_vm3 = vmmov %vm5447_vm0 }
 0x4e9   : > { %vm5457_vm12 = vmmov %vm5447_vm0 }
 0x4ea   : > { %vm5458_vm14 = vmmov %vm5447_vm0 }
 0x4ec   : > { %v2015_v37 = vld [vmem:[#allocation2 + $0x20] sm:$0xff] }
 0x4ed   : > { %v2016_v61 = vld [vmem:[#allocation2 + $0x30] sm:$0x3]  ;;  %2033 = vrot.lane.b32.xlu0 %v2015_v37, %s4057_s23 }
 0x4ee   : > { %2035 = vrot.lane.b32.xlu2 %v2016_v61, %s4057_s23 }
 0x51d   : > { %v2040_v24 = vpop.permute.xlu2 %2039 }
 0x51e   : > { %2058 = vst.msk [vmem:[#allocation2 + $0x50] sm:$0x3] %vm354_vm5, %v2040_v24 }
 0x525   : > { %v2066_v45 = vld [vmem:[#allocation2 + $0x50] sm:$0x3] }
 0x526   : > { %2087 = vrot.lane.b32.xlu0 %v2066_v45, %s4058_s8  ;;  %v2847_v2 = vld [vmem:[#allocation2 + $0x50] sm:$0x3] }
 0x527   : > { %v2415_v4 = vld [vmem:[#allocation2 + $0x50] sm:$0x1]  ;;  %v2865_v11 = vrot.slane %v2847_v2, 2 }
 0x528   : > { %v2433_v43 = vrot.slane %v2415_v4, 1  ;;  %v3116_v47 = vld [vmem:[#allocation2 + $0x50] sm:$0x3] }
 0x529   : > { %v2948_v17 = vld [vmem:[#allocation2 + $0x50] sm:$0x3]  ;;  %v3151_v31 = vrot.slane %v3116_v47, 2 }
 0x52a   : > { %v4910_v27 = vld [vmem:[#allocation2 + $0x50] sm:$0x1]  ;;  %v2983_v32 = vrot.slane %v2948_v17, 2 }
 0x52b   : > { %v2575_v33 = vrot.slane %v4910_v27, 1 }
 0x52d   : > { %v2038_v15 = vpop.permute.xlu0 %2037 }
 0x52e   : > { %2057 = vst.msk [vmem:[#allocation2 + $0x40] sm:$0xff] %vm352_vm4, %v2038_v15 }
 0x52f   : > { %v2042_v49 = vpop.permute.xlu2 %2041 }
 0x530   : > { %2059 = vst.msk [vmem:[#allocation2 + $0x60] sm:$0xff] %vm352_vm4, %v2042_v49 }
 0x535   : > { %v4886_v51 = vld [vmem:[#allocation2 + $0x40] sm:$0xff] }
 0x536   : > { %2085 = vrot.lane.b32.xlu1 %v4886_v51, %s4058_s8  ;;  %v2846_v12 = vld [vmem:[#allocation2 + $0x40] sm:$0xfc] }
 0x537   : > { %v4890_v23 = vld [vmem:[#allocation2 + $0x60] sm:$0xff]  ;;  %v2864_v3 = vrot.slane %v2846_v12, 2 }
 0x538   : > { %2089 = vrot.lane.b32.xlu0 %v4890_v23, %s4058_s8  ;;  %v2414_v35 = vld [vmem:[#allocation2 + $0x40] sm:$0xfe] }
 0x539   : > { %v2432_v22 = vrot.slane %v2414_v35, 1  ;;  %v2112_v5 = vld [vmem:[#allocation2 + $0x40] sm:$0xff]  ;;  %v2866_v8 = vsel %vm1165_vm7, %v2864_v3, %v2865_v11 }
 0x53a   : > { %v3114_v14 = vld [vmem:[#allocation2 + $0x40] sm:$0xfc]  ;;  %v2114_v42 = vrot.slane %v2112_v5, 4  ;;  %v2874_v59 = vrot.slane %v2866_v8, 4 }
 0x53b   : > { %v2434_v55 = vsel %vm732_vm6, %v2432_v22, %v2433_v43  ;;  %v3150_v9 = vrot.slane %v3114_v14, 2  ;;  %v2946_v25 = vld [vmem:[#allocation2 + $0x40] sm:$0xfc] }
 0x53c   : > { %v2442_v60 = vrot.slane %v2434_v55, 4  ;;  %v4917_v36 = vld [vmem:[#allocation2 + $0x40] sm:$0xfe]  ;;  %v2982_v24 = vrot.slane %v2946_v25, 2 }
 0x53d   : > { %v2848_v48 = vld [vmem:[#allocation2 + $0x60] sm:$0xfc] }
 0x53e   : > { %v2416_v34 = vld [vmem:[#allocation2 + $0x60] sm:$0xfe] }
 0x53f   : > { %v2030_v38 = vpop.permute.xlu1 %2029  ;;  %v4926_v45 = vld [vmem:[#allocation2 + $0x60] sm:$0xfc] }
 0x540   : > { %2053 = vst.msk [vmem:[#allocation2] sm:$0xff] %vm352_vm4, %v2030_v38  ;;  %v4928_v38 = vld [vmem:[#allocation2 + $0x60] sm:$0xff]  ;;  %v2988_v3 = vrot.slane %v4926_v45, 2 }
 0x541   : > { %v2126_v22 = vrot.slane %v4928_v38, 4 }
 0x547   : > { %v4895_v39 = vld [vmem:[#allocation2] sm:$0xff] }
 0x548   : > { %v2036_v46 = vpop.permute.xlu2 %2035  ;;  %2077 = vrot.lane.b32.xlu2 %v4895_v39, %s4058_s8  ;;  %v2842_v1 = vld [vmem:[#allocation2] sm:$0xfc] }
 0x549   : > { %2056 = vst.msk [vmem:[#allocation2 + $0x30] sm:$0x3] %vm354_vm5, %v2036_v46  ;;  %v2858_v56 = vrot.slane %v2842_v1, 2  ;;  %v2410_v0 = vld [vmem:[#allocation2] sm:$0xfe]  ;;  %v2867_v1 = vrot.slane %v2848_v48, 2 }
 0x54a   : > { %v2110_v10 = vld [vmem:[#allocation2] sm:$0xff]  ;;  %v2426_v50 = vrot.slane %v2410_v0, 1 }
 0x54b   : > { %v2116_v20 = vrot.slane %v2110_v10, 4  ;;  %v2115_v54 = vsel %vm418_vm8, %v2114_v42, %v2110_v10 }
 0x54c   : > { %v4924_v61 = vperm.slane %v2115_v54, %v4314_v41 }
 0x54d   : > { %v2032_v29 = vpop.permute.xlu0 %2031  ;;  %v2117_v19 = vsel %vm418_vm8, %v2112_v5, %v2116_v20 }
 0x54e   : > { %2054 = vst.msk [vmem:[#allocation2 + $0x10] sm:$0x3] %vm354_vm5, %v2032_v29  ;;  %v3152_v29 = vsel %vm1165_vm7, %v3150_v9, %v3151_v31  ;;  %v4934_v12 = vperm.slane %v2117_v19, %v4314_v41  ;;  %v2140_v5 = vrot.slane %v4924_v61, 4 }
 0x550   : > { %v2064_v57 = vld [vmem:[#allocation2 + $0x30] sm:$0x3]  ;;  %v2152_v42 = vrot.slane %v4934_v12, 4 }
 0x551   : > { %2083 = vrot.lane.b32.xlu0 %v2064_v57, %s4058_s8  ;;  %v2574_v57 = vrot.slane %v4917_v36, 1 }
 0x555   : > { %v2044_v7 = vpop.permute.xlu1 %2043  ;;  %v2062_v58 = vld [vmem:[#allocation2 + $0x10] sm:$0x3] }
 0x556   : > { %2060 = vst.msk [vmem:[#allocation2 + $0x70] sm:$0x3] %vm354_vm5, %v2044_v7  ;;  %2079 = vrot.lane.b32.xlu1 %v2062_v58, %s4058_s8  ;;  %v2843_v53 = vld [vmem:[#allocation2 + $0x10] sm:$0x3]  ;;  %vm5452_vm5 = vmmov %vm5447_vm0 }
 0x557   : > { %v2859_v6 = vrot.slane %v2843_v53, 2  ;;  %v2411_v30 = vld [vmem:[#allocation2 + $0x10] sm:$0x1] }
 0x558   : > { %v2427_v44 = vrot.slane %v2411_v30, 1  ;;  %v2845_v7 = vld [vmem:[#allocation2 + $0x30] sm:$0x3] }
 0x559   : > { %2330 = vrot.lane.b32.xlu0 %v4886_v51, %s4057_s23  ;;  %v2860_v13 = vsel %vm1165_vm7, %v2858_v56, %v2859_v6  ;;  %v2413_v58 = vld [vmem:[#allocation2 + $0x30] sm:$0x1]  ;;  %v2435_v6 = vrot.slane %v2416_v34, 1 }
 0x55a   : > { %v2876_v28 = vrot.slane %v2860_v13, 4  ;;  %v2428_v21 = vsel %vm732_vm6, %v2426_v50, %v2427_v44  ;;  %v2875_v26 = vsel %vm418_vm8, %v2874_v59, %v2860_v13  ;;  %v2430_v10 = vrot.slane %v2413_v58, 1 }
 0x55b   : > { %v2443_v37 = vsel %vm418_vm8, %v2442_v60, %v2428_v21  ;;  %v2444_v53 = vrot.slane %v2428_v21, 4  ;;  %v2881_v2 = vperm.slane %v2875_v26, %v4314_v41  ;;  %v4957_v44 = vsel %vm1165_vm7, %v2982_v24, %v2983_v32 }
 0x55c   : > { %v2877_v46 = vsel %vm418_vm8, %v2866_v8, %v2876_v28  ;;  %v2449_v30 = vperm.slane %v2443_v37, %v4314_v41 }
 0x55d   : > { %v2068_v52 = vld [vmem:[#allocation2 + $0x70] sm:$0x3]  ;;  %v4948_v56 = vperm.slane %v2877_v46, %v4314_v41  ;;  %v2445_v13 = vsel %vm418_vm8, %v2434_v55, %v2444_v53  ;;  %v2900_v50 = vrot.slane %v2881_v2, 4 }
 0x55e   : > { %2091 = vrot.lane.b32.xlu2 %v2068_v52, %s4058_s8  ;;  %v2849_v63 = vld [vmem:[#allocation2 + $0x70] sm:$0x3]  ;;  %v4968_v55 = vperm.slane %v2445_v13, %v4314_v41 }
 0x55f   : > { %v2034_v16 = vpop.permute.xlu0 %2033  ;;  %v2417_v18 = vld [vmem:[#allocation2 + $0x70] sm:$0x1]  ;;  %v2868_v15 = vrot.slane %v2849_v63, 2  ;;  %v2912_v28 = vrot.slane %v4948_v56, 4 }
 0x560   : > { %2055 = vst.msk [vmem:[#allocation2 + $0x20] sm:$0xff] %vm352_vm4, %v2034_v16  ;;  %v2436_v49 = vrot.slane %v2417_v18, 1  ;;  %v4938_v35 = vld [vmem:[#allocation2 + $0x70] sm:$0x3]  ;;  %v2468_v16 = vrot.slane %v2449_v30, 4  ;;  %vm5451_vm4 = vmmov %vm5447_vm0 }
 0x561   : > { %2322 = vrot.lane.b32.xlu0 %v4895_v39, %s4057_s23  ;;  %v2869_v0 = vsel %vm1165_vm7, %v2867_v1, %v2868_v15  ;;  %v2989_v43 = vrot.slane %v4938_v35, 2 }
 0x562   : > { %v2437_v11 = vsel %vm732_vm6, %v2435_v6, %v2436_v49  ;;  %v2886_v17 = vrot.slane %v2869_v0, 4 }
 0x563   : > { %v2454_v9 = vrot.slane %v2437_v11, 4 }
 0x566   : > { %2202 = vrot.lane.b32.xlu2 %v4886_v51, %s4059_s5  ;;  %v2862_v51 = vrot.slane %v2845_v7, 2 }
 0x567   : > { %v4942_v4 = vld [vmem:[#allocation2 + $0x20] sm:$0xff] }
 0x568   : > { %2081 = vrot.lane.b32.xlu1 %v4942_v4, %s4058_s8  ;;  %v2844_v52 = vld [vmem:[#allocation2 + $0x20] sm:$0xfc] }
 0x569   : > { %2198 = vrot.lane.b32.xlu0 %v4942_v4, %s4059_s5  ;;  %v2412_v14 = vld [vmem:[#allocation2 + $0x20] sm:$0xfe]  ;;  %v2861_v8 = vrot.slane %v2844_v52, 2 }
 0x56a   : > { %v2429_v20 = vrot.slane %v2412_v14, 1  ;;  %v2111_v47 = vld [vmem:[#allocation2 + $0x20] sm:$0xff]  ;;  %v2940_v14 = vld [vmem:[#allocation2 + $0x10] sm:$0x3] }
 0x56b   : > { %v2127_v25 = vsel %vm418_vm8, %v2126_v22, %v2111_v47  ;;  %v2863_v21 = vsel %vm1165_vm7, %v2861_v8, %v2862_v51  ;;  %v2128_v34 = vrot.slane %v2111_v47, 4  ;;  %v2480_v22 = vrot.slane %v4968_v55, 4  ;;  %v2942_v27 = vld [vmem:[#allocation2 + $0x20] sm:$0xfc] }
 0x56c   : > { %v2431_v54 = vsel %vm732_vm6, %v2429_v20, %v2430_v10  ;;  %v2133_v63 = vperm.slane %v2127_v25, %v4314_v41  ;;  %v2887_v59 = vsel %vm418_vm8, %v2886_v17, %v2863_v21  ;;  %v2888_v18 = vrot.slane %v2863_v21, 4 }
 0x56d   : > { %v2455_v60 = vsel %vm418_vm8, %v2454_v9, %v2431_v54  ;;  %v2456_v31 = vrot.slane %v2431_v54, 4  ;;  %v2893_v32 = vperm.slane %v2887_v59, %v4314_v41  ;;  %v2971_v59 = vrot.slane %v2940_v14, 2 }
 0x56e   : > { %2206 = vrot.lane.b32.xlu2 %v4890_v23, %s4059_s5  ;;  %v2461_v19 = vperm.slane %v2455_v60, %v4314_v41  ;;  %v2141_v48 = vsel %vm418_vm8, %v2133_v63, %v2140_v5  ;;  %v2138_v26 = vrot.slane %v2133_v63, 4  ;;  %v2889_v24 = vsel %vm418_vm8, %v2869_v0, %v2888_v18  ;;  %v2684_v18 = vld [vmem:[#allocation2 + $0x50] sm:$0x1] }
 0x56f   : > { %v2149_v37 = vperm.slane %v2141_v48, %v4333_v62  ;;  %3759 = vst.sshfl [vmem:[#allocation3 + $0x10] sm:$0x55 pattern:$0x73516240] %v2141_v48  ;;  %v2457_v15 = vsel %vm418_vm8, %v2437_v11, %v2456_v31  ;;  %v2901_v49 = vsel %vm418_vm8, %v2893_v32, %v2900_v50  ;;  %v2898_v46 = vrot.slane %v2893_v32, 4 }
 0x570   : > { %2194 = vrot.lane.b32.xlu1 %v4895_v39, %s4059_s5  ;;  %v2469_v7 = vsel %vm418_vm8, %v2461_v19, %v2468_v16  ;;  %v2466_v58 = vrot.slane %v2461_v19, 4  ;;  %v2909_v53 = vperm.slane %v2901_v49, %v4333_v62  ;;  %3771 = vst.sshfl [vmem:[#allocation3 + $0xd0] sm:$0x55 pattern:$0x73516240] %v2901_v49  ;;  %v2139_v6 = vsel %vm418_vm8, %v2138_v26, %v4924_v61 }
 0x571   : > { %3170 = vrot.lane.b32.xlu0 %v3152_v29, %s4057_s23  ;;  %v2477_v1 = vperm.slane %v2469_v7, %v4333_v62  ;;  %v2899_v39 = vsel %vm418_vm8, %v2898_v46, %v2881_v2  ;;  %v2145_v51 = vperm.slane %v2139_v6, %v4333_v62  ;;  %3758 = vst.sshfl [vmem:[#allocation3] sm:$0x55 pattern:$0x73516240] %v2139_v6  ;;  %v2164_v61 = vrot.slane %v2149_v37, 4 }
 0x572   : > { %v2467_v5 = vsel %vm418_vm8, %v2466_v58, %v2449_v30  ;;  %v2897_v0 = vperm.slane %v2889_v24, %v4314_v41  ;;  %v2924_v29 = vrot.slane %v2909_v53, 4  ;;  %v2905_v10 = vperm.slane %v2899_v39, %v4333_v62  ;;  %3770 = vst.sshfl [vmem:[#allocation3 + $0xc0] sm:$0x55 pattern:$0x73516240] %v2899_v39 }
 0x573   : > { %v2492_v11 = vrot.slane %v2477_v1, 4  ;;  %v2473_v52 = vperm.slane %v2467_v5, %v4333_v62  ;;  %v2129_v2 = vsel %vm418_vm8, %v4928_v38, %v2128_v34  ;;  %v2162_v47 = vrot.slane %v2145_v51, 4  ;;  %v3118_v5 = vld [vmem:[#allocation2 + $0x60] sm:$0xfc]  ;;  %v3108_v51 = vld [vmem:[#allocation2 + $0x10] sm:$0x3] }
 0x574   : > { %v2913_v13 = vsel %vm418_vm8, %v2897_v0, %v2912_v28  ;;  %v2910_v8 = vrot.slane %v2897_v0, 4  ;;  %v2922_v30 = vrot.slane %v2905_v10, 4  ;;  %v2925_v50 = vsel %vm418_vm8, 0.0, %v2924_v29  ;;  %v2682_v28 = vld [vmem:[#allocation2 + $0x40] sm:$0xfe] }
 0x575   : > { %2524 = vst [vmem:[#allocation3 + $0x50] sm:$0xf0] %v2492_v11  ;;  %v2490_v20 = vrot.slane %v2473_v52, 4  ;;  %v2493_v16 = vsel %vm418_vm8, 0.0, %v2492_v11  ;;  %v2921_v9 = vperm.slane %v2913_v13, %v4333_v62  ;;  %v2465_v63 = vperm.slane %v2457_v15, %v4314_v41  ;;  %v3120_v15 = vld [vmem:[#allocation2 + $0x70] sm:$0x3] }
 0x576   : > { %3002 = vrot.lane.b32.xlu2 %v4957_v44, %s4059_s5  ;;  %2933 = vst [vmem:[#allocation3 + $0xd8] sm:$0xf] %v2925_v50  ;;  %v2509_v17 = vrot.slane %v2493_v16, 4  ;;  %v2911_v25 = vsel %vm418_vm8, %v2910_v8, %v4948_v56  ;;  %v2923_v38 = vsel %vm418_vm8, 0.0, %v2922_v30  ;;  %v2990_v44 = vsel %vm1165_vm7, %v2988_v3, %v2989_v43  ;;  %v2938_v56 = vld [vmem:[#allocation2] sm:$0xfc] }
 0x577   : > { %2522 = vst [vmem:[#allocation3 + $0x40] sm:$0xf0] %v2490_v20  ;;  %v2491_v21 = vsel %vm418_vm8, 0.0, %v2490_v20  ;;  %v2917_v54 = vperm.slane %v2911_v25, %v4333_v62  ;;  %v2137_v31 = vperm.slane %v2129_v2, %v4314_v41  ;;  %v2928_v32 = vrot.slane %v2921_v9, 4  ;;  %v3106_v29 = vld [vmem:[#allocation2] sm:$0xfc] }
 0x578   : > { %2334 = vrot.lane.b32.xlu1 %v4890_v23, %s4057_s23  ;;  %2931 = vst [vmem:[#allocation3 + $0xc8] sm:$0xf] %v2923_v38  ;;  %v2507_v60 = vrot.slane %v2491_v21, 4  ;;  %v2165_v35 = vsel %vm418_vm8, 0.0, %v2164_v61  ;;  %v2481_v45 = vsel %vm418_vm8, %v2465_v63, %v2480_v22  ;;  %v2478_v19 = vrot.slane %v2465_v63, 4 }
 0x579   : > { %3006 = vrot.lane.b32.xlu0 %v2990_v44, %s4059_s5  ;;  %2525 = vst [vmem:[#allocation3 + $0x58] sm:$0xf0] %v2509_v17  ;;  %v2718_v3 = vrot.slane %v2682_v28, 1  ;;  %v2489_v23 = vperm.slane %v2481_v45, %v4333_v62  ;;  %v2153_v43 = vsel %vm418_vm8, %v2137_v31, %v2152_v42  ;;  %v2150_v48 = vrot.slane %v2137_v31, 4  ;;  %v2944_v61 = vld [vmem:[#allocation2 + $0x30] sm:$0x3] }
 0x57a   : > { %3773 = vst.sshfl [vmem:[#allocation3 + $0xf0] sm:$0x55 pattern:$0x73516240] %v2913_v13  ;;  %v2970_v26 = vrot.slane %v2938_v56, 2  ;;  %v2926_v34 = vrot.slane %v2917_v54, 4  ;;  %v2479_v24 = vsel %vm418_vm8, %v2478_v19, %v4968_v55  ;;  %v2161_v7 = vperm.slane %v2153_v43, %v4333_v62 }
 0x57b   : > { %2523 = vst [vmem:[#allocation3 + $0x48] sm:$0xf0] %v2507_v60  ;;  %v2163_v37 = vsel %vm418_vm8, 0.0, %v2162_v47  ;;  %v2496_v49 = vrot.slane %v2489_v23, 4  ;;  %v2485_v46 = vperm.slane %v2479_v24, %v4333_v62  ;;  %v2151_v58 = vsel %vm418_vm8, %v2150_v48, %v4934_v12  ;;  %v2688_v47 = vld [vmem:[#allocation2 + $0x70] sm:$0x1] }
 0x57c   : > { %2173 = vst [vmem:[#allocation3 + $0x18] sm:$0xf] %v2165_v35  ;;  %v2972_v42 = vsel %vm1165_vm7, %v2970_v26, %v2971_v59  ;;  %v2719_v53 = vrot.slane %v2684_v18, 1  ;;  %v2929_v1 = vsel %vm418_vm8, 0.0, %v2928_v32  ;;  %v2157_v6 = vperm.slane %v2151_v58, %v4333_v62  ;;  %v2676_v28 = vld [vmem:[#allocation2 + $0x10] sm:$0x1] }
 0x57d   : > { %3772 = vst.sshfl [vmem:[#allocation3 + $0xe0] sm:$0x55 pattern:$0x73516240] %v2911_v25  ;;  %v2494_v55 = vrot.slane %v2485_v46, 4  ;;  %v2497_v22 = vsel %vm418_vm8, 0.0, %v2496_v49  ;;  %v2576_v12 = vsel %vm732_vm6, %v2574_v57, %v2575_v33 }
 0x57e   : > { %2994 = vrot.lane.b32.xlu2 %v2972_v42, %s4059_s5  ;;  %2171 = vst [vmem:[#allocation3 + $0x8] sm:$0xf] %v2163_v37  ;;  %v2720_v39 = vsel %vm732_vm6, %v2718_v3, %v2719_v53  ;;  %v3157_v0 = vrot.slane %v3120_v15, 2  ;;  %v2168_v10 = vrot.slane %v2161_v7, 4  ;;  %v2927_v11 = vsel %vm418_vm8, 0.0, %v2926_v34 }
 0x57f   : > { %2528 = vst [vmem:[#allocation3 + $0x70] sm:$0xf0] %v2496_v49  ;;  %v2495_v52 = vsel %vm418_vm8, 0.0, %v2494_v55  ;;  %v2166_v36 = vrot.slane %v2157_v6, 4  ;;  %v2513_v33 = vrot.slane %v2497_v22, 4  ;;  %v3156_v14 = vrot.slane %v3118_v5, 2 }
 0x580   : > { %2738 = vrot.lane.b32.xlu1 %v2720_v39, %s4057_s23  ;;  %2937 = vst [vmem:[#allocation3 + $0xf8] sm:$0xf] %v2929_v1  ;;  %v2511_v57 = vrot.slane %v2495_v52, 4  ;;  %v3139_v13 = vrot.slane %v3108_v51, 2  ;;  %v2976_v8 = vrot.slane %v2942_v27, 2  ;;  %v2169_v2 = vsel %vm418_vm8, 0.0, %v2168_v10 }
 0x581   : > { %2594 = vrot.lane.b32.xlu0 %v2576_v12, %s4059_s5  ;;  %2526 = vst [vmem:[#allocation3 + $0x60] sm:$0xf0] %v2494_v55  ;;  %v3158_v30 = vsel %vm1165_vm7, %v3156_v14, %v3157_v0  ;;  %v3138_v50 = vrot.slane %v3106_v29, 2  ;;  %v2167_v20 = vsel %vm418_vm8, 0.0, %v2166_v36  ;;  %v2977_v16 = vrot.slane %v2944_v61, 2 }
 0x582   : > { %3761 = vst.sshfl [vmem:[#allocation3 + $0x30] sm:$0x55 pattern:$0x73516240] %v2153_v43  ;;  %v2686_v25 = vld [vmem:[#allocation2 + $0x60] sm:$0xfe] }
 0x583   : > { %2935 = vst [vmem:[#allocation3 + $0xe8] sm:$0xf] %v2927_v11  ;;  %v3140_v17 = vsel %vm1165_vm7, %v3138_v50, %v3139_v13  ;;  %v2978_v9 = vsel %vm1165_vm7, %v2976_v8, %v2977_v16  ;;  %v2725_v38 = vrot.slane %v2688_v47, 1  ;;  %v2678_v21 = vld [vmem:[#allocation2 + $0x20] sm:$0xfe]  ;;  %v2724_v63 = vrot.slane %v2686_v25, 1 }
 0x584   : > { %3760 = vst.sshfl [vmem:[#allocation3 + $0x20] sm:$0x55 pattern:$0x73516240] %v2151_v58  ;;  %v2674_v54 = vld [vmem:[#allocation2] sm:$0xfe] }
 0x585   : > { %2529 = vst [vmem:[#allocation3 + $0x78] sm:$0xf0] %v2513_v33  ;;  %v2680_v44 = vld [vmem:[#allocation2 + $0x30] sm:$0x1]  ;;  %v2707_v56 = vrot.slane %v2676_v28, 1  ;;  %v2712_v59 = vrot.slane %v2678_v21, 1  ;;  %v2726_v18 = vsel %vm732_vm6, %v2724_v63, %v2725_v38 }
 0x586   : > { %3174 = vrot.lane.b32.xlu2 %v3158_v30, %s4057_s23  ;;  %2527 = vst [vmem:[#allocation3 + $0x68] sm:$0xf0] %v2511_v57  ;;  %v2706_v60 = vrot.slane %v2674_v54, 1  ;;  %v2713_v31 = vrot.slane %v2680_v44, 1  ;;  %v2544_v32 = vld [vmem:[#allocation2 + $0x70] sm:$0x1] }
 0x587   : > { %2177 = vst [vmem:[#allocation3 + $0x38] sm:$0xf] %v2169_v2  ;;  %v2542_v19 = vld [vmem:[#allocation2 + $0x60] sm:$0xfe]  ;;  %v2581_v23 = vrot.slane %v2544_v32, 1 }
 0x588   : > { %3162 = vrot.lane.b32.xlu1 %v3140_v17, %s4057_s23  ;;  %2175 = vst [vmem:[#allocation3 + $0x28] sm:$0xf] %v2167_v20  ;;  %v2708_v35 = vsel %vm732_vm6, %v2706_v60, %v2707_v56  ;;  %v2714_v45 = vsel %vm732_vm6, %v2712_v59, %v2713_v31  ;;  %v3110_v3 = vld [vmem:[#allocation2 + $0x20] sm:$0xfc]  ;;  %v3112_v43 = vld [vmem:[#allocation2 + $0x30] sm:$0x3] }
 0x589   : > { %2998 = vrot.lane.b32.xlu0 %v2978_v9, %s4059_s5  ;;  %v2580_v48 = vrot.slane %v2542_v19, 1  ;;  %v3144_v26 = vrot.slane %v3110_v3, 2  ;;  %v3145_v37 = vrot.slane %v3112_v43, 2  ;;  %v2534_v24 = vld [vmem:[#allocation2 + $0x20] sm:$0xfe] }
 0x58a   : > { %v2536_v46 = vld [vmem:[#allocation2 + $0x30] sm:$0x1]  ;;  %v2568_v58 = vrot.slane %v2534_v24, 1  ;;  %v2530_v42 = vld [vmem:[#allocation2] sm:$0xfe] }
 0x58b   : > { %v2582_v34 = vsel %vm732_vm6, %v2580_v48, %v2581_v23  ;;  %v3146_v15 = vsel %vm1165_vm7, %v3144_v26, %v3145_v37  ;;  %v2532_v7 = vld [vmem:[#allocation2 + $0x10] sm:$0x1]  ;;  %v2569_v53 = vrot.slane %v2536_v46, 1  ;;  %v2562_v55 = vrot.slane %v2530_v42, 1 }
 0x58c   : > { %v2563_v1 = vrot.slane %v2532_v7, 1 }
 0x58d   : > { %v2570_v6 = vsel %vm732_vm6, %v2568_v58, %v2569_v53 }
 0x58e   : > { %2742 = vrot.lane.b32.xlu2 %v2726_v18, %s4057_s23  ;;  %v2564_v22 = vsel %vm732_vm6, %v2562_v55, %v2563_v1 }
 0x590   : > { %2730 = vrot.lane.b32.xlu1 %v2708_v35, %s4057_s23 }
 0x591   : > { %2734 = vrot.lane.b32.xlu0 %v2714_v45, %s4057_s23 }
 0x596   : > { %2598 = vrot.lane.b32.xlu2 %v2582_v34, %s4059_s5 }
 0x598   : > { %3166 = vrot.lane.b32.xlu1 %v3146_v15, %s4057_s23  ;;  %v2088_v49 = vpop.permute.xlu0 %2087 }
 0x599   : > { %2106 = vst.msk [vmem:[#allocation2 + $0x58] sm:$0x3] %vm404_vm10, %v2088_v49 }
 0x59e   : > { %2590 = vrot.lane.b32.xlu2 %v2570_v6, %s4059_s5 }
 0x5a0   : > { %2586 = vrot.lane.b32.xlu1 %v2564_v22, %s4059_s5  ;;  %v2685_v11 = vld [vmem:[#allocation2 + $0x58] sm:$0x1] }
 0x5a1   : > { %v2722_v36 = vrot.slane %v2685_v11, 1  ;;  %v3117_v61 = vld [vmem:[#allocation2 + $0x58] sm:$0x3] }
 0x5a2   : > { %v2078_v12 = vpop.permute.xlu2 %2077  ;;  %v2949_v13 = vld [vmem:[#allocation2 + $0x58] sm:$0x3]  ;;  %v3154_v30 = vrot.slane %v3117_v61, 2 }
 0x5a3   : > { %2101 = vst.msk [vmem:[#allocation2 + $0x8] sm:$0xff] %vm402_vm9, %v2078_v12  ;;  %v2986_v50 = vrot.slane %v2949_v13, 2  ;;  %v2541_v56 = vld [vmem:[#allocation2 + $0x58] sm:$0x1] }
 0x5a4   : > { %v2578_v18 = vrot.slane %v2541_v56, 1 }
 0x5a8   : > { %v2086_v39 = vpop.permute.xlu1 %2085 }
 0x5a9   : > { %2105 = vst.msk [vmem:[#allocation2 + $0x48] sm:$0xff] %vm402_vm9, %v2086_v39 }
 0x5aa   : > { %v2090_v5 = vpop.permute.xlu0 %2089  ;;  %v2179_v51 = vld [vmem:[#allocation2 + $0x8] sm:$0xff] }
 0x5ab   : > { %2107 = vst.msk [vmem:[#allocation2 + $0x68] sm:$0xff] %vm402_vm9, %v2090_v5  ;;  %2196 = vrot.lane.b32.xlu0 %v2179_v51, %s4059_s5  ;;  %v3107_v60 = vld [vmem:[#allocation2 + $0x8] sm:$0xfc] }
 0x5ac   : > { %v2939_v31 = vld [vmem:[#allocation2 + $0x8] sm:$0xfc]  ;;  %v3141_v3 = vrot.slane %v3107_v60, 2 }
 0x5ad   : > { %v2973_v43 = vrot.slane %v2939_v31, 2  ;;  %v2675_v15 = vld [vmem:[#allocation2 + $0x8] sm:$0xfe] }
 0x5ae   : > { %v2709_v58 = vrot.slane %v2675_v15, 1 }
 0x5b0   : > { %v2311_v0 = vld [vmem:[#allocation2 + $0x48] sm:$0xff] }
 0x5b1   : > { %2332 = vrot.lane.b32.xlu2 %v2311_v0, %s4057_s23  ;;  %2204 = vrot.lane.b32.xlu1 %v2311_v0, %s4059_s5  ;;  %v2683_v10 = vld [vmem:[#allocation2 + $0x48] sm:$0xfe] }
 0x5b2   : > { %v2313_v29 = vld [vmem:[#allocation2 + $0x68] sm:$0xff]  ;;  %v2721_v52 = vrot.slane %v2683_v10, 1 }
 0x5b3   : > { %2336 = vrot.lane.b32.xlu0 %v2313_v29, %s4057_s23  ;;  %v3115_v33 = vld [vmem:[#allocation2 + $0x48] sm:$0xfc] }
 0x5b4   : > { %v2947_v57 = vld [vmem:[#allocation2 + $0x48] sm:$0xfc]  ;;  %v2723_v14 = vsel %vm732_vm6, %v2721_v52, %v2722_v36  ;;  %v3153_v8 = vrot.slane %v3115_v33, 2 }
 0x5b5   : > { %v2985_v2 = vrot.slane %v2947_v57, 2  ;;  %v2951_v25 = vld [vmem:[#allocation2 + $0x68] sm:$0xfc] }
 0x5b6   : > { %v3155_v16 = vsel %vm1165_vm7, %v3153_v8, %v3154_v30  ;;  %v2991_v38 = vrot.slane %v2951_v25, 2  ;;  %v2539_v44 = vld [vmem:[#allocation2 + $0x48] sm:$0xfe] }
 0x5b7   : > { %v2987_v47 = vsel %vm1165_vm7, %v2985_v2, %v2986_v50  ;;  %v2577_v59 = vrot.slane %v2539_v44, 1  ;;  %v3119_v49 = vld [vmem:[#allocation2 + $0x68] sm:$0xfc] }
 0x5b8   : > { %v2092_v27 = vpop.permute.xlu2 %2091  ;;  %v3159_v42 = vrot.slane %v3119_v49, 2  ;;  %v2687_v39 = vld [vmem:[#allocation2 + $0x68] sm:$0xfe] }
 0x5b9   : > { %2108 = vst.msk [vmem:[#allocation2 + $0x78] sm:$0x3] %vm404_vm10, %v2092_v27  ;;  %2324 = vrot.lane.b32.xlu2 %v2179_v51, %s4057_s23  ;;  %2208 = vrot.lane.b32.xlu1 %v2313_v29, %s4059_s5  ;;  %v2579_v32 = vsel %vm732_vm6, %v2577_v59, %v2578_v18  ;;  %v2727_v51 = vrot.slane %v2687_v39, 1  ;;  %v2543_v50 = vld [vmem:[#allocation2 + $0x68] sm:$0xfe] }
 0x5bb   : > { %2740 = vrot.lane.b32.xlu0 %v2723_v14, %s4057_s23 }
 0x5c0   : > { %v5082_v20 = vpop.permute.xlu2 %2202  ;;  %v2953_v17 = vld [vmem:[#allocation2 + $0x78] sm:$0x3] }
 0x5c1   : > { %3172 = vrot.lane.b32.xlu2 %v3155_v16, %s4057_s23  ;;  %3004 = vrot.lane.b32.xlu1 %v2987_v47, %s4059_s5  ;;  %v2992_v28 = vrot.slane %v2953_v17, 2  ;;  %v3121_v24 = vld [vmem:[#allocation2 + $0x78] sm:$0x3] }
 0x5c2   : > { %v3160_v7 = vrot.slane %v3121_v24, 2  ;;  %v2689_v22 = vld [vmem:[#allocation2 + $0x78] sm:$0x1] }
 0x5c3   : > { %v2084_v9 = vpop.permute.xlu0 %2083  ;;  %v2993_v63 = vsel %vm1165_vm7, %v2991_v38, %v2992_v28  ;;  %v2728_v5 = vrot.slane %v2689_v22, 1  ;;  %v2545_v14 = vld [vmem:[#allocation2 + $0x78] sm:$0x1]  ;;  %v2583_v28 = vrot.slane %v2543_v50, 1 }
 0x5c4   : > { %2104 = vst.msk [vmem:[#allocation2 + $0x38] sm:$0x3] %vm404_vm10, %v2084_v9  ;;  %v3161_v55 = vsel %vm1165_vm7, %v3159_v42, %v3160_v7  ;;  %v2584_v17 = vrot.slane %v2545_v14, 1  ;;  %v2531_v9 = vld [vmem:[#allocation2 + $0x8] sm:$0xfe] }
 0x5c5   : > { %v2729_v10 = vsel %vm732_vm6, %v2727_v51, %v2728_v5  ;;  %v2565_v44 = vrot.slane %v2531_v9, 1 }
 0x5c8   : > { %v5089_v21 = vpop.permute.xlu2 %2206  ;;  %v2080_v54 = vpop.permute.xlu1 %2079 }
 0x5c9   : > { %2102 = vst.msk [vmem:[#allocation2 + $0x18] sm:$0x3] %vm404_vm10, %v2080_v54  ;;  %3008 = vrot.lane.b32.xlu2 %v2993_v63, %s4059_s5  ;;  %v2585_v63 = vsel %vm732_vm6, %v2583_v28, %v2584_v17  ;;  %vm5456_vm10 = vmmov %vm5447_vm0 }
 0x5cb   : > { %v2331_v12 = vpop.permute.xlu0 %2330  ;;  %v3113_v0 = vld [vmem:[#allocation2 + $0x38] sm:$0x3] }
 0x5cc   : > { %v2945_v29 = vld [vmem:[#allocation2 + $0x38] sm:$0x3]  ;;  %v3148_v36 = vrot.slane %v3113_v0, 2 }
 0x5cd   : > { %v2980_v57 = vrot.slane %v2945_v29, 2  ;;  %v2681_v25 = vld [vmem:[#allocation2 + $0x38] sm:$0x1] }
 0x5ce   : > { %v2716_v56 = vrot.slane %v2681_v25, 1  ;;  %v2537_v31 = vld [vmem:[#allocation2 + $0x38] sm:$0x1] }
 0x5d0   : > { %v3109_v35 = vld [vmem:[#allocation2 + $0x18] sm:$0x3]  ;;  %v5095_v19 = vpop.permute.xlu2 %3002 }
 0x5d1   : > { %v2941_v45 = vld [vmem:[#allocation2 + $0x18] sm:$0x3]  ;;  %2596 = vrot.lane.b32.xlu2 %v2579_v32, %s4059_s5  ;;  %v3142_v23 = vrot.slane %v3109_v35, 2 }
 0x5d2   : > { %v2974_v48 = vrot.slane %v2941_v45, 2  ;;  %v2677_v37 = vld [vmem:[#allocation2 + $0x18] sm:$0x1] }
 0x5d3   : > { %v3143_v26 = vsel %vm1165_vm7, %v3141_v3, %v3142_v23  ;;  %v2710_v46 = vrot.slane %v2677_v37, 1  ;;  %v2323_v2 = vpop.permute.xlu0 %2322  ;;  %v2533_v16 = vld [vmem:[#allocation2 + $0x18] sm:$0x1]  ;;  %v2572_v23 = vrot.slane %v2537_v31, 1 }
 0x5d4   : > { %v2975_v34 = vsel %vm1165_vm7, %v2973_v43, %v2974_v48  ;;  %3164 = vrot.lane.b32.xlu0 %v3143_v26, %s4057_s23  ;;  %v2566_v38 = vrot.slane %v2533_v16, 1 }
 0x5d5   : > { %2996 = vrot.lane.b32.xlu1 %v2975_v34, %s4059_s5  ;;  %v2711_v6 = vsel %vm732_vm6, %v2709_v58, %v2710_v46 }
 0x5d6   : > { %v2567_v18 = vsel %vm732_vm6, %v2565_v44, %v2566_v38 }
 0x5d8   : > { %v5102_v1 = vpop.permute.xlu2 %2994 }
 0x5da   : > { %v2082_v53 = vpop.permute.xlu1 %2081 }
 0x5db   : > { %2103 = vst.msk [vmem:[#allocation2 + $0x28] sm:$0xff] %vm402_vm9, %v2082_v53  ;;  %v5125_v45 = vpop.permute.xlu0 %2198  ;;  %vm5455_vm9 = vmmov %vm5447_vm0 }
 0x5dc   : > { %2732 = vrot.lane.b32.xlu0 %v2711_v6, %s4057_s23 }
 0x5dd   : > { %3176 = vrot.lane.b32.xlu1 %v3161_v55, %s4057_s23 }
 0x5e0   : > { %v5111_v61 = vpop.permute.xlu2 %3174 }
 0x5e2   : > { %v3111_v11 = vld [vmem:[#allocation2 + $0x28] sm:$0xfc]  ;;  %v2195_v30 = vpop.permute.xlu1 %2194 }
 0x5e3   : > { %v2943_v52 = vld [vmem:[#allocation2 + $0x28] sm:$0xfc]  ;;  %v3147_v27 = vrot.slane %v3111_v11, 2  ;;  %v3171_v34 = vpop.permute.xlu0 %3170 }
 0x5e4   : > { %v2979_v33 = vrot.slane %v2943_v52, 2  ;;  %v2679_v47 = vld [vmem:[#allocation2 + $0x28] sm:$0xfe] }
 0x5e5   : > { %2744 = vrot.lane.b32.xlu1 %v2729_v10, %s4057_s23  ;;  %v3149_v13 = vsel %vm1165_vm7, %v3147_v27, %v3148_v36  ;;  %v2715_v54 = vrot.slane %v2679_v47, 1  ;;  %v2535_v59 = vld [vmem:[#allocation2 + $0x28] sm:$0xfe] }
 0x5e6   : > { %v2981_v8 = vsel %vm1165_vm7, %v2979_v33, %v2980_v57  ;;  %3168 = vrot.lane.b32.xlu0 %v3149_v13, %s4057_s23  ;;  %v2571_v35 = vrot.slane %v2535_v59, 1  ;;  %v2309_v48 = vld [vmem:[#allocation2 + $0x28] sm:$0xff]  ;;  %vm5454_vm7 = vmmov %vm5447_vm0 }
 0x5e7   : > { %3000 = vrot.lane.b32.xlu2 %v2981_v8, %s4059_s5  ;;  %v2717_v60 = vsel %vm732_vm6, %v2715_v54, %v2716_v56 }
 0x5e8   : > { %v5123_v32 = vpop.permute.xlu2 %2742  ;;  %v2573_v43 = vsel %vm732_vm6, %v2571_v35, %v2572_v23  ;;  %vm5453_vm6 = vmmov %vm5447_vm0 }
 0x5ea   : > { %v5127_v3 = vpop.permute.xlu1 %2334 }
 0x5eb   : > { %v3007_v15 = vpop.permute.xlu0 %3006 }
 0x5ed   : > { %2600 = vrot.lane.b32.xlu1 %v2585_v63, %s4059_s5 }
 0x5ee   : > { %2588 = vrot.lane.b32.xlu0 %v2567_v18, %s4059_s5 }
 0x5ef   : > { %2736 = vrot.lane.b32.xlu2 %v2717_v60, %s4057_s23 }
 0x5f0   : > { %v5133_v26 = vpop.permute.xlu2 %2598 }
 0x5f2   : > { %v5135_v37 = vpop.permute.xlu1 %2738 }
 0x5f3   : > { %v2595_v58 = vpop.permute.xlu0 %2594 }
 0x5f5   : > { %2592 = vrot.lane.b32.xlu1 %v2573_v43, %s4059_s5 }
 0x5f6   : > { %2328 = vrot.lane.b32.xlu0 %v2309_v48, %s4057_s23 }
 0x5f7   : > { %2200 = vrot.lane.b32.xlu2 %v2309_v48, %s4059_s5 }
 0x5f8   : > { %v5139_v24 = vpop.permute.xlu2 %2590 }
 0x5fa   : > { %v3163_v49 = vpop.permute.xlu1 %3162 }
 0x5fb   : > { %v2999_v5 = vpop.permute.xlu0 %2998 }
 0x5fd   : > { %2326 = vrot.lane.b32.xlu1 %v4942_v4, %s4057_s23 }
 0x602   : > { %v5142_v42 = vpop.permute.xlu1 %2730 }
 0x603   : > { %v2735_v0 = vpop.permute.xlu0 %2734 }
 0x60a   : > { %v5151_v51 = vpop.permute.xlu1 %3166 }
 0x60b   : > { %v2333_v46 = vpop.permute.xlu2 %2332 }
 0x60c   : > { %v2340_v7 = vsel %vm643_vm11, %v2331_v12, %v2333_v46 }
 0x60d   : > { %v2346_v53 = vrot.slane %v2340_v7, 4 }
 0x612   : > { %v5153_v29 = vpop.permute.xlu1 %2586 }
 0x613   : > { %v2325_v6 = vpop.permute.xlu2 %2324 }
 0x614   : > { %v2338_v55 = vsel %vm643_vm11, %v2323_v2, %v2325_v6 }
 0x615   : > { %v5146_v22 = vsel %vm418_vm8, %v2346_v53, %v2338_v55  ;;  %v2348_v39 = vrot.slane %v2338_v55, 4 }
 0x617   : > { %v5149_v4 = vsel %vm418_vm8, %v2340_v7, %v2348_v39 }
 0x61b   : > { %v3173_v12 = vpop.permute.xlu2 %3172 }
 0x61d   : > { %v2197_v10 = vpop.permute.xlu0 %2196 }
 0x61e   : > { %v2210_v14 = vsel %vm5448_vm1, %v2195_v30, %v2197_v10 }
 0x61f   : > { %v2220_v16 = vrot.slane %v2210_v14, 4 }
 0x623   : > { %v2205_v11 = vpop.permute.xlu1 %2204  ;;  %v3009_v52 = vpop.permute.xlu2 %3008 }
 0x624   : > { %v2212_v57 = vsel %vm5447_vm0, %v5082_v20, %v2205_v11  ;;  %v3013_v13 = vsel %vm5449_vm2, %v3007_v15, %v3009_v52  ;;  %v3180_v20 = vsel %vm643_vm11, %v3171_v34, %v3173_v12 }
 0x625   : > { %v5155_v27 = vpop.permute.xlu0 %2336  ;;  %v2218_v8 = vrot.slane %v2212_v57, 4  ;;  %v3030_v47 = vrot.slane %v3013_v13, 4  ;;  %v2221_v9 = vsel %vm418_vm8, %v2212_v57, %v2220_v16  ;;  %v3186_v18 = vrot.slane %v3180_v20, 4 }
 0x626   : > { %v5169_v63 = vperm.slane %v2221_v9, %v4314_v41 }
 0x627   : > { %v2219_v28 = vsel %vm418_vm8, %v2218_v8, %v2210_v14 }
 0x628   : > { %v5173_v56 = vperm.slane %v2219_v28, %v4314_v41  ;;  %v2256_v34 = vrot.slane %v5169_v63, 4 }
 0x62a   : > { %v2244_v6 = vrot.slane %v5173_v56, 4 }
 0x62b   : > { %v2209_v36 = vpop.permute.xlu1 %2208  ;;  %v2597_v33 = vpop.permute.xlu2 %2596 }
 0x62c   : > { %v5177_v23 = vsel %vm5452_vm5, %v2595_v58, %v2597_v33  ;;  %v2213_v58 = vsel %vm5454_vm7, %v5089_v21, %v2209_v36 }
 0x62d   : > { %v2741_v2 = vpop.permute.xlu0 %2740  ;;  %v2230_v57 = vrot.slane %v2213_v58, 4 }
 0x633   : > { %v3005_v50 = vpop.permute.xlu1 %3004 }
 0x634   : > { %v3012_v30 = vsel %vm5451_vm4, %v5095_v19, %v3005_v50 }
 0x635   : > { %v3018_v60 = vrot.slane %v3012_v30, 4 }
 0x641   : > { %v3001_v17 = vpop.permute.xlu2 %3000 }
 0x642   : > { %v3011_v25 = vsel %vm5450_vm3, %v2999_v5, %v3001_v17  ;;  %v2610_v5 = vrot.slane %v5177_v23, 4 }
 0x643   : > { %v3031_v38 = vsel %vm418_vm8, %v3030_v47, %v3011_v25  ;;  %v3032_v54 = vrot.slane %v3011_v25, 4 }
 0x644   : > { %v3037_v59 = vperm.slane %v3031_v38, %v4314_v41 }
 0x645   : > { %v3033_v44 = vsel %vm418_vm8, %v3013_v13, %v3032_v54 }
 0x646   : > { %v3165_v35 = vpop.permute.xlu0 %3164  ;;  %v3041_v43 = vperm.slane %v3033_v44, %v4314_v41  ;;  %v3042_v55 = vrot.slane %v3037_v59, 4 }
 0x647   : > { %v2997_v31 = vpop.permute.xlu1 %2996  ;;  %v3178_v48 = vsel %vm643_vm11, %v3163_v49, %v3165_v35 }
 0x648   : > { %v3010_v19 = vsel %vm5453_vm6, %v5102_v1, %v2997_v31  ;;  %v3188_v53 = vrot.slane %v3178_v48, 4  ;;  %v2748_v1 = vsel %vm643_vm11, %v5135_v37, %v2741_v2  ;;  %v3187_v12 = vsel %vm418_vm8, %v3186_v18, %v3178_v48 }
 0x649   : > { %v3019_v15 = vsel %vm418_vm8, %v3018_v60, %v3010_v19  ;;  %v3020_v46 = vrot.slane %v3010_v19, 4  ;;  %v2737_v7 = vpop.permute.xlu2 %2736  ;;  %v3054_v10 = vrot.slane %v3041_v43, 4  ;;  %v5204_v2 = vperm.slane %v3187_v12, %v4314_v41 }
 0x64a   : > { %v3025_v39 = vperm.slane %v3019_v15, %v4314_v41  ;;  %v5198_v36 = vsel %vm643_vm11, %v2735_v0, %v2737_v7  ;;  %v3189_v14 = vsel %vm418_vm8, %v3180_v20, %v3188_v53  ;;  %v2754_v50 = vrot.slane %v2748_v1, 4 }
 0x64b   : > { %v3021_v49 = vsel %vm418_vm8, %v3012_v30, %v3020_v46  ;;  %v2768_v28 = vrot.slane %v5198_v36, 4  ;;  %v5211_v38 = vperm.slane %v3189_v14, %v4314_v41  ;;  %v3212_v31 = vrot.slane %v5204_v2, 4 }
 0x64c   : > { %v3029_v11 = vperm.slane %v3021_v49, %v4314_v41  ;;  %v3043_v52 = vsel %vm418_vm8, %v3042_v55, %v3025_v39  ;;  %v3044_v33 = vrot.slane %v3025_v39, 4 }
 0x64d   : > { %v3049_v21 = vperm.slane %v3043_v52, %v4333_v62 }
 0x64e   : > { %v3045_v37 = vsel %vm418_vm8, %v3037_v59, %v3044_v33  ;;  %v3055_v13 = vsel %vm418_vm8, %v3054_v10, %v3029_v11  ;;  %v3056_v8 = vrot.slane %v3029_v11, 4  ;;  %v2733_v25 = vpop.permute.xlu0 %2732 }
 0x64f   : > { %v3053_v16 = vperm.slane %v3045_v37, %v4333_v62  ;;  %v3061_v47 = vperm.slane %v3055_v13, %v4333_v62  ;;  %v3066_v17 = vrot.slane %v3049_v21, 4  ;;  %v3177_v9 = vpop.permute.xlu1 %3176  ;;  %v2746_v54 = vsel %vm643_vm11, %v5142_v42, %v2733_v25 }
 0x650   : > { %v3057_v0 = vsel %vm418_vm8, %v3041_v43, %v3056_v8  ;;  %v2755_v43 = vsel %vm418_vm8, %v2754_v50, %v2746_v54  ;;  %v2756_v49 = vrot.slane %v2746_v54, 4 }
 0x651   : > { %v3065_v20 = vperm.slane %v3057_v0, %v4333_v62  ;;  %v3067_v30 = vsel %vm418_vm8, 0.0, %v3066_v17  ;;  %v3068_v44 = vrot.slane %v3053_v16, 4  ;;  %v3070_v59 = vrot.slane %v3061_v47, 4  ;;  %3098 = vst [vmem:[#allocation3 + $0xc0] sm:$0xf0] %v3066_v17  ;;  %v2201_v18 = vpop.permute.xlu2 %2200 }
 0x652   : > { %v3083_v60 = vrot.slane %v3067_v30, 4  ;;  %v2211_v35 = vsel %vm5455_vm9, %v5125_v45, %v2201_v18  ;;  %v3224_v45 = vrot.slane %v5211_v38, 4  ;;  %v2761_v12 = vperm.slane %v2755_v43, %v4314_v41 }
 0x653   : > { %v3069_v19 = vsel %vm418_vm8, 0.0, %v3068_v44  ;;  %v3071_v42 = vsel %vm418_vm8, 0.0, %v3070_v59  ;;  %v3072_v48 = vrot.slane %v3065_v20, 4  ;;  %3100 = vst [vmem:[#allocation3 + $0xd0] sm:$0xf0] %v3068_v44  ;;  %v2231_v15 = vsel %vm418_vm8, %v2230_v57, %v2211_v35 }
 0x654   : > { %v3085_v46 = vrot.slane %v3069_v19, 4  ;;  %v3087_v7 = vrot.slane %v3071_v42, 4  ;;  %3099 = vst [vmem:[#allocation3 + $0xc8] sm:$0xf0] %v3083_v60  ;;  %v2232_v53 = vrot.slane %v2211_v35, 4  ;;  %v2237_v55 = vperm.slane %v2231_v15, %v4314_v41 }
 0x655   : > { %v3073_v39 = vsel %vm418_vm8, 0.0, %v3072_v48  ;;  %3102 = vst [vmem:[#allocation3 + $0xe0] sm:$0xf0] %v3070_v59  ;;  %v5232_v57 = vsel %vm643_vm11, %v5111_v61, %v3177_v9  ;;  %v2757_v37 = vsel %vm418_vm8, %v2748_v1, %v2756_v49  ;;  %v2780_v50 = vrot.slane %v2761_v12, 4 }
 0x656   : > { %v3089_v10 = vrot.slane %v3073_v39, 4  ;;  %3101 = vst [vmem:[#allocation3 + $0xd8] sm:$0xf0] %v3085_v46  ;;  %v2233_v11 = vsel %vm418_vm8, %v2213_v58, %v2232_v53  ;;  %v2242_v52 = vrot.slane %v2237_v55, 4  ;;  %v2245_v33 = vsel %vm418_vm8, %v2237_v55, %v2244_v6 }
 0x657   : > { %3103 = vst [vmem:[#allocation3 + $0xe8] sm:$0xf0] %v3087_v7  ;;  %v2241_v21 = vperm.slane %v2233_v11, %v4314_v41  ;;  %v2253_v14 = vperm.slane %v2245_v33, %v4333_v62  ;;  %v2745_v13 = vpop.permute.xlu1 %2744  ;;  %v2765_v58 = vperm.slane %v2757_v37, %v4314_v41  ;;  %v3198_v11 = vrot.slane %v5232_v57, 4 }
 0x658   : > { %3104 = vst [vmem:[#allocation3 + $0xf0] sm:$0xf0] %v3072_v48  ;;  %v2243_v8 = vsel %vm418_vm8, %v2242_v52, %v5173_v56  ;;  %v2749_v6 = vsel %vm643_vm11, %v5123_v32, %v2745_v13  ;;  %v3169_v17 = vpop.permute.xlu0 %3168 }
 0x659   : > { %3105 = vst [vmem:[#allocation3 + $0xf8] sm:$0xf0] %v3089_v10  ;;  %v2249_v61 = vperm.slane %v2243_v8, %v4333_v62  ;;  %v2254_v16 = vrot.slane %v2241_v21, 4  ;;  %v2257_v47 = vsel %vm418_vm8, %v2241_v21, %v2256_v34  ;;  %v2268_v1 = vrot.slane %v2253_v14, 4 }
 0x65a   : > { %v2265_v9 = vperm.slane %v2257_v47, %v4333_v62  ;;  %v2792_v25 = vrot.slane %v2765_v58, 4  ;;  %v2766_v56 = vrot.slane %v2749_v6, 4  ;;  %v2769_v0 = vsel %vm418_vm8, %v2749_v6, %v2768_v28 }
 0x65b   : > { %v2255_v54 = vsel %vm418_vm8, %v2254_v16, %v5169_v63  ;;  %v2266_v32 = vrot.slane %v2249_v61, 4  ;;  %v2269_v20 = vsel %vm418_vm8, 0.0, %v2268_v1  ;;  %2300 = vst [vmem:[#allocation3 + $0x10] sm:$0xf0] %v2268_v1  ;;  %v2777_v30 = vperm.slane %v2769_v0, %v4314_v41 }
 0x65c   : > { %v2261_v44 = vperm.slane %v2255_v54, %v4333_v62  ;;  %v2272_v34 = vrot.slane %v2265_v9, 4  ;;  %v2285_v59 = vrot.slane %v2269_v20, 4  ;;  %v2767_v18 = vsel %vm418_vm8, %v2766_v56, %v5198_v36 }
 0x65d   : > { %v2267_v60 = vsel %vm418_vm8, 0.0, %v2266_v32  ;;  %2298 = vst [vmem:[#allocation3] sm:$0xf0] %v2266_v32  ;;  %v2773_v28 = vperm.slane %v2767_v18, %v4314_v41  ;;  %v2790_v35 = vrot.slane %v2777_v30, 4  ;;  %v2793_v63 = vsel %vm418_vm8, %v2777_v30, %v2792_v25 }
 0x65e   : > { %v2270_v43 = vrot.slane %v2261_v44, 4  ;;  %v2273_v19 = vsel %vm418_vm8, 0.0, %v2272_v34  ;;  %v2283_v42 = vrot.slane %v2267_v60, 4  ;;  %2301 = vst [vmem:[#allocation3 + $0x18] sm:$0xf0] %v2285_v59  ;;  %v2801_v48 = vperm.slane %v2793_v63, %v4333_v62 }
 0x65f   : > { %v2289_v15 = vrot.slane %v2273_v19, 4  ;;  %2304 = vst [vmem:[#allocation3 + $0x30] sm:$0xf0] %v2272_v34  ;;  %v2778_v46 = vrot.slane %v2773_v28, 4  ;;  %v2781_v36 = vsel %vm418_vm8, %v2773_v28, %v2780_v50  ;;  %v2791_v7 = vsel %vm418_vm8, %v2790_v35, %v2765_v58  ;;  %v2601_v53 = vpop.permute.xlu1 %2600 }
 0x660   : > { %v2271_v55 = vsel %vm418_vm8, 0.0, %v2270_v43  ;;  %2299 = vst [vmem:[#allocation3 + $0x8] sm:$0xf0] %v2283_v42  ;;  %v2789_v39 = vperm.slane %v2781_v36, %v4333_v62  ;;  %v2797_v49 = vperm.slane %v2791_v7, %v4333_v62  ;;  %v2808_v10 = vrot.slane %v2801_v48, 4  ;;  %v2589_v58 = vpop.permute.xlu0 %2588 }
 0x661   : > { %v2287_v52 = vrot.slane %v2271_v55, 4  ;;  %2302 = vst [vmem:[#allocation3 + $0x20] sm:$0xf0] %v2270_v43  ;;  %v2779_v33 = vsel %vm418_vm8, %v2778_v46, %v2761_v12  ;;  %v3179_v21 = vsel %vm643_vm11, %v5151_v51, %v3169_v17  ;;  %v2605_v16 = vsel %vm5456_vm10, %v5133_v26, %v2601_v53 }
 0x662   : > { %2305 = vst [vmem:[#allocation3 + $0x38] sm:$0xf0] %v2289_v15  ;;  %v2785_v14 = vperm.slane %v2779_v33, %v4333_v62  ;;  %v2804_v37 = vrot.slane %v2789_v39, 4  ;;  %v2806_v13 = vrot.slane %v2797_v49, 4  ;;  %v2809_v8 = vsel %vm418_vm8, 0.0, %v2808_v10 }
 0x663   : > { %2303 = vst [vmem:[#allocation3 + $0x28] sm:$0xf0] %v2287_v52  ;;  %v2825_v50 = vrot.slane %v2809_v8, 4  ;;  %v3199_v6 = vsel %vm418_vm8, %v3198_v11, %v3179_v21  ;;  %v3200_v61 = vrot.slane %v3179_v21, 4  ;;  %v2602_v56 = vsel %vm5457_vm12, %v5153_v29, %v2589_v58 }
 0x664   : > { %v2802_v12 = vrot.slane %v2785_v14, 4  ;;  %v2805_v47 = vsel %vm418_vm8, 0.0, %v2804_v37  ;;  %v2807_v51 = vsel %vm418_vm8, 0.0, %v2806_v13  ;;  %2836 = vst [vmem:[#allocation3 + $0x90] sm:$0xf0] %v2804_v37  ;;  %v3205_v1 = vperm.slane %v3199_v6, %v4314_v41 }
 0x665   : > { %v2821_v17 = vrot.slane %v2805_v47, 4  ;;  %v2823_v9 = vrot.slane %v2807_v51, 4  ;;  %2838 = vst [vmem:[#allocation3 + $0xa0] sm:$0xf0] %v2806_v13  ;;  %v3201_v25 = vsel %vm418_vm8, %v5232_v57, %v3200_v61  ;;  %v2611_v57 = vsel %vm418_vm8, %v2610_v5, %v2602_v56 }
 0x666   : > { %v2803_v0 = vsel %vm418_vm8, 0.0, %v2802_v12  ;;  %2834 = vst [vmem:[#allocation3 + $0x80] sm:$0xf0] %v2802_v12  ;;  %v3209_v26 = vperm.slane %v3201_v25, %v4314_v41  ;;  %v3210_v54 = vrot.slane %v3205_v1, 4  ;;  %v3213_v32 = vsel %vm418_vm8, %v3205_v1, %v3212_v31 }
 0x667   : > { %v2819_v20 = vrot.slane %v2803_v0, 4  ;;  %2837 = vst [vmem:[#allocation3 + $0x98] sm:$0xf0] %v2821_v17  ;;  %v3221_v30 = vperm.slane %v3213_v32, %v4333_v62  ;;  %v2612_v44 = vrot.slane %v2602_v56, 4  ;;  %v2593_v29 = vpop.permute.xlu1 %2592  ;;  %v2617_v31 = vperm.slane %v2611_v57, %v4314_v41 }
 0x668   : > { %2839 = vst [vmem:[#allocation3 + $0xa8] sm:$0xf0] %v2823_v9  ;;  %v3211_v34 = vsel %vm418_vm8, %v3210_v54, %v5204_v2  ;;  %v3222_v59 = vrot.slane %v3209_v26, 4  ;;  %v3225_v18 = vsel %vm418_vm8, %v3209_v26, %v3224_v45  ;;  %v2622_v63 = vrot.slane %v2605_v16, 4  ;;  %v2329_v33 = vpop.permute.xlu0 %2328  ;;  %v3274_v26 = vld [vmem:[#allocation3 + $0xc0] sm:$0xff] }
 0x669   : > { %2835 = vst [vmem:[#allocation3 + $0x88] sm:$0xf0] %v2819_v20  ;;  %v3217_v60 = vperm.slane %v3211_v34, %v4333_v62  ;;  %v3233_v28 = vperm.slane %v3225_v18, %v4333_v62  ;;  %v3236_v35 = vrot.slane %v3221_v30, 4  ;;  %v2613_v5 = vsel %vm418_vm8, %v5177_v23, %v2612_v44 }
 0x66a   : > { %2840 = vst [vmem:[#allocation3 + $0xb0] sm:$0xf0] %v2808_v10  ;;  %v3223_v2 = vsel %vm418_vm8, %v3222_v59, %v5211_v38  ;;  %v2621_v43 = vperm.slane %v2613_v5, %v4314_v41  ;;  %v2603_v45 = vsel %vm5458_vm14, %v5139_v24, %v2593_v29  ;;  %v2341_v19 = vsel %vm643_vm11, %v5127_v3, %v5155_v27  ;;  %v3277_v59 = vld [vmem:[#allocation3 + $0xd8] sm:$0xff] }
 0x66b   : > { %2841 = vst [vmem:[#allocation3 + $0xb8] sm:$0xf0] %v2825_v50  ;;  %v3229_v42 = vperm.slane %v3223_v2, %v4333_v62  ;;  %v3234_v48 = vrot.slane %v3217_v60, 4  ;;  %v3237_v23 = vsel %vm418_vm8, 0.0, %v3236_v35  ;;  %v3240_v15 = vrot.slane %v3233_v28, 4  ;;  %v3275_v60 = vld [vmem:[#allocation3 + $0xc8] sm:$0xff] }
 0x66c   : > { %3774 = vst.sshfl [vmem:[#allocation3 + $0x100] sm:$0x55 pattern:$0x73516240] %v3211_v34  ;;  %v2623_v38 = vsel %vm418_vm8, %v2622_v63, %v2603_v45  ;;  %v2624_v46 = vrot.slane %v2603_v45, 4  ;;  %v2636_v24 = vrot.slane %v2617_v31, 4  ;;  %v5315_v3 = vperm.slane %v5146_v22, %v4314_v41 }
 0x66d   : > { %v3235_v36 = vsel %vm418_vm8, 0.0, %v3234_v48  ;;  %v3238_v7 = vrot.slane %v3229_v42, 4  ;;  %3245 = vst [vmem:[#allocation3 + $0x118] sm:$0xf] %v3237_v23  ;;  %v2629_v53 = vperm.slane %v2623_v38, %v4314_v41  ;;  %v2358_v27 = vrot.slane %v2341_v19, 4 }
 0x66e   : > { %3243 = vst [vmem:[#allocation3 + $0x108] sm:$0xf] %v3235_v36  ;;  %v2648_v55 = vrot.slane %v2621_v43, 4  ;;  %v2625_v39 = vsel %vm418_vm8, %v2605_v16, %v2624_v46  ;;  %v2357_v14 = vperm.slane %v5149_v4, %v4314_v41  ;;  %v3241_v22 = vsel %vm418_vm8, 0.0, %v3240_v15 }
 0x66f   : > { %v3239_v49 = vsel %vm418_vm8, 0.0, %v3238_v7  ;;  %3775 = vst.sshfl [vmem:[#allocation3 + $0x110] sm:$0x55 pattern:$0x73516240] %v3213_v32  ;;  %v2633_v10 = vperm.slane %v2625_v39, %v4314_v41  ;;  %v2634_v11 = vrot.slane %v2629_v53, 4  ;;  %v2637_v52 = vsel %vm418_vm8, %v2629_v53, %v2636_v24  ;;  %v2327_v21 = vpop.permute.xlu1 %2326 }
 0x670   : > { %3776 = vst.sshfl [vmem:[#allocation3 + $0x120] sm:$0x55 pattern:$0x73516240] %v3223_v2  ;;  %v2645_v37 = vperm.slane %v2637_v52, %v4333_v62  ;;  %v2339_v13 = vsel %vm643_vm11, %v2327_v21, %v2329_v33  ;;  %v2372_v47 = vrot.slane %v5315_v3, 4  ;;  %v2384_v9 = vrot.slane %v2357_v14, 4 }
 0x671   : > { %3247 = vst [vmem:[#allocation3 + $0x128] sm:$0xf] %v3239_v49  ;;  %v2635_v8 = vsel %vm418_vm8, %v2634_v11, %v2617_v31  ;;  %v2646_v58 = vrot.slane %v2633_v10, 4  ;;  %v2649_v50 = vsel %vm418_vm8, %v2633_v10, %v2648_v55  ;;  %v2359_v6 = vsel %vm418_vm8, %v2358_v27, %v2339_v13  ;;  %v3276_v31 = vld [vmem:[#allocation3 + $0xd0] sm:$0xff]  ;;  %v3250_v11 = vld [vmem:[#allocation3] sm:$0xff] }
 0x672   : > { %3777 = vst.sshfl [vmem:[#allocation3 + $0x130] sm:$0x55 pattern:$0x73516240] %v3225_v18  ;;  %v2641_v61 = vperm.slane %v2635_v8, %v4333_v62  ;;  %v2657_v4 = vperm.slane %v2649_v50, %v4333_v62  ;;  %v2660_v16 = vrot.slane %v2645_v37, 4  ;;  %v2360_v12 = vrot.slane %v2339_v13, 4 }
 0x673   : > { %3249 = vst [vmem:[#allocation3 + $0x138] sm:$0xf] %v3241_v22  ;;  %v2647_v51 = vsel %vm418_vm8, %v2646_v58, %v2621_v43  ;;  %v3282_v1 = vld [vmem:[#allocation3 + $0x100] sm:$0xf]  ;;  %v2365_v17 = vperm.slane %v2359_v6, %v4314_v41  ;;  %v3252_v21 = vld [vmem:[#allocation3 + $0x10] sm:$0xff]  ;;  %v3253_v37 = vld [vmem:[#allocation3 + $0x18] sm:$0xff] }
 0x674   : > { %v2653_v25 = vperm.slane %v2647_v51, %v4333_v62  ;;  %v2658_v56 = vrot.slane %v2641_v61, 4  ;;  %v2661_v0 = vsel %vm418_vm8, 0.0, %v2660_v16  ;;  %3778 = vmatpush.msk.msra.mxu0 %vm1602_vm13, %v3282_v1  ;;  %v3285_v54 = vld [vmem:[#allocation3 + $0x118] sm:$0xf]  ;;  %v2361_v20 = vsel %vm418_vm8, %v2341_v19, %v2360_v12  ;;  %v3278_v13 = vld [vmem:[#allocation3 + $0xe0] sm:$0xff]  ;;  %v3256_v1 = vld [vmem:[#allocation3 + $0x30] sm:$0xff] }
 0x675   : > { %3766 = vst.sshfl [vmem:[#allocation3 + $0x80] sm:$0x55 pattern:$0x73516240] %v2635_v8  ;;  %3784 = vmatpush.msk.msra.mxu3 %vm1602_vm13, %v3285_v54  ;;  %v3283_v32 = vld [vmem:[#allocation3 + $0x108] sm:$0xf]  ;;  %v2373_v30 = vsel %vm418_vm8, %v2365_v17, %v2372_v47  ;;  %v2369_v18 = vperm.slane %v2361_v20, %v4314_v41 }
 0x676   : > { %v3284_v57 = vld [vmem:[#allocation3 + $0x110] sm:$0xf]  ;;  %v2659_v44 = vsel %vm418_vm8, 0.0, %v2658_v56  ;;  %v2662_v29 = vrot.slane %v2653_v25, 4  ;;  %v2664_v34 = vrot.slane %v2657_v4, 4  ;;  %3329 = vmatpush.msra.mxu0 %v3274_v26  ;;  %3780 = vmatpush.msk.msra.mxu1 %vm1602_vm13, %v3283_v32  ;;  %v2370_v28 = vrot.slane %v2365_v17, 4 }
 0x677   : > { %3782 = vmatpush.msk.msra.mxu2 %vm1602_vm13, %v3284_v57  ;;  %2667 = vst [vmem:[#allocation3 + $0x88] sm:$0xf] %v2659_v44  ;;  %3389 = vmatpush.msra.mxu3 %v3277_v59  ;;  %v2381_v35 = vperm.slane %v2373_v30, %v4333_v62  ;;  %v2382_v2 = vrot.slane %v2369_v18, 4  ;;  %v2385_v63 = vsel %vm418_vm8, %v2369_v18, %v2384_v9  ;;  %v3286_v33 = vld [vmem:[#allocation3 + $0x120] sm:$0xf]  ;;  %v3280_v8 = vld [vmem:[#allocation3 + $0xf0] sm:$0xff] }
 0x678   : > { %v2663_v5 = vsel %vm418_vm8, 0.0, %v2662_v29  ;;  %3767 = vst.sshfl [vmem:[#allocation3 + $0x90] sm:$0x55 pattern:$0x73516240] %v2637_v52  ;;  %3349 = vmatpush.msra.mxu1 %v3275_v60  ;;  %v2371_v41 = vsel %vm418_vm8, %v2370_v28, %v5315_v3  ;;  %v2393_v43 = vperm.slane %v2385_v63, %v4333_v62  ;;  %v2665_v19 = vsel %vm418_vm8, 0.0, %v2664_v34 }
 0x679   : > { %2669 = vst [vmem:[#allocation3 + $0x98] sm:$0xf] %v2661_v0  ;;  %3369 = vmatpush.msra.mxu2 %v3276_v31  ;;  %v2396_v45 = vrot.slane %v2381_v35, 4  ;;  %v2377_v42 = vperm.slane %v2371_v41, %v4333_v62  ;;  %v2383_v48 = vsel %vm418_vm8, %v2382_v2, %v2357_v14  ;;  %v2109_v14 = vld [vmem:[#allocation9] sm:$0xf]  ;;  %v3281_v4 = vld [vmem:[#allocation3 + $0xf8] sm:$0xff] }
 0x67a   : > { %3768 = vst.sshfl [vmem:[#allocation3 + $0xa0] sm:$0x55 pattern:$0x73516240] %v2647_v51  ;;  %v2389_v23 = vperm.slane %v2383_v48, %v4333_v62  ;;  %v2400_v7 = vrot.slane %v2393_v43, 4  ;;  %v3279_v17 = vld [vmem:[#allocation3 + $0xe8] sm:$0xff] }
 0x67b   : > { %2671 = vst [vmem:[#allocation3 + $0xa8] sm:$0xf] %v2663_v5  ;;  %v2394_v15 = vrot.slane %v2377_v42, 4  ;;  %v2397_v46 = vsel %vm418_vm8, 0.0, %v2396_v45  ;;  %v3288_v22 = vld [vmem:[#allocation3 + $0x130] sm:$0xf] }
 0x67c   : > { %3769 = vst.sshfl [vmem:[#allocation3 + $0xb0] sm:$0x55 pattern:$0x73516240] %v2649_v50  ;;  %v3266_v38 = vld [vmem:[#allocation3 + $0x80] sm:$0xff]  ;;  %v2398_v36 = vrot.slane %v2389_v23, 4 }
 0x67d   : > { %2673 = vst [vmem:[#allocation3 + $0xb8] sm:$0xf] %v2665_v19  ;;  %3330 = vmatpush.msra.mxu0 %v3266_v38  ;;  %v2395_v24 = vsel %vm418_vm8, 0.0, %v2394_v15  ;;  %v2401_v55 = vsel %vm418_vm8, 0.0, %v2400_v7  ;;  %v3289_v58 = vld [vmem:[#allocation3 + $0x138] sm:$0xf] }
 0x67e   : > { %3762 = vst.sshfl [vmem:[#allocation3 + $0x40] sm:$0x55 pattern:$0x73516240] %v2371_v41  ;;  %v3267_v53 = vld [vmem:[#allocation3 + $0x88] sm:$0xff]  ;;  %v2399_v27 = vsel %vm418_vm8, 0.0, %v2398_v36 }
 0x67f   : > { %2403 = vst [vmem:[#allocation3 + $0x48] sm:$0xf] %v2395_v24  ;;  %v3268_v3 = vld [vmem:[#allocation3 + $0x90] sm:$0xff]  ;;  %3350 = vmatpush.msra.mxu1 %v3267_v53  ;;  %vm5459_vm8 = vcmask 293888   ;;  %v3251_v50 = vld [vmem:[#allocation3 + $0x8] sm:$0xff]  ;;  %v3254_v9 = vld [vmem:[#allocation3 + $0x20] sm:$0xff] }
 0x680   : > { %3763 = vst.sshfl [vmem:[#allocation3 + $0x50] sm:$0x55 pattern:$0x73516240] %v2373_v30  ;;  %3370 = vmatpush.msra.mxu2 %v3268_v3  ;;  %v3269_v62 = vld [vmem:[#allocation3 + $0x98] sm:$0xff]  ;;  %vm5460_vm11 = vmmov %vm5459_vm8  ;;  %v3255_v54 = vld [vmem:[#allocation3 + $0x28] sm:$0xff] }
 0x681   : > { %2405 = vst [vmem:[#allocation3 + $0x58] sm:$0xf] %v2397_v46  ;;  %3390 = vmatpush.msra.mxu3 %v3269_v62  ;;  %vm5461_vm15 = vmmov %vm5459_vm8  ;;  %v3270_v61 = vld [vmem:[#allocation3 + $0xa0] sm:$0xff]  ;;  %v3287_v12 = vld [vmem:[#allocation3 + $0x128] sm:$0xf] }
 0x682   : > { %3764 = vst.sshfl [vmem:[#allocation3 + $0x60] sm:$0x55 pattern:$0x73516240] %v2383_v48  ;;  %vm5462_vm0 = vmmov %vm5459_vm8  ;;  %v3271_v56 = vld [vmem:[#allocation3 + $0xa8] sm:$0xff]  ;;  %v3257_v0 = vld [vmem:[#allocation3 + $0x38] sm:$0xff] }
 0x683   : > { %2407 = vst [vmem:[#allocation3 + $0x68] sm:$0xf] %v2399_v27  ;;  %v3272_v6 = vld [vmem:[#allocation3 + $0xb0] sm:$0xff]  ;;  %vm5463_vm1 = vmmov %vm5462_vm0 }
 0x684   : > { %3765 = vst.sshfl [vmem:[#allocation3 + $0x70] sm:$0x55 pattern:$0x73516240] %v2385_v63  ;;  %v3273_v51 = vld [vmem:[#allocation3 + $0xb8] sm:$0xff]  ;;  %vm5464_vm2 = vmmov %vm5462_vm0 }
 0x685   : > { %2409 = vst [vmem:[#allocation3 + $0x78] sm:$0xf] %v2401_v55  ;;  %v3258_v39 = vld [vmem:[#allocation3 + $0x40] sm:$0xff]  ;;  %vm5465_vm3 = vmmov %vm5462_vm0 }
 0x686   : > { %3331 = vmatpush.msra.mxu0 %v3258_v39  ;;  %v3259_v49 = vld [vmem:[#allocation3 + $0x48] sm:$0xff]  ;;  %vm5466_vm4 = vmmov %vm5462_vm0 }
 0x687   : > { %v3260_v10 = vld [vmem:[#allocation3 + $0x50] sm:$0xff]  ;;  %3351 = vmatpush.msra.mxu1 %v3259_v49 }
 0x688   : > { %3371 = vmatpush.msra.mxu2 %v3260_v10  ;;  %3332 = vmatpush.msra.mxu0 %v3250_v11  ;;  %v3261_v52 = vld [vmem:[#allocation3 + $0x58] sm:$0xff] }
 0x689   : > { %3391 = vmatpush.msra.mxu3 %v3261_v52  ;;  %3779 = vmatmul.msk.f32.vlgmr.msra.gmra.mxu0 %vm5459_vm8, %v2109_v14  ;;  %v3262_v47 = vld [vmem:[#allocation3 + $0x60] sm:$0xff] }
 0x68a   : > { %3786 = vmatpush.msk.msrb.mxu0 %vm1602_vm13, %v3286_v33  ;;  %3372 = vmatpush.msra.mxu2 %v3252_v21  ;;  %v3263_v26 = vld [vmem:[#allocation3 + $0x68] sm:$0xff] }
 0x68b   : > { %3392 = vmatpush.msra.mxu3 %v3253_v37  ;;  %3783 = vmatmul.msk.f32.vlgmr.msra.gmra.mxu2 %vm5460_vm11, %v2109_v14  ;;  %v3264_v16 = vld [vmem:[#allocation3 + $0x70] sm:$0xff] }
 0x68c   : > { %3790 = vmatpush.msk.msrb.mxu2 %vm1602_vm13, %v3288_v22  ;;  %3409 = vmatpush.msrb.mxu0 %v3278_v13  ;;  %v3265_v25 = vld [vmem:[#allocation3 + $0x78] sm:$0xff] }
 0x68d   : > { %3785 = vmatmul.msk.f32.vlgmr.msra.gmra.mxu3 %vm5461_vm15, %v2109_v14  ;;  %3352 = vmatpush.msra.mxu1 %v3251_v50 }
 0x68e   : > { %3449 = vmatpush.msrb.mxu2 %v3280_v8  ;;  %3792 = vmatpush.msk.msrb.mxu3 %vm1602_vm13, %v3289_v58 }
 0x68f   : > { %3410 = vmatpush.msrb.mxu0 %v3270_v61  ;;  %3781 = vmatmul.msk.f32.vlgmr.msra.gmra.mxu1 %vm5462_vm0, %v2109_v14 }
 0x690   : > { %3450 = vmatpush.msrb.mxu2 %v3272_v6  ;;  %3469 = vmatpush.msrb.mxu3 %v3281_v4 }
 0x691   : > { %3788 = vmatpush.msk.msrb.mxu1 %vm1602_vm13, %v3287_v12  ;;  %3411 = vmatpush.msrb.mxu0 %v3262_v47 }
 0x692   : > { %3451 = vmatpush.msrb.mxu2 %v3264_v16  ;;  %3470 = vmatpush.msrb.mxu3 %v3273_v51 }
 0x693   : > { %3429 = vmatpush.msrb.mxu1 %v3279_v17  ;;  %3412 = vmatpush.msrb.mxu0 %v3254_v9 }
 0x694   : > { %3452 = vmatpush.msrb.mxu2 %v3256_v1  ;;  %3471 = vmatpush.msrb.mxu3 %v3265_v25 }
 0x695   : > { %3430 = vmatpush.msrb.mxu1 %v3271_v56  ;;  %3791 = vmatmul.msk.f32.vlgmr.msrb.gmra.mxu2 %vm5463_vm1, %v2109_v14 }
 0x696   : > { %3787 = vmatmul.msk.f32.vlgmr.msrb.gmra.mxu0 %vm5464_vm2, %v2109_v14  ;;  %3472 = vmatpush.msrb.mxu3 %v3257_v0 }
 0x697   : > { %3431 = vmatpush.msrb.mxu1 %v3263_v26  ;;  %3793 = vmatmul.msk.f32.vlgmr.msrb.gmra.mxu3 %vm5465_vm3, %v2109_v14 }
 0x699   : > { %3432 = vmatpush.msrb.mxu1 %v3255_v54 }
 0x69a   : > { %3789 = vmatmul.msk.f32.vlgmr.msrb.gmra.mxu1 %vm5466_vm4, %v2109_v14 }
 0x706   : > { %v3334_v32 = vpop.f32.mrf.mxu0 }
 0x707   : > { %v3477_v20 = vsel %vm1602_vm13, %v3334_v32, 0.0 }
 0x70c   : > { %v3354_v30 = vpop.f32.mrf.mxu1 }
 0x70d   : > { %v3478_v57 = vsel %vm1602_vm13, %v3354_v30, 0.0 }
 0x70e   : > { %v3479_v44 = vadd.f32 %v3478_v57, %v3477_v20  ;;  %v3374_v29 = vpop.f32.mrf.mxu2  ;;  %v3796_v57 = vld [vmem:[%s4189_s4 + $0x3] ss:$8 sm:$0xf] }
 0x70f   : > { %v3480_v34 = vsel %vm1602_vm13, %v3374_v29, 0.0 }
 0x710   : > { %v3394_v59 = vpop.f32.mrf.mxu3  ;;  %v3481_v18 = vadd.f32 %v3480_v34, %v3479_v44 }
 0x711   : > { %v3482_v31 = vsel %vm1602_vm13, %v3394_v59, 0.0 }
 0x712   : > { %v3483_v60 = vadd.f32 %v3482_v31, %v3481_v18  ;;  %v3798_v18 = vld [vmem:[%s4189_s4 + $0x5] ss:$8 sm:$0xf]  ;;  %v3800_v31 = vld [vmem:[%s4189_s4 + $0x7] ss:$8 sm:$0xf] }
 0x713   : > { %v3414_v28 = vpop.f32.mrf.mxu0 }
 0x714   : > { %v3484_v35 = vsel %vm1602_vm13, %v3414_v28, 0.0 }
 0x715   : > { %v3485_v5 = vadd.f32 %v3484_v35, %v3483_v60 }
 0x717   : > { %v3434_v2 = vpop.f32.mrf.mxu1 }
 0x718   : > { %v3486_v63 = vsel %vm1602_vm13, %v3434_v2, 0.0  ;;  %v3454_v41 = vpop.f32.mrf.mxu2 }
 0x719   : > { %v3487_v43 = vadd.f32 %v3486_v63, %v3485_v5  ;;  %v3488_v45 = vsel %vm1602_vm13, %v3454_v41, 0.0  ;;  %v3795_v63 = vld [vmem:[%s4189_s4 + $0x2] ss:$8 sm:$0xf] }
 0x71a   : > { %v3474_v19 = vpop.f32.mrf.mxu3 }
 0x71b   : > { %v3489_v42 = vadd.f32 %v3488_v45, %v3487_v43  ;;  %v3490_v48 = vsel %vm1602_vm13, %v3474_v19, 0.0  ;;  %v3799_v43 = vld [vmem:[%s4189_s4 + $0x6] ss:$8 sm:$0xf] }
 0x71d   : > { %v3491_v23 = vadd.f32 %v3490_v48, %v3489_v42 }
 0x71f   : > { %3492 = vadd.xlane.f32.xlu2 %v3491_v23 }
 0x792   : > { %v3493_v15 = vpop.xlane.xlu2 %3492 }
 0x793   : > { %v3494_v38 = vmul.f32 %v3493_v15, %v4798_v40 }
 0x795   : > { %v3495_v46 = vsub.f32 %v3334_v32, %v3494_v38  ;;  %v3496_v36 = vsub.f32 %v3354_v30, %v3494_v38  ;;  %v3497_v7 = vsub.f32 %v3374_v29, %v3494_v38  ;;  %v3498_v24 = vsub.f32 %v3394_v59, %v3494_v38 }
 0x796   : > { %v3499_v53 = vsub.f32 %v3414_v28, %v3494_v38  ;;  %v3500_v55 = vsub.f32 %v3434_v2, %v3494_v38  ;;  %v3501_v52 = vsub.f32 %v3454_v41, %v3494_v38  ;;  %v3502_v22 = vsub.f32 %v3474_v19, %v3494_v38  ;;  %v3548_v2 = vld [vmem:[%s4189_s4] ss:$8 sm:$0xf]  ;;  %v3797_v41 = vld [vmem:[%s4189_s4 + $0x4] ss:$8 sm:$0xf] }
 0x797   : > { %v3503_v3 = vmul.f32 %v3495_v46, %v3495_v46  ;;  %v3504_v27 = vmul.f32 %v3496_v36, %v3496_v36  ;;  %v3505_v62 = vmul.f32 %v3497_v7, %v3497_v7  ;;  %v3506_v39 = vmul.f32 %v3498_v24, %v3498_v24 }
 0x798   : > { %v3507_v33 = vmul.f32 %v3499_v53, %v3499_v53  ;;  %v3508_v37 = vmul.f32 %v3500_v55, %v3500_v55  ;;  %v3509_v58 = vmul.f32 %v3501_v52, %v3501_v52  ;;  %v3510_v61 = vmul.f32 %v3502_v22, %v3502_v22 }
 0x799   : > { %v3511_v49 = vsel %vm1602_vm13, %v3503_v3, 0.0  ;;  %v3512_v10 = vsel %vm1602_vm13, %v3504_v27, 0.0  ;;  %v3514_v21 = vsel %vm1602_vm13, %v3505_v62, 0.0  ;;  %v3516_v13 = vsel %vm1602_vm13, %v3506_v39, 0.0 }
 0x79a   : > { %v3513_v11 = vadd.f32 %v3512_v10, %v3511_v49  ;;  %v3518_v50 = vsel %vm1602_vm13, %v3507_v33, 0.0  ;;  %v3520_v4 = vsel %vm1602_vm13, %v3508_v37, 0.0  ;;  %v3522_v12 = vsel %vm1602_vm13, %v3509_v58, 0.0 }
 0x79b   : > { %v3524_v51 = vsel %vm1602_vm13, %v3510_v61, 0.0 }
 0x79c   : > { %v3515_v14 = vadd.f32 %v3514_v21, %v3513_v11 }
 0x79e   : > { %v3517_v8 = vadd.f32 %v3516_v13, %v3515_v14 }
 0x7a0   : > { %v3519_v6 = vadd.f32 %v3518_v50, %v3517_v8 }
 0x7a2   : > { %v3521_v16 = vadd.f32 %v3520_v4, %v3519_v6 }
 0x7a4   : > { %v3523_v47 = vadd.f32 %v3522_v12, %v3521_v16 }
 0x7a6   : > { %v3525_v1 = vadd.f32 %v3524_v51, %v3523_v47 }
 0x7a8   : > { %3526 = vadd.xlane.f32.xlu1 %v3525_v1 }
 0x81b   : > { %v3527_v17 = vpop.xlane.xlu1 %3526 }
 0x81c   : > { %v3528_v9 = vmul.f32 %v3527_v17, %v4798_v40  ;;  %v3794_v40 = vld [vmem:[%s4189_s4 + $0x1] ss:$8 sm:$0xf] }
 0x81e   : > { %v3529_v25 = vadd.f32 1e-05, %v3528_v9 }
 0x820   : > { %3888 = vrsqrt.f32 %v3529_v25  ;;  %vm3536_vm6 = vweird.f32 %v3529_v25 }
 0x826   : > { %v3889_v56 = vpop.eup %3888 }
 0x827   : > { %v3531_v0 = vmul.f32 %v3889_v56, %v3529_v25  ;;  %vm3537_vm5 = vweird.f32 %v3889_v56 }
 0x828   : > { %vm3538_vm7 = vmor %vm3536_vm6, %vm3537_vm5 }
 0x829   : > { %v3532_v26 = vmul.f32 %v3889_v56, %v3531_v0 }
 0x82b   : > { %v3533_v54 = vmul.f32 0.5, %v3532_v26 }
 0x82d   : > { %v3534_v32 = vsub.f32 1.5, %v3533_v54 }
 0x82f   : > { %v3535_v20 = vmul.f32 %v3889_v56, %v3534_v32 }
 0x831   : > { %v3539_v30 = vsel %vm3538_vm7, %v3889_v56, %v3535_v20 }
 0x832   : > { %v3540_v44 = vmul.f32 %v3539_v30, %v3495_v46  ;;  %v3541_v29 = vmul.f32 %v3539_v30, %v3496_v36  ;;  %v3542_v34 = vmul.f32 %v3539_v30, %v3497_v7  ;;  %v3543_v59 = vmul.f32 %v3539_v30, %v3498_v24 }
 0x833   : > { %v3544_v60 = vmul.f32 %v3539_v30, %v3499_v53  ;;  %v3545_v28 = vmul.f32 %v3539_v30, %v3500_v55  ;;  %v3546_v35 = vmul.f32 %v3539_v30, %v3501_v52  ;;  %v3547_v5 = vmul.f32 %v3539_v30, %v3502_v22 }
 0x834   : > { %v3572_v45 = vadd.f32 %v3794_v40, %v3541_v29  ;;  %v3574_v19 = vadd.f32 %v3796_v57, %v3543_v59  ;;  %v3571_v23 = vadd.f32 %v3548_v2, %v3540_v44  ;;  %v3573_v15 = vadd.f32 %v3795_v63, %v3542_v34 }
 0x835   : > { %v3576_v42 = vadd.f32 %v3798_v18, %v3545_v28  ;;  %v3578_v48 = vadd.f32 %v3800_v31, %v3547_v5  ;;  %v3575_v36 = vadd.f32 %v3797_v41, %v3544_v60  ;;  %v3577_v7 = vadd.f32 %v3799_v43, %v3546_v35 }
 0x836   : > { %v3587_v38 = vrot.slane %v3572_v45, 4  ;;  %v3588_v46 = vrot.slane %v3574_v19, 4 }
 0x837   : > { %v3589_v24 = vrot.slane %v3576_v42, 4  ;;  %v3590_v53 = vrot.slane %v3578_v48, 4 }
 0x838   : > { %v3591_v3 = vsel %vm1602_vm13, %v3571_v23, %v3587_v38  ;;  %v3592_v27 = vsel %vm1602_vm13, %v3573_v15, %v3588_v46 }
 0x839   : > { %v3593_v62 = vsel %vm1602_vm13, %v3575_v36, %v3589_v24  ;;  %v3594_v55 = vsel %vm1602_vm13, %v3577_v7, %v3590_v53  ;;  %3599 = vst [vmem:[%s219_s7] sm:$0xff] %v3591_v3 }
 0x83a   : > { %3600 = vst [vmem:[%s219_s7 + $0x8] sm:$0xff] %v3592_v27 }
 0x83b   : > { %3601 = vst [vmem:[%s219_s7 + $0x10] sm:$0xff] %v3593_v62 }
 0x83c   : > { %3602 = vst [vmem:[%s219_s7 + $0x18] sm:$0xff] %v3594_v55 }
 0x83d   : > { %4007 = shalt.err (!%p4004_p8)
}
 0x83e   : > { %3818 = dma.vmem_to_hbm [thread:$0]  (%p4135_p11), %s3618_s9, 512, %s3620_s10, %s3604_s20  }
 0x83f PF: > { %s3631_s27 = sand.u32 1, %s4038_s12   ;;  %p5467_p9 = scmp.ge.s32.totalorder %s4050_s15, 2 }
 0x840   : > { %s3632_s23 = scalar_lea.sflag [#allocation6], %s3631_s27 }
 0x841   : > { %p3832_p10 = pnand %p5467_p9, %p4139_p12 }
 0x843   : > { %p3833_p1 = pneg %p3832_p10 }
 0x845   : > { %4033 = dma.done.wait (%p3833_p1), %s3632_s23, 512  }
 0x846   : > { %4035 = vsyncadd (%p3833_p1), %s3632_s23, 4294966784  ;;  %p17_p2 = scmp.ge.s32.totalorder %s4108_s18, 4   ;;  %s5468_s12 = smov %s4042_s13 }
 0x847   : > { %s5469_s13 = smov %s4046_s14  ;;  %s5470_s14 = smov %s4120_s21 }
 0x848   : > { %s5471_s15 = smov %s4108_s18  ;;  %19 = sbr.rel (!%p17_p2) target bundleno = 6 (0x6), region = 92 }
 0x84d   :  { %3638 = vsyncpa [#allocation5], 1 }
 0x84e   :  { %3640 = vsyncpa [#allocation5 + $0x1], 1 }
 0x84f   :  { %3641 = vsyncpa [#allocation8], 1 }
 0x850   :  { %3642 = vsyncpa [#allocation6], 1 }
 0x851   :  { %3644 = vsyncpa [#allocation6 + $0x1], 1 }

</bundles_post_ra>
